<compile_context>
chip_gen: v5e
topology: v5e:2x2
jax: 0.10.0
libtpu: 0.0.40
codegen_flags: <defaults>
</compile_context>

<pallas_src>
import functools
import math

import jax
import jax.numpy as jnp
from jax.experimental import pallas as pl
from jax.experimental.pallas import tpu as pltpu


def _fused_kernel(q_ref, kv_ref, wq_ref, wkv_ref, vecs_ref, m_ref, mt_ref, w9c_ref,
                  o_ref,
                  a0_sc, bs_sc, vp_sc, qa_sc, a_sc,
                  *, eps, scale, w_sp, tq, pad, epi_chunk):
    c, sq = q_ref.shape
    sk = kv_ref.shape[1]
    g = m_ref.shape[1]
    cpg = c // g
    t = pl.program_id(1)

    # ---- once per image (t == 0): GN stats + K/V projection + score-weight fold ----
    @pl.when(t == 0)
    def _():
        qx = q_ref[...]                                    # [C, Sq] f32
        kx = kv_ref[...]                                   # [C, Sk] f32
        # Pack the four per-channel reductions into one [C, 4] matrix so the group
        # reduction is a single pair of tiny matmuls.
        lane4 = jax.lax.broadcasted_iota(jnp.int32, (1, 4), 1)
        s_all = (jnp.where(lane4 == 0, jnp.sum(qx, axis=1, keepdims=True), 0.0)
                 + jnp.where(lane4 == 1, jnp.sum(qx * qx, axis=1, keepdims=True), 0.0)
                 + jnp.where(lane4 == 2, jnp.sum(kx, axis=1, keepdims=True), 0.0)
                 + jnp.where(lane4 == 3, jnp.sum(kx * kx, axis=1, keepdims=True), 0.0))
        g_all = jnp.dot(mt_ref[...], s_all, preferred_element_type=jnp.float32,
                        precision=jax.lax.Precision.HIGHEST)            # [G, 4]
        c_all = jnp.dot(m_ref[...], g_all, preferred_element_type=jnp.float32,
                        precision=jax.lax.Precision.HIGHEST)            # [C, 4]

        bq = vecs_ref[:, 0:1]
        bk = vecs_ref[:, 1:2]
        bv = vecs_ref[:, 2:3]
        gw = vecs_ref[:, 3:4]
        gb = vecs_ref[:, 4:5]

        cnt_q = jnp.float32(sq * cpg)
        mean_q = c_all[:, 0:1] / cnt_q
        var_q = jnp.maximum(c_all[:, 1:2] / cnt_q - mean_q * mean_q, 0.0)
        alpha_q = jax.lax.rsqrt(var_q + eps) * gw
        beta_q = gb - mean_q * alpha_q
        qa_sc[...] = alpha_q

        cnt_k = jnp.float32(sk * cpg)
        mean_k = c_all[:, 2:3] / cnt_k
        var_k = jnp.maximum(c_all[:, 3:4] / cnt_k - mean_k * mean_k, 0.0)
        alpha_k = jax.lax.rsqrt(var_k + eps) * gw
        kvn = (kx * alpha_k + (gb - mean_k * alpha_k)).astype(jnp.bfloat16)

        # Single stacked K/V projection: [2C,C] @ [C,Sk].
        kvp = jnp.dot(wkv_ref[...], kvn, preferred_element_type=jnp.float32)
        kp = kvp[0:c, :] + bk                              # [C, Sk]
        vp_sc[...] = (kvp[c:2 * c, :] + bv).astype(jnp.bfloat16)

        # Fold Wq, the GN shift and bq into the score weights (once per image).
        kpT = ((kp * scale).T).astype(jnp.bfloat16)        # [Sk, C]
        wq = wq_ref[...]                                   # [C, C] bf16
        a0_sc[...] = jnp.dot(kpT, wq,
                             preferred_element_type=jnp.float32).astype(jnp.bfloat16)
        qbias = (jnp.dot(wq, beta_q.astype(jnp.bfloat16),
                         preferred_element_type=jnp.float32) + bq).astype(jnp.bfloat16)
        bs_sc[...] = jnp.dot(kpT, qbias, preferred_element_type=jnp.float32)

        # Zero ONLY the conv halo columns (interior is fully overwritten by q tiles).
        a_sc[:, 0:pad] = jnp.zeros((c, pad), a_sc.dtype)
        a_sc[:, pad + sq:pad + sq + pad] = jnp.zeros((c, pad), a_sc.dtype)

    # ---- every q tile: GN scale + folded projection + attention, one MXU matmul ----
    idx = t * tq
    if tq % 128 == 0:
        idx = pl.multiple_of(idx, 128)
    qt = (q_ref[:, pl.ds(idx, tq)] * qa_sc[...]).astype(jnp.bfloat16)    # [C, tq]
    st = jnp.dot(a0_sc[...], qt, preferred_element_type=jnp.float32) + bs_sc[...]
    st_max = jnp.max(st, axis=0, keepdims=True)
    p = jnp.exp(st - st_max)
    denom = jnp.sum(p, axis=0, keepdims=True)
    a_t = jnp.dot(vp_sc[...], p.astype(jnp.bfloat16),
                  preferred_element_type=jnp.float32)                    # [C, tq]
    a_sc[:, pl.ds(pad + idx, tq)] = (
        a_t * pl.reciprocal(denom, approx=True)).astype(a_sc.dtype)

    # ---- last tile: 3x3 out_proj as ONE K=9C matmul (chunked) + bias + residual ----
    @pl.when(t == pl.num_programs(1) - 1)
    def _():
        bo = vecs_ref[:, 5:6]
        w9c = w9c_ref[...]                                 # [C, 9C] bf16
        for ci in range(sq // epi_chunk):
            c0 = ci * epi_chunk
            wcol = (jax.lax.broadcasted_iota(jnp.int32, (1, epi_chunk), 1) + c0) % w_sp
            taps = []
            for ky in range(3):
                for kx in range(3):
                    dy, dx = ky - 1, kx - 1
                    off = pad + c0 + dy * w_sp + dx
                    tap = a_sc[:, off:off + epi_chunk]     # bf16, already cast
                    # Row (dy) out-of-bounds lands in the zeroed halo; only the
                    # column (dx) wrap-around at image-row boundaries needs a mask.
                    if dx == -1:
                        tap = jnp.where(wcol >= 1, tap, jnp.zeros_like(tap))
                    elif dx == 1:
                        tap = jnp.where(wcol < w_sp - 1, tap, jnp.zeros_like(tap))
                    taps.append(tap)
            slab = jnp.concatenate(taps, axis=0)           # [9C, chunk] bf16
            acc = q_ref[:, c0:c0 + epi_chunk] + bo         # residual + bias (f32)
            acc = acc + jnp.dot(w9c, slab, preferred_element_type=jnp.float32)
            o_ref[:, c0:c0 + epi_chunk] = acc.astype(o_ref.dtype)


def cross_attention_block(q, kv, params, eps=1e-5, q_tile=None):
    """q, kv: NCHW float32 (matches the PyTorch module's input convention)."""
    n, c, h_sp, w_sp = q.shape
    _, ck, hk, wk_sp = kv.shape
    assert ck == c
    sq = h_sp * w_sp
    sk = hk * wk_sp
    g = min(32, c // 4)
    cpg = c // g

    q3 = q.reshape(n, c, sq).astype(jnp.float32)
    kv3 = kv.reshape(n, c, sk).astype(jnp.float32)

    # --- parameter plumbing (glue) ---
    wq_w = params["wq"][:, :, 0, 0].astype(jnp.bfloat16)
    wkv2d = params["wkv"][:, :, 0, 0]
    # kv_proj interleaves k/v output channels (torch reshape(N,C,2,S)): k=2i, v=2i+1.
    wkv_w = jnp.concatenate([wkv2d[0::2, :], wkv2d[1::2, :]], axis=0).astype(jnp.bfloat16)
    bq = params["bq"]
    bk = params["bkv"][0::2]
    bv = params["bkv"][1::2]
    vecs = jnp.stack([bq, bk, bv, params["gn_w"], params["gn_b"], params["bout"],
                      jnp.zeros_like(bq), jnp.zeros_like(bq)],
                     axis=1).astype(jnp.float32)                         # [C, 8]
    # 3x3 out_proj -> [C_out, 9*C_in], column block (ky*3+kx)*C + cin.
    w9c = jnp.transpose(params["wout"], (0, 2, 3, 1)).reshape(c, 9 * c).astype(jnp.bfloat16)

    group_ids = jnp.arange(c) // cpg
    m = (group_ids[:, None] == jnp.arange(g)[None, :]).astype(jnp.float32)   # [C, G]
    mt = m.T

    # q-tile: largest 128-multiple chunk such that the per-tile f32 live values
    # (scores [Sk,tq] + PV [C,tq]) stay well under the 256 KiB vreg file.
    if q_tile is None:
        budget = (96 * 1024) // (4 * (sk + c))
        budget = max(128, (budget // 128) * 128)
        if sq <= budget or sq % 128 != 0:
            q_tile = sq
        else:
            q_tile = 128
            cand = budget
            while cand >= 128:
                if sq % cand == 0:
                    q_tile = cand
                    break
                cand -= 128
    assert sq % q_tile == 0
    n_t = sq // q_tile

    # Epilogue chunk along Sq: bounds the [9C, chunk] tap slab (register pressure,
    # and keeps the concat+matmul within v7x's smaller VMEM for big shapes).
    epi_chunk = sq
    if sq % 128 == 0 and sq > 512:
        cand = 512
        while cand >= 128:
            if sq % cand == 0:
                epi_chunk = cand
                break
            cand -= 128

    pad = ((w_sp + 1 + 127) // 128) * 128        # conv halo, 128-aligned
    scale = 1.0 / math.sqrt(c)

    # Explicit VMEM budget (v5e's 16 MiB default scoped limit is the tightest).
    weight_bytes = (wq_w.size + wkv_w.size + w9c.size) * 2 \
        + (vecs.size + m.size + mt.size) * 4
    block_bytes = (c * sq * 4) * 2 + (c * sk * 4)            # q + out (f32) + kv
    scratch_bytes = sk * c * 2 + sk * 4 + c * sk * 2 + c * 4 + c * (sq + 2 * pad) * 2
    slab_bytes = 2 * (9 * c * epi_chunk * 2)
    vmem_need = 2 * (block_bytes + weight_bytes) + scratch_bytes + slab_bytes
    vmem_limit = int(min(max(vmem_need + (4 << 20), 32 << 20), 100 << 20))

    flops = n * (2 * (2 * c) * c * sk            # stacked K/V projection
                 + 2 * sk * c * c                # score-weight fold
                 + 4 * sq * sk * c               # scores + PV
                 + 18 * c * c * sq)              # 3x3 out_proj (K = 9C)
    bytes_accessed = 4 * (q3.size + kv3.size + n * c * sq) \
        + 2 * (w9c.size + wq_w.size + wkv_w.size)
    cost = pl.CostEstimate(flops=int(flops), transcendentals=int(n * sq * sk),
                           bytes_accessed=int(bytes_accessed))

    kernel = functools.partial(_fused_kernel, eps=eps, scale=scale, w_sp=w_sp,
                               tq=q_tile, pad=pad, epi_chunk=epi_chunk)
    cmap = lambda i, t: (0, 0)                   # resident weights / constants

    out3 = pl.pallas_call(
        kernel,
        out_shape=jax.ShapeDtypeStruct((n, c, sq), jnp.float32),
        grid=(n, n_t),
        in_specs=[
            pl.BlockSpec((None, c, sq), lambda i, t: (i, 0, 0)),   # q (stats, tiles, residual)
            pl.BlockSpec((None, c, sk), lambda i, t: (i, 0, 0)),   # kv
            pl.BlockSpec((c, c), cmap),                            # Wq
            pl.BlockSpec((2 * c, c), cmap),                        # stacked [Wk; Wv]
            pl.BlockSpec((c, 8), cmap),                            # packed per-channel vectors
            pl.BlockSpec((c, g), cmap),                            # group one-hot M
            pl.BlockSpec((g, c), cmap),                            # M^T
            pl.BlockSpec((c, 9 * c), cmap),                        # out_proj [C, 9C]
        ],
        out_specs=pl.BlockSpec((None, c, sq), lambda i, t: (i, 0, 0)),
        scratch_shapes=[
            pltpu.VMEM((sk, c), jnp.bfloat16),                     # A0 = scale*Kp^T @ Wq
            pltpu.VMEM((sk, 1), jnp.float32),                      # b_s (folded bias)
            pltpu.VMEM((c, sk), jnp.bfloat16),                     # V
            pltpu.VMEM((c, 1), jnp.float32),                       # q GN scale (alpha_q)
            pltpu.VMEM((c, sq + 2 * pad), jnp.bfloat16),           # attention output + halo
        ],
        compiler_params=pltpu.CompilerParams(
            dimension_semantics=("parallel", "arbitrary"),
            vmem_limit_bytes=vmem_limit),
        cost_estimate=cost,
    )(q3, kv3, wq_w, wkv_w, vecs, m, mt, w9c)

    return out3.reshape(n, c, h_sp, w_sp)


def reference(q, kv, params, eps=1e-5):
    """Pure-JAX reference mirroring the PyTorch forward (high precision)."""
    n, c, h, w = q.shape
    g = min(32, c // 4)
    P = jax.lax.Precision.HIGHEST

    def gn(x):
        nn_, cc, hh, ww = x.shape
        xr = x.reshape(nn_, g, cc // g, hh, ww)
        mean = xr.mean(axis=(2, 3, 4), keepdims=True)
        var = xr.var(axis=(2, 3, 4), keepdims=True)
        xn = (xr - mean) / jnp.sqrt(var + eps)
        return (xn.reshape(nn_, cc, hh, ww) * params["gn_w"].reshape(1, -1, 1, 1)
                + params["gn_b"].reshape(1, -1, 1, 1))

    dn = ("NCHW", "OIHW", "NCHW")
    qp = jax.lax.conv_general_dilated(gn(q), params["wq"], (1, 1), "VALID",
                                      dimension_numbers=dn, precision=P) \
        + params["bq"].reshape(1, -1, 1, 1)
    kvp = jax.lax.conv_general_dilated(gn(kv), params["wkv"], (1, 1), "VALID",
                                       dimension_numbers=dn, precision=P) \
        + params["bkv"].reshape(1, -1, 1, 1)
    qf = qp.reshape(n, c, -1)
    kvf = kvp.reshape(n, c, 2, -1)
    k, v = kvf[:, :, 0, :], kvf[:, :, 1, :]
    w_attn = jax.nn.softmax(
        jnp.einsum("ncq,nck->nqk", qf, k / jnp.sqrt(jnp.float32(c)), precision=P), axis=2)
    a = jnp.einsum("nqk,nck->ncq", w_attn, v, precision=P).reshape(q.shape)
    out = jax.lax.conv_general_dilated(a, params["wout"], (1, 1),
                                       ((1, 1), (1, 1)), dimension_numbers=dn,
                                       precision=P)
    return out + params["bout"].reshape(1, -1, 1, 1) + q


if __name__ == "__main__":
    C = 32
    key = jax.random.PRNGKey(0)
    kq, kkv, k1, k2, k3, k4, k5, k6, k7 = jax.random.split(key, 9)

    def xavier_uniform(k, shape, fan_in, fan_out, gain):
        lim = math.sqrt(6.0 / (fan_in + fan_out))
        return gain * lim * (jax.random.uniform(k, shape, jnp.float32) * 2.0 - 1.0)

    # Faithful CrossAttentionBlock init (out_proj weight * 1e-5, zero biases).
    params = {
        "gn_w": jnp.ones((C,), jnp.float32),
        "gn_b": jnp.zeros((C,), jnp.float32),
        "wq": xavier_uniform(k1, (C, C, 1, 1), C, C, math.sqrt(0.2)),
        "bq": jnp.zeros((C,), jnp.float32),
        "wkv": xavier_uniform(k2, (2 * C, C, 1, 1), C, 2 * C, math.sqrt(0.2)),
        "bkv": jnp.zeros((2 * C,), jnp.float32),
        "wout": xavier_uniform(k3, (C, C, 3, 3), C * 9, C * 9, 1e-5),
        "bout": jnp.zeros((C,), jnp.float32),
    }
    # Stress params: non-trivial GN affine / biases and O(1) out_proj weights so the
    # attention math is actually visible in the output (tighter functional check).
    params_stress = dict(params)
    params_stress.update({
        "gn_w": 1.0 + 0.1 * jax.random.normal(k4, (C,), jnp.float32),
        "gn_b": 0.1 * jax.random.normal(k5, (C,), jnp.float32),
        "bq": 0.1 * jax.random.normal(k6, (C,), jnp.float32),
        "bkv": 0.1 * jax.random.normal(k7, (2 * C,), jnp.float32),
        "wout": xavier_uniform(k3, (C, C, 3, 3), C * 9, C * 9, 1.0),
        "bout": 0.1 * jax.random.normal(k4, (C,), jnp.float32),
    })

    q = jax.random.normal(kq, (2, C, 16, 16), jnp.float32)     # NCHW
    kv = jax.random.normal(kkv, (2, C, 8, 8), jnp.float32)     # NCHW

    # Check 1: module's own init, single-tile path.
    out = jax.block_until_ready(jax.jit(cross_attention_block)(q, kv, params))
    ref = reference(q, kv, params)
    assert out.shape == q.shape
    err = float(jnp.max(jnp.abs(out - ref)))
    assert jnp.allclose(out, ref, atol=1e-3, rtol=1e-3), f"max abs err {err}"

    # Check 2: stress params + multi-tile path (Sq split into 128-token q tiles).
    fn_tiled = jax.jit(functools.partial(cross_attention_block, q_tile=128))
    out2 = jax.block_until_ready(fn_tiled(q, kv, params_stress))
    ref2 = reference(q, kv, params_stress)
    err2 = float(jnp.max(jnp.abs(out2 - ref2)))
    assert jnp.allclose(out2, ref2, atol=3e-2, rtol=3e-2), f"max abs err {err2}"

    print("KERNEL_OK")
</pallas_src>

<mosaic_0001>
module attributes {stable_mosaic.version = 11 : i64} {
  func.func @_fused_kernel(%arg0: i32, %arg1: i32, %arg2: memref<1x32x256xf32, #tpu.memory_space<vmem>>, %arg3: memref<1x32x64xf32, #tpu.memory_space<vmem>>, %arg4: memref<32x32xbf16, #tpu.memory_space<vmem>>, %arg5: memref<64x32xbf16, #tpu.memory_space<vmem>>, %arg6: memref<32x8xf32, #tpu.memory_space<vmem>>, %arg7: memref<32x8xf32, #tpu.memory_space<vmem>>, %arg8: memref<8x32xf32, #tpu.memory_space<vmem>>, %arg9: memref<32x288xbf16, #tpu.memory_space<vmem>>, %arg10: memref<1x32x256xf32, #tpu.memory_space<vmem>>, %arg11: memref<64x32xbf16, #tpu.memory_space<vmem>>, %arg12: memref<64x1xf32, #tpu.memory_space<vmem>>, %arg13: memref<32x64xbf16, #tpu.memory_space<vmem>>, %arg14: memref<32x1xf32, #tpu.memory_space<vmem>>, %arg15: memref<32x512xbf16, #tpu.memory_space<vmem>>) attributes {dimension_semantics = [#tpu.dimension_semantics<parallel>, #tpu.dimension_semantics<arbitrary>], iteration_bounds = array<i64: 2, 1>, scalar_prefetch = 0 : i64, scratch_operands = 5 : i64, tpu.core_type = #tpu.core_type<tc>, window_params = [{transform_indices = @transform_0, window_bounds = array<i64: 1, 32, 256>}, {transform_indices = @transform_1, window_bounds = array<i64: 1, 32, 64>}, {pipeline_mode = #tpu.pipeline_mode<synchronous>, transform_indices = @transform_2, window_bounds = array<i64: 32, 32>}, {pipeline_mode = #tpu.pipeline_mode<synchronous>, transform_indices = @transform_3, window_bounds = array<i64: 64, 32>}, {pipeline_mode = #tpu.pipeline_mode<synchronous>, transform_indices = @transform_4, window_bounds = array<i64: 32, 8>}, {pipeline_mode = #tpu.pipeline_mode<synchronous>, transform_indices = @transform_5, window_bounds = array<i64: 32, 8>}, {pipeline_mode = #tpu.pipeline_mode<synchronous>, transform_indices = @transform_6, window_bounds = array<i64: 8, 32>}, {pipeline_mode = #tpu.pipeline_mode<synchronous>, transform_indices = @transform_7, window_bounds = array<i64: 32, 288>}, {transform_indices = @transform_8, window_bounds = array<i64: 1, 32, 256>}]} {
    %c0_i32 = arith.constant 0 : i32
    %0 = arith.cmpi eq, %arg1, %c0_i32 : i32
    %1 = arith.extui %0 : i1 to i32
    %c0_i32_0 = arith.constant 0 : i32
    %2 = arith.cmpi ne, %1, %c0_i32_0 : i32
    scf.if %2 {
      %c0_16 = arith.constant 0 : index
      %c0_17 = arith.constant 0 : index
      %c0_18 = arith.constant 0 : index
      %37 = vector.load %arg2[%c0_16, %c0_17, %c0_18] : memref<1x32x256xf32, #tpu.memory_space<vmem>>, vector<1x32x256xf32>
      %38 = vector.shape_cast %37 : vector<1x32x256xf32> to vector<32x256xf32>
      %c0_19 = arith.constant 0 : index
      %c0_20 = arith.constant 0 : index
      %c0_21 = arith.constant 0 : index
      %39 = vector.load %arg3[%c0_19, %c0_20, %c0_21] : memref<1x32x64xf32, #tpu.memory_space<vmem>>, vector<1x32x64xf32>
      %40 = vector.shape_cast %39 : vector<1x32x64xf32> to vector<32x64xf32>
      %41 = tpu.iota {dimensions = array<i32: 1>} : vector<1x4xi32>
      %c0_i32_22 = arith.constant 0 : i32
      %42 = vector.broadcast %c0_i32_22 : i32 to vector<1x4xi32>
      %43 = arith.cmpi eq, %41, %42 : vector<1x4xi32>
      %cst_23 = arith.constant dense<0.000000e+00> : vector<32xf32>
      %44 = vector.multi_reduction <add>, %38, %cst_23 [1] : vector<32x256xf32> to vector<32xf32>
      %45 = vector.shape_cast %44 : vector<32xf32> to vector<32x1xf32>
      %cst_24 = arith.constant 0.000000e+00 : f32
      %46 = vector.shape_cast %43 : vector<1x4xi1> to vector<1x4xi1>
      %47 = vector.broadcast %46 : vector<1x4xi1> to vector<32x4xi1>
      %48 = vector.shape_cast %45 : vector<32x1xf32> to vector<32x1xf32>
      %49 = vector.broadcast %48 : vector<32x1xf32> to vector<32x4xf32>
      %50 = vector.broadcast %cst_24 : f32 to vector<32x4xf32>
      %51 = arith.select %47, %49, %50 : vector<32x4xi1>, vector<32x4xf32>
      %c1_i32 = arith.constant 1 : i32
      %52 = vector.broadcast %c1_i32 : i32 to vector<1x4xi32>
      %53 = arith.cmpi eq, %41, %52 : vector<1x4xi32>
      %54 = arith.mulf %38, %38 : vector<32x256xf32>
      %cst_25 = arith.constant dense<0.000000e+00> : vector<32xf32>
      %55 = vector.multi_reduction <add>, %54, %cst_25 [1] : vector<32x256xf32> to vector<32xf32>
      %56 = vector.shape_cast %55 : vector<32xf32> to vector<32x1xf32>
      %cst_26 = arith.constant 0.000000e+00 : f32
      %57 = vector.shape_cast %53 : vector<1x4xi1> to vector<1x4xi1>
      %58 = vector.broadcast %57 : vector<1x4xi1> to vector<32x4xi1>
      %59 = vector.shape_cast %56 : vector<32x1xf32> to vector<32x1xf32>
      %60 = vector.broadcast %59 : vector<32x1xf32> to vector<32x4xf32>
      %61 = vector.broadcast %cst_26 : f32 to vector<32x4xf32>
      %62 = arith.select %58, %60, %61 : vector<32x4xi1>, vector<32x4xf32>
      %63 = arith.addf %51, %62 : vector<32x4xf32>
      %c2_i32 = arith.constant 2 : i32
      %64 = vector.broadcast %c2_i32 : i32 to vector<1x4xi32>
      %65 = arith.cmpi eq, %41, %64 : vector<1x4xi32>
      %cst_27 = arith.constant dense<0.000000e+00> : vector<32xf32>
      %66 = vector.multi_reduction <add>, %40, %cst_27 [1] : vector<32x64xf32> to vector<32xf32>
      %67 = vector.shape_cast %66 : vector<32xf32> to vector<32x1xf32>
      %cst_28 = arith.constant 0.000000e+00 : f32
      %68 = vector.shape_cast %65 : vector<1x4xi1> to vector<1x4xi1>
      %69 = vector.broadcast %68 : vector<1x4xi1> to vector<32x4xi1>
      %70 = vector.shape_cast %67 : vector<32x1xf32> to vector<32x1xf32>
      %71 = vector.broadcast %70 : vector<32x1xf32> to vector<32x4xf32>
      %72 = vector.broadcast %cst_28 : f32 to vector<32x4xf32>
      %73 = arith.select %69, %71, %72 : vector<32x4xi1>, vector<32x4xf32>
      %74 = arith.addf %63, %73 : vector<32x4xf32>
      %c3_i32 = arith.constant 3 : i32
      %75 = vector.broadcast %c3_i32 : i32 to vector<1x4xi32>
      %76 = arith.cmpi eq, %41, %75 : vector<1x4xi32>
      %77 = arith.mulf %40, %40 : vector<32x64xf32>
      %cst_29 = arith.constant dense<0.000000e+00> : vector<32xf32>
      %78 = vector.multi_reduction <add>, %77, %cst_29 [1] : vector<32x64xf32> to vector<32xf32>
      %79 = vector.shape_cast %78 : vector<32xf32> to vector<32x1xf32>
      %cst_30 = arith.constant 0.000000e+00 : f32
      %80 = vector.shape_cast %76 : vector<1x4xi1> to vector<1x4xi1>
      %81 = vector.broadcast %80 : vector<1x4xi1> to vector<32x4xi1>
      %82 = vector.shape_cast %79 : vector<32x1xf32> to vector<32x1xf32>
      %83 = vector.broadcast %82 : vector<32x1xf32> to vector<32x4xf32>
      %84 = vector.broadcast %cst_30 : f32 to vector<32x4xf32>
      %85 = arith.select %81, %83, %84 : vector<32x4xi1>, vector<32x4xf32>
      %86 = arith.addf %74, %85 : vector<32x4xf32>
      %c0_31 = arith.constant 0 : index
      %c0_32 = arith.constant 0 : index
      %87 = vector.load %arg8[%c0_31, %c0_32] : memref<8x32xf32, #tpu.memory_space<vmem>>, vector<8x32xf32>
      %cst_33 = arith.constant dense<0.000000e+00> : vector<8x4xf32>
      %88 = tpu.matmul %87, %86, %cst_33 {dimension_numbers = #tpu.dot_dimension_numbers<[1], [0], [0], [1], [0, 0, 1, 1], [], []>, precision = #tpu.contract_precision<fp32>} : vector<8x32xf32>, vector<32x4xf32>, vector<8x4xf32> -> vector<8x4xf32>
      %c0_34 = arith.constant 0 : index
      %c0_35 = arith.constant 0 : index
      %89 = vector.load %arg7[%c0_34, %c0_35] : memref<32x8xf32, #tpu.memory_space<vmem>>, vector<32x8xf32>
      %cst_36 = arith.constant dense<0.000000e+00> : vector<32x4xf32>
      %90 = tpu.matmul %89, %88, %cst_36 {dimension_numbers = #tpu.dot_dimension_numbers<[1], [0], [0], [1], [0, 0, 1, 1], [], []>, precision = #tpu.contract_precision<fp32>} : vector<32x8xf32>, vector<8x4xf32>, vector<32x4xf32> -> vector<32x4xf32>
      %c0_37 = arith.constant 0 : index
      %c0_38 = arith.constant 0 : index
      %91 = vector.load %arg6[%c0_37, %c0_38] : memref<32x8xf32, #tpu.memory_space<vmem>>, vector<32x1xf32>
      %c0_39 = arith.constant 0 : index
      %c1 = arith.constant 1 : index
      %92 = vector.load %arg6[%c0_39, %c1] : memref<32x8xf32, #tpu.memory_space<vmem>>, vector<32x1xf32>
      %c0_40 = arith.constant 0 : index
      %c2 = arith.constant 2 : index
      %93 = vector.load %arg6[%c0_40, %c2] : memref<32x8xf32, #tpu.memory_space<vmem>>, vector<32x1xf32>
      %c0_41 = arith.constant 0 : index
      %c3 = arith.constant 3 : index
      %94 = vector.load %arg6[%c0_41, %c3] : memref<32x8xf32, #tpu.memory_space<vmem>>, vector<32x1xf32>
      %c0_42 = arith.constant 0 : index
      %c4 = arith.constant 4 : index
      %95 = vector.load %arg6[%c0_42, %c4] : memref<32x8xf32, #tpu.memory_space<vmem>>, vector<32x1xf32>
      %96 = vector.extract_strided_slice %90 {offsets = [0, 0], sizes = [32, 1], strides = [1, 1]} : vector<32x4xf32> to vector<32x1xf32>
      %cst_43 = arith.constant 1.024000e+03 : f32
      %97 = vector.broadcast %cst_43 : f32 to vector<32x1xf32>
      %98 = arith.divf %96, %97 : vector<32x1xf32>
      %99 = vector.extract_strided_slice %90 {offsets = [0, 1], sizes = [32, 1], strides = [1, 1]} : vector<32x4xf32> to vector<32x1xf32>
      %cst_44 = arith.constant 1.024000e+03 : f32
      %100 = vector.broadcast %cst_44 : f32 to vector<32x1xf32>
      %101 = arith.divf %99, %100 : vector<32x1xf32>
      %102 = arith.mulf %98, %98 : vector<32x1xf32>
      %103 = arith.subf %101, %102 : vector<32x1xf32>
      %cst_45 = arith.constant 0.000000e+00 : f32
      %104 = vector.broadcast %cst_45 : f32 to vector<32x1xf32>
      %105 = arith.maximumf %103, %104 : vector<32x1xf32>
      %cst_46 = arith.constant 9.99999974E-6 : f32
      %106 = vector.broadcast %cst_46 : f32 to vector<32x1xf32>
      %107 = arith.addf %105, %106 : vector<32x1xf32>
      %108 = math.rsqrt %107 : vector<32x1xf32>
      %109 = arith.mulf %108, %94 : vector<32x1xf32>
      %110 = arith.mulf %98, %109 : vector<32x1xf32>
      %111 = arith.subf %95, %110 : vector<32x1xf32>
      %c0_47 = arith.constant 0 : index
      %c0_48 = arith.constant 0 : index
      %112 = vector.load %arg14[%c0_47, %c0_48] : memref<32x1xf32, #tpu.memory_space<vmem>>, vector<32x1xf32>
      tpu.vector_store %arg14[%c0_47, %c0_48], %109 {strides = array<i32>} : memref<32x1xf32, #tpu.memory_space<vmem>>, vector<32x1xf32>,
      %113 = vector.extract_strided_slice %90 {offsets = [0, 2], sizes = [32, 1], strides = [1, 1]} : vector<32x4xf32> to vector<32x1xf32>
      %cst_49 = arith.constant 2.560000e+02 : f32
      %114 = vector.broadcast %cst_49 : f32 to vector<32x1xf32>
      %115 = arith.divf %113, %114 : vector<32x1xf32>
      %116 = vector.extract_strided_slice %90 {offsets = [0, 3], sizes = [32, 1], strides = [1, 1]} : vector<32x4xf32> to vector<32x1xf32>
      %cst_50 = arith.constant 2.560000e+02 : f32
      %117 = vector.broadcast %cst_50 : f32 to vector<32x1xf32>
      %118 = arith.divf %116, %117 : vector<32x1xf32>
      %119 = arith.mulf %115, %115 : vector<32x1xf32>
      %120 = arith.subf %118, %119 : vector<32x1xf32>
      %cst_51 = arith.constant 0.000000e+00 : f32
      %121 = vector.broadcast %cst_51 : f32 to vector<32x1xf32>
      %122 = arith.maximumf %120, %121 : vector<32x1xf32>
      %cst_52 = arith.constant 9.99999974E-6 : f32
      %123 = vector.broadcast %cst_52 : f32 to vector<32x1xf32>
      %124 = arith.addf %122, %123 : vector<32x1xf32>
      %125 = math.rsqrt %124 : vector<32x1xf32>
      %126 = arith.mulf %125, %94 : vector<32x1xf32>
      %127 = vector.broadcast %126 : vector<32x1xf32> to vector<32x64xf32>
      %128 = arith.mulf %40, %127 : vector<32x64xf32>
      %129 = arith.mulf %115, %126 : vector<32x1xf32>
      %130 = arith.subf %95, %129 : vector<32x1xf32>
      %131 = vector.broadcast %130 : vector<32x1xf32> to vector<32x64xf32>
      %132 = arith.addf %128, %131 : vector<32x64xf32>
      %133 = arith.truncf %132 : vector<32x64xf32> to vector<32x64xbf16>
      %c0_53 = arith.constant 0 : index
      %c0_54 = arith.constant 0 : index
      %134 = vector.load %arg5[%c0_53, %c0_54] : memref<64x32xbf16, #tpu.memory_space<vmem>>, vector<64x32xbf16>
      %cst_55 = arith.constant dense<0.000000e+00> : vector<64x64xf32>
      %135 = tpu.matmul %134, %133, %cst_55 {dimension_numbers = #tpu.dot_dimension_numbers<[1], [0], [0], [1], [0, 0, 1, 1], [], []>} : vector<64x32xbf16>, vector<32x64xbf16>, vector<64x64xf32> -> vector<64x64xf32>
      %136 = vector.extract_strided_slice %135 {offsets = [0, 0], sizes = [32, 64], strides = [1, 1]} : vector<64x64xf32> to vector<32x64xf32>
      %137 = vector.broadcast %92 : vector<32x1xf32> to vector<32x64xf32>
      %138 = arith.addf %136, %137 : vector<32x64xf32>
      %139 = vector.extract_strided_slice %135 {offsets = [32, 0], sizes = [32, 64], strides = [1, 1]} : vector<64x64xf32> to vector<32x64xf32>
      %140 = vector.broadcast %93 : vector<32x1xf32> to vector<32x64xf32>
      %141 = arith.addf %139, %140 : vector<32x64xf32>
      %142 = arith.truncf %141 : vector<32x64xf32> to vector<32x64xbf16>
      %c0_56 = arith.constant 0 : index
      %c0_57 = arith.constant 0 : index
      %143 = vector.load %arg13[%c0_56, %c0_57] : memref<32x64xbf16, #tpu.memory_space<vmem>>, vector<32x64xbf16>
      tpu.vector_store %arg13[%c0_56, %c0_57], %142 {strides = array<i32>} : memref<32x64xbf16, #tpu.memory_space<vmem>>, vector<32x64xbf16>,
      %cst_58 = arith.constant 0.176776692 : f32
      %144 = vector.broadcast %cst_58 : f32 to vector<32x64xf32>
      %145 = arith.mulf %138, %144 : vector<32x64xf32>
      %146 = tpu.transpose %145, [1, 0] : vector<32x64xf32> -> vector<64x32xf32>
      %147 = arith.truncf %146 : vector<64x32xf32> to vector<64x32xbf16>
      %c0_59 = arith.constant 0 : index
      %c0_60 = arith.constant 0 : index
      %148 = vector.load %arg4[%c0_59, %c0_60] : memref<32x32xbf16, #tpu.memory_space<vmem>>, vector<32x32xbf16>
      %cst_61 = arith.constant dense<0.000000e+00> : vector<64x32xf32>
      %149 = tpu.matmul %147, %148, %cst_61 {dimension_numbers = #tpu.dot_dimension_numbers<[1], [0], [0], [1], [0, 0, 1, 1], [], []>} : vector<64x32xbf16>, vector<32x32xbf16>, vector<64x32xf32> -> vector<64x32xf32>
      %150 = arith.truncf %149 : vector<64x32xf32> to vector<64x32xbf16>
      %c0_62 = arith.constant 0 : index
      %c0_63 = arith.constant 0 : index
      %151 = vector.load %arg11[%c0_62, %c0_63] : memref<64x32xbf16, #tpu.memory_space<vmem>>, vector<64x32xbf16>
      tpu.vector_store %arg11[%c0_62, %c0_63], %150 {strides = array<i32>} : memref<64x32xbf16, #tpu.memory_space<vmem>>, vector<64x32xbf16>,
      %152 = arith.truncf %111 : vector<32x1xf32> to vector<32x1xbf16>
      %cst_64 = arith.constant dense<0.000000e+00> : vector<32x1xf32>
      %153 = tpu.matmul %148, %152, %cst_64 {dimension_numbers = #tpu.dot_dimension_numbers<[1], [0], [0], [1], [0, 0, 1, 1], [], []>} : vector<32x32xbf16>, vector<32x1xbf16>, vector<32x1xf32> -> vector<32x1xf32>
      %154 = arith.addf %153, %91 : vector<32x1xf32>
      %155 = arith.truncf %154 : vector<32x1xf32> to vector<32x1xbf16>
      %cst_65 = arith.constant dense<0.000000e+00> : vector<64x1xf32>
      %156 = tpu.matmul %147, %155, %cst_65 {dimension_numbers = #tpu.dot_dimension_numbers<[1], [0], [0], [1], [0, 0, 1, 1], [], []>} : vector<64x32xbf16>, vector<32x1xbf16>, vector<64x1xf32> -> vector<64x1xf32>
      %c0_66 = arith.constant 0 : index
      %c0_67 = arith.constant 0 : index
      %157 = vector.load %arg12[%c0_66, %c0_67] : memref<64x1xf32, #tpu.memory_space<vmem>>, vector<64x1xf32>
      tpu.vector_store %arg12[%c0_66, %c0_67], %156 {strides = array<i32>} : memref<64x1xf32, #tpu.memory_space<vmem>>, vector<64x1xf32>,
      %cst_68 = arith.constant 0.000000e+00 : bf16
      %158 = vector.broadcast %cst_68 : bf16 to vector<32x128xbf16>
      %c0_69 = arith.constant 0 : index
      %c0_70 = arith.constant 0 : index
      %159 = vector.load %arg15[%c0_69, %c0_70] : memref<32x512xbf16, #tpu.memory_space<vmem>>, vector<32x128xbf16>
      tpu.vector_store %arg15[%c0_69, %c0_70], %158 {strides = array<i32>} : memref<32x512xbf16, #tpu.memory_space<vmem>>, vector<32x128xbf16>,
      %cst_71 = arith.constant 0.000000e+00 : bf16
      %160 = vector.broadcast %cst_71 : bf16 to vector<32x128xbf16>
      %c0_72 = arith.constant 0 : index
      %c384 = arith.constant 384 : index
      %161 = vector.load %arg15[%c0_72, %c384] : memref<32x512xbf16, #tpu.memory_space<vmem>>, vector<32x128xbf16>
      tpu.vector_store %arg15[%c0_72, %c384], %160 {strides = array<i32>} : memref<32x512xbf16, #tpu.memory_space<vmem>>, vector<32x128xbf16>,
    } else {
    }
    %c256_i32 = arith.constant 256 : i32
    %3 = arith.muli %arg1, %c256_i32 : i32
    %4 = tpu.assume_multiple %3, 128 : i32
    %c0 = arith.constant 0 : index
    %c0_1 = arith.constant 0 : index
    %5 = arith.index_cast %4 : i32 to index
    %6 = vector.load %arg2[%c0, %c0_1, %5] : memref<1x32x256xf32, #tpu.memory_space<vmem>>, vector<1x32x256xf32>
    %7 = vector.shape_cast %6 : vector<1x32x256xf32> to vector<32x256xf32>
    %c0_2 = arith.constant 0 : index
    %c0_3 = arith.constant 0 : index
    %8 = vector.load %arg14[%c0_2, %c0_3] : memref<32x1xf32, #tpu.memory_space<vmem>>, vector<32x1xf32>
    %9 = vector.broadcast %8 : vector<32x1xf32> to vector<32x256xf32>
    %10 = arith.mulf %7, %9 : vector<32x256xf32>
    %11 = arith.truncf %10 : vector<32x256xf32> to vector<32x256xbf16>
    %c0_4 = arith.constant 0 : index
    %c0_5 = arith.constant 0 : index
    %12 = vector.load %arg11[%c0_4, %c0_5] : memref<64x32xbf16, #tpu.memory_space<vmem>>, vector<64x32xbf16>
    %cst = arith.constant dense<0.000000e+00> : vector<64x256xf32>
    %13 = tpu.matmul %12, %11, %cst {dimension_numbers = #tpu.dot_dimension_numbers<[1], [0], [0], [1], [0, 0, 1, 1], [], []>} : vector<64x32xbf16>, vector<32x256xbf16>, vector<64x256xf32> -> vector<64x256xf32>
    %c0_6 = arith.constant 0 : index
    %c0_7 = arith.constant 0 : index
    %14 = vector.load %arg12[%c0_6, %c0_7] : memref<64x1xf32, #tpu.memory_space<vmem>>, vector<64x1xf32>
    %15 = vector.broadcast %14 : vector<64x1xf32> to vector<64x256xf32>
    %16 = arith.addf %13, %15 : vector<64x256xf32>
    %cst_8 = arith.constant dense<0xFF800000> : vector<256xf32>
    %17 = vector.multi_reduction <maximumf>, %16, %cst_8 [0] : vector<64x256xf32> to vector<256xf32>
    %18 = vector.shape_cast %17 : vector<256xf32> to vector<1x256xf32>
    %19 = vector.broadcast %18 : vector<1x256xf32> to vector<64x256xf32>
    %20 = arith.subf %16, %19 : vector<64x256xf32>
    %21 = math.exp %20 : vector<64x256xf32>
    %cst_9 = arith.constant dense<0.000000e+00> : vector<256xf32>
    %22 = vector.multi_reduction <add>, %21, %cst_9 [0] : vector<64x256xf32> to vector<256xf32>
    %23 = vector.shape_cast %22 : vector<256xf32> to vector<1x256xf32>
    %c0_10 = arith.constant 0 : index
    %c0_11 = arith.constant 0 : index
    %24 = vector.load %arg13[%c0_10, %c0_11] : memref<32x64xbf16, #tpu.memory_space<vmem>>, vector<32x64xbf16>
    %25 = arith.truncf %21 : vector<64x256xf32> to vector<64x256xbf16>
    %cst_12 = arith.constant dense<0.000000e+00> : vector<32x256xf32>
    %26 = tpu.matmul %24, %25, %cst_12 {dimension_numbers = #tpu.dot_dimension_numbers<[1], [0], [0], [1], [0, 0, 1, 1], [], []>} : vector<32x64xbf16>, vector<64x256xbf16>, vector<32x256xf32> -> vector<32x256xf32>
    %27 = tpu.reciprocal %23 {approx = true} : vector<1x256xf32> -> vector<1x256xf32>
    %28 = vector.broadcast %27 : vector<1x256xf32> to vector<32x256xf32>
    %29 = arith.mulf %26, %28 : vector<32x256xf32>
    %30 = arith.truncf %29 : vector<32x256xf32> to vector<32x256xbf16>
    %c128_i32 = arith.constant 128 : i32
    %31 = arith.addi %c128_i32, %4 : i32
    %c0_13 = arith.constant 0 : index
    %32 = arith.index_cast %31 : i32 to index
    %33 = vector.load %arg15[%c0_13, %32] : memref<32x512xbf16, #tpu.memory_space<vmem>>, vector<32x256xbf16>
    tpu.vector_store %arg15[%c0_13, %32], %30 {strides = array<i32>} : memref<32x512xbf16, #tpu.memory_space<vmem>>, vector<32x256xbf16>,
    %c0_i32_14 = arith.constant 0 : i32
    %34 = arith.cmpi eq, %arg1, %c0_i32_14 : i32
    %35 = arith.extui %34 : i1 to i32
    %c0_i32_15 = arith.constant 0 : i32
    %36 = arith.cmpi ne, %35, %c0_i32_15 : i32
    scf.if %36 {
      %c0_16 = arith.constant 0 : index
      %c5 = arith.constant 5 : index
      %37 = vector.load %arg6[%c0_16, %c5] : memref<32x8xf32, #tpu.memory_space<vmem>>, vector<32x1xf32>
      %c0_17 = arith.constant 0 : index
      %c0_18 = arith.constant 0 : index
      %38 = vector.load %arg9[%c0_17, %c0_18] : memref<32x288xbf16, #tpu.memory_space<vmem>>, vector<32x288xbf16>
      %39 = tpu.iota {dimensions = array<i32: 1>} : vector<1x256xi32>
      %c0_i32_19 = arith.constant 0 : i32
      %40 = vector.broadcast %c0_i32_19 : i32 to vector<1x256xi32>
      %41 = arith.addi %39, %40 : vector<1x256xi32>
      %c16_i32 = arith.constant 16 : i32
      %c0_i32_20 = arith.constant 0 : i32
      %42 = arith.cmpi eq, %c16_i32, %c0_i32_20 : i32
      %c1_i32 = arith.constant 1 : i32
      %43 = arith.select %42, %c1_i32, %c16_i32 : i32
      %44 = vector.broadcast %43 : i32 to vector<1x256xi32>
      %45 = arith.remsi %41, %44 : vector<1x256xi32>
      %c0_i32_21 = arith.constant 0 : i32
      %46 = vector.broadcast %c0_i32_21 : i32 to vector<1x256xi32>
      %47 = arith.cmpi ne, %45, %46 : vector<1x256xi32>
      %c0_i32_22 = arith.constant 0 : i32
      %48 = vector.broadcast %c0_i32_22 : i32 to vector<1x256xi32>
      %49 = arith.cmpi slt, %45, %48 : vector<1x256xi32>
      %c0_i32_23 = arith.constant 0 : i32
      %50 = arith.cmpi slt, %43, %c0_i32_23 : i32
      %51 = vector.broadcast %50 : i1 to vector<1x256xi1>
      %52 = vector.broadcast %51 : vector<1x256xi1> to vector<1x256xi1>
      %53 = arith.xori %49, %52 : vector<1x256xi1>
      %54 = arith.andi %53, %47 : vector<1x256xi1>
      %55 = vector.broadcast %43 : i32 to vector<1x256xi32>
      %56 = arith.addi %45, %55 : vector<1x256xi32>
      %57 = arith.select %54, %56, %45 : vector<1x256xi1>, vector<1x256xi32>
      %c0_24 = arith.constant 0 : index
      %c111 = arith.constant 111 : index
      %58 = vector.load %arg15[%c0_24, %c111] : memref<32x512xbf16, #tpu.memory_space<vmem>>, vector<32x256xbf16>
      %c1_i32_25 = arith.constant 1 : i32
      %59 = vector.broadcast %c1_i32_25 : i32 to vector<1x256xi32>
      %60 = arith.cmpi sge, %57, %59 : vector<1x256xi32>
      %cst_26 = arith.constant 0.000000e+00 : bf16
      %61 = vector.broadcast %cst_26 : bf16 to vector<32x256xbf16>
      %62 = vector.shape_cast %60 : vector<1x256xi1> to vector<1x256xi1>
      %63 = vector.broadcast %62 : vector<1x256xi1> to vector<32x256xi1>
      %64 = arith.select %63, %58, %61 : vector<32x256xi1>, vector<32x256xbf16>
      %c0_27 = arith.constant 0 : index
      %c112 = arith.constant 112 : index
      %65 = vector.load %arg15[%c0_27, %c112] : memref<32x512xbf16, #tpu.memory_space<vmem>>, vector<32x256xbf16>
      %c0_28 = arith.constant 0 : index
      %c113 = arith.constant 113 : index
      %66 = vector.load %arg15[%c0_28, %c113] : memref<32x512xbf16, #tpu.memory_space<vmem>>, vector<32x256xbf16>
      %c15_i32 = arith.constant 15 : i32
      %67 = vector.broadcast %c15_i32 : i32 to vector<1x256xi32>
      %68 = arith.cmpi slt, %57, %67 : vector<1x256xi32>
      %cst_29 = arith.constant 0.000000e+00 : bf16
      %69 = vector.broadcast %cst_29 : bf16 to vector<32x256xbf16>
      %70 = vector.shape_cast %68 : vector<1x256xi1> to vector<1x256xi1>
      %71 = vector.broadcast %70 : vector<1x256xi1> to vector<32x256xi1>
      %72 = arith.select %71, %66, %69 : vector<32x256xi1>, vector<32x256xbf16>
      %c0_30 = arith.constant 0 : index
      %c127 = arith.constant 127 : index
      %73 = vector.load %arg15[%c0_30, %c127] : memref<32x512xbf16, #tpu.memory_space<vmem>>, vector<32x256xbf16>
      %c1_i32_31 = arith.constant 1 : i32
      %74 = vector.broadcast %c1_i32_31 : i32 to vector<1x256xi32>
      %75 = arith.cmpi sge, %57, %74 : vector<1x256xi32>
      %cst_32 = arith.constant 0.000000e+00 : bf16
      %76 = vector.broadcast %cst_32 : bf16 to vector<32x256xbf16>
      %77 = vector.shape_cast %75 : vector<1x256xi1> to vector<1x256xi1>
      %78 = vector.broadcast %77 : vector<1x256xi1> to vector<32x256xi1>
      %79 = arith.select %78, %73, %76 : vector<32x256xi1>, vector<32x256xbf16>
      %c0_33 = arith.constant 0 : index
      %c128 = arith.constant 128 : index
      %80 = vector.load %arg15[%c0_33, %c128] : memref<32x512xbf16, #tpu.memory_space<vmem>>, vector<32x256xbf16>
      %c0_34 = arith.constant 0 : index
      %c129 = arith.constant 129 : index
      %81 = vector.load %arg15[%c0_34, %c129] : memref<32x512xbf16, #tpu.memory_space<vmem>>, vector<32x256xbf16>
      %c15_i32_35 = arith.constant 15 : i32
      %82 = vector.broadcast %c15_i32_35 : i32 to vector<1x256xi32>
      %83 = arith.cmpi slt, %57, %82 : vector<1x256xi32>
      %cst_36 = arith.constant 0.000000e+00 : bf16
      %84 = vector.broadcast %cst_36 : bf16 to vector<32x256xbf16>
      %85 = vector.shape_cast %83 : vector<1x256xi1> to vector<1x256xi1>
      %86 = vector.broadcast %85 : vector<1x256xi1> to vector<32x256xi1>
      %87 = arith.select %86, %81, %84 : vector<32x256xi1>, vector<32x256xbf16>
      %c0_37 = arith.constant 0 : index
      %c143 = arith.constant 143 : index
      %88 = vector.load %arg15[%c0_37, %c143] : memref<32x512xbf16, #tpu.memory_space<vmem>>, vector<32x256xbf16>
      %c1_i32_38 = arith.constant 1 : i32
      %89 = vector.broadcast %c1_i32_38 : i32 to vector<1x256xi32>
      %90 = arith.cmpi sge, %57, %89 : vector<1x256xi32>
      %cst_39 = arith.constant 0.000000e+00 : bf16
      %91 = vector.broadcast %cst_39 : bf16 to vector<32x256xbf16>
      %92 = vector.shape_cast %90 : vector<1x256xi1> to vector<1x256xi1>
      %93 = vector.broadcast %92 : vector<1x256xi1> to vector<32x256xi1>
      %94 = arith.select %93, %88, %91 : vector<32x256xi1>, vector<32x256xbf16>
      %c0_40 = arith.constant 0 : index
      %c144 = arith.constant 144 : index
      %95 = vector.load %arg15[%c0_40, %c144] : memref<32x512xbf16, #tpu.memory_space<vmem>>, vector<32x256xbf16>
      %c0_41 = arith.constant 0 : index
      %c145 = arith.constant 145 : index
      %96 = vector.load %arg15[%c0_41, %c145] : memref<32x512xbf16, #tpu.memory_space<vmem>>, vector<32x256xbf16>
      %c15_i32_42 = arith.constant 15 : i32
      %97 = vector.broadcast %c15_i32_42 : i32 to vector<1x256xi32>
      %98 = arith.cmpi slt, %57, %97 : vector<1x256xi32>
      %cst_43 = arith.constant 0.000000e+00 : bf16
      %99 = vector.broadcast %cst_43 : bf16 to vector<32x256xbf16>
      %100 = vector.shape_cast %98 : vector<1x256xi1> to vector<1x256xi1>
      %101 = vector.broadcast %100 : vector<1x256xi1> to vector<32x256xi1>
      %102 = arith.select %101, %96, %99 : vector<32x256xi1>, vector<32x256xbf16>
      %103 = tpu.concatenate %64, %65, %72, %79, %80, %87, %94, %95, %102 in 0 : vector<32x256xbf16>, vector<32x256xbf16>, vector<32x256xbf16>, vector<32x256xbf16>, vector<32x256xbf16>, vector<32x256xbf16>, vector<32x256xbf16>, vector<32x256xbf16>, vector<32x256xbf16> -> vector<288x256xbf16>
      %c0_44 = arith.constant 0 : index
      %c0_45 = arith.constant 0 : index
      %c0_46 = arith.constant 0 : index
      %104 = vector.load %arg2[%c0_44, %c0_45, %c0_46] : memref<1x32x256xf32, #tpu.memory_space<vmem>>, vector<1x32x256xf32>
      %105 = vector.shape_cast %104 : vector<1x32x256xf32> to vector<32x256xf32>
      %106 = vector.broadcast %37 : vector<32x1xf32> to vector<32x256xf32>
      %107 = arith.addf %105, %106 : vector<32x256xf32>
      %cst_47 = arith.constant dense<0.000000e+00> : vector<32x256xf32>
      %108 = tpu.matmul %38, %103, %cst_47 {dimension_numbers = #tpu.dot_dimension_numbers<[1], [0], [0], [1], [0, 0, 1, 1], [], []>} : vector<32x288xbf16>, vector<288x256xbf16>, vector<32x256xf32> -> vector<32x256xf32>
      %109 = arith.addf %107, %108 : vector<32x256xf32>
      %c0_48 = arith.constant 0 : index
      %c0_49 = arith.constant 0 : index
      %c0_50 = arith.constant 0 : index
      %110 = vector.load %arg10[%c0_48, %c0_49, %c0_50] : memref<1x32x256xf32, #tpu.memory_space<vmem>>, vector<1x32x256xf32>
      %111 = vector.shape_cast %110 : vector<1x32x256xf32> to vector<32x256xf32>
      %112 = vector.shape_cast %109 : vector<32x256xf32> to vector<1x32x256xf32>
      tpu.vector_store %arg10[%c0_48, %c0_49, %c0_50], %112 {strides = array<i32>} : memref<1x32x256xf32, #tpu.memory_space<vmem>>, vector<1x32x256xf32>,
    } else {
    }
    return
  }
  func.func @transform_0(%arg0: i32, %arg1: i32) -> (i32, i32, i32) {
    %c0_i32 = arith.constant 0 : i32
    %c0_i32_0 = arith.constant 0 : i32
    %c0_i32_1 = arith.constant 0 : i32
    return %arg0, %c0_i32, %c0_i32_0 : i32, i32, i32
  }
  func.func @transform_1(%arg0: i32, %arg1: i32) -> (i32, i32, i32) {
    %c0_i32 = arith.constant 0 : i32
    %c0_i32_0 = arith.constant 0 : i32
    %c0_i32_1 = arith.constant 0 : i32
    return %arg0, %c0_i32, %c0_i32_0 : i32, i32, i32
  }
  func.func @transform_2(%arg0: i32, %arg1: i32) -> (i32, i32) {
    %c0_i32 = arith.constant 0 : i32
    %c0_i32_0 = arith.constant 0 : i32
    %c0_i32_1 = arith.constant 0 : i32
    return %c0_i32, %c0_i32_0 : i32, i32
  }
  func.func @transform_3(%arg0: i32, %arg1: i32) -> (i32, i32) {
    %c0_i32 = arith.constant 0 : i32
    %c0_i32_0 = arith.constant 0 : i32
    %c0_i32_1 = arith.constant 0 : i32
    return %c0_i32, %c0_i32_0 : i32, i32
  }
  func.func @transform_4(%arg0: i32, %arg1: i32) -> (i32, i32) {
    %c0_i32 = arith.constant 0 : i32
    %c0_i32_0 = arith.constant 0 : i32
    %c0_i32_1 = arith.constant 0 : i32
    return %c0_i32, %c0_i32_0 : i32, i32
  }
  func.func @transform_5(%arg0: i32, %arg1: i32) -> (i32, i32) {
    %c0_i32 = arith.constant 0 : i32
    %c0_i32_0 = arith.constant 0 : i32
    %c0_i32_1 = arith.constant 0 : i32
    return %c0_i32, %c0_i32_0 : i32, i32
  }
  func.func @transform_6(%arg0: i32, %arg1: i32) -> (i32, i32) {
    %c0_i32 = arith.constant 0 : i32
    %c0_i32_0 = arith.constant 0 : i32
    %c0_i32_1 = arith.constant 0 : i32
    return %c0_i32, %c0_i32_0 : i32, i32
  }
  func.func @transform_7(%arg0: i32, %arg1: i32) -> (i32, i32) {
    %c0_i32 = arith.constant 0 : i32
    %c0_i32_0 = arith.constant 0 : i32
    %c0_i32_1 = arith.constant 0 : i32
    return %c0_i32, %c0_i32_0 : i32, i32
  }
  func.func @transform_8(%arg0: i32, %arg1: i32) -> (i32, i32, i32) {
    %c0_i32 = arith.constant 0 : i32
    %c0_i32_0 = arith.constant 0 : i32
    %c0_i32_1 = arith.constant 0 : i32
    return %arg0, %c0_i32, %c0_i32_0 : i32, i32, i32
  }
}

</mosaic_0001>

<bundles_post_ra>
// kernel: cross_attention_block.1
= control target key start
LH: loop header
LB: loop body
LE: loop exit
PB: predicated region body
PF: predicated region fallthrough
CT: control target
= control target key end

     0   :  { %s3417_s27 = smov 0   ;;  %s3419_s28 = smov 0   ;;  %s4568_s0 = inlined_call_operand.vmem [shape: f32[2,32,256], index: 0, kind: input, shape index: {}]   ;;  %s4569_s1 = inlined_call_operand.vmem [shape: f32[2,32,64], index: 1, kind: input, shape index: {}]   ;;  %s4570_s2 = inlined_call_operand.vmem [shape: bf16[32,32], index: 2, kind: input, shape index: {}]   ;;  %s4571_s3 = inlined_call_operand.vmem [shape: bf16[64,32], index: 3, kind: input, shape index: {}]   ;;  %s4572_s4 = inlined_call_operand.vmem [shape: f32[32,8], index: 4, kind: input, shape index: {}]   ;;  %s4573_s5 = inlined_call_operand.vmem [shape: f32[32,8], index: 5, kind: input, shape index: {}]   ;;  %s4574_s6 = inlined_call_operand.vmem [shape: f32[8,32], index: 6, kind: input, shape index: {}]   ;;  %s4575_s7 = inlined_call_operand.vmem [shape: bf16[32,288], index: 7, kind: input, shape index: {}]   ;;  %s4576_s8 = inlined_call_operand.vmem [shape: f32[2,32,256], index: 8, kind: output, shape index: {}]  }
   0x1   :  { %s3421_s29 = smov 0  }
   0x2 LB: > { %s30_s30 = sadd.s32 1, %s3343_s28  ;;  %p2988_p0 = scmp.ge.s32.totalorder %s3347_s29, 1  ;;  %s3347_s29 = sphi %s3421_s29, %s18_s29   ;;  %s3343_s28 = sphi %s3419_s28, %s4654_s28   ;;  %s3339_s27 = sphi %s3417_s27, %s4653_s27  }
   0x3   : > { %p32_p1 = scmp.ge.s32.totalorder %s30_s30, 2  ;;  %p284_p2 = scmp.lt.s32.totalorder %s3347_s29, 3 }
   0x5   : > { %s4656_s30 = smov (%p32_p1, %s30_s30), 0  ;;  %p285_p3 = pnand %p2988_p0, %p284_p2 }
   0x6   : > { %p323_p4 = scmp.lt.s32.totalorder (!%p285_p3), %s3339_s27, 1  ;;  %s3352_s17 = smov (!%p285_p3), 127  }
   0x7   : > { %288 = sbr.rel (%p285_p3) target bundleno = 2533 (0x9e5), region = 52  ;;  %s3354_s22 = smov (!%p285_p3), 2  }
   0x8   : > { %s3355_s23 = smov (!%p285_p3), 126   ;;  %s3357_s24 = smov (!%p285_p3), 4  }
   0x9   : > { %s3360_s12 = smov (!%p285_p3), 124   ;;  %s3363_s25 = smov (!%p285_p3), 15  }
   0xa   : > { %s3364_s26 = smov (!%p285_p3), 111   ;;  %s3365_s11 = smov (!%p285_p3), 17  }
   0xb   : > { %s3368_s14 = smov (!%p285_p3), 110   ;;  %s3369_s15 = smov (!%p285_p3), 94  }
   0xc   : > { %s4658_s27 = smov (!%p323_p4, %s3339_s27), 1  ;;  %vm410_vm0 = vcmask 523264   ;;  %v357_v40 = vlaneseq  ;;  %v460_v63 = vld [vmem:[%s4574_s6] sm:$0xff]  ;;  %vm4577_vm5 = vcmask 261120   ;;  %vm654_vm6 = vcmask 64512   ;;  %s3370_s18 = smov 112  }
   0xd   : > { %s3168_s9 = sshll.u32 %s4658_s27, 5  ;;  %s3167_s10 = sshll.u32 %s4658_s27, 6 }
   0xe   : > { %s3442_s13 = scalar_lea.vmem %s4569_s1, %s3168_s9  ;;  %s3449_s16 = scalar_lea.vmem %s4568_s0, %s3167_s10  ;;  %v3486_v44 = vand.u32 127, %v357_v40 }
   0xf   : > { %v356_v0 = vld [vmem:[%s3442_s13 + $0x18] sm:$0xff]  ;;  %v351_v1 = vld [vmem:[%s3449_s16 + $0x30] sm:$0xff]  ;;  %v349_v5 = vld [vmem:[%s3449_s16 + $0x20] sm:$0xff]  ;;  %s3351_s9 = smov 1   ;;  %s4543_s19 = scalar_lea.vmem %s4576_s8, %s3167_s10 }
  0x10   : > { %v352_v2 = vld [vmem:[%s3449_s16 + $0x38] sm:$0xff]  ;;  %v420_v3 = vsel %vm410_vm0, %v356_v0, 0.0  ;;  %v350_v6 = vld [vmem:[%s3449_s16 + $0x28] sm:$0xff]  ;;  %v385_v8 = vmul.f32 %v351_v1, %v351_v1  ;;  %v347_v10 = vld [vmem:[%s3449_s16 + $0x10] sm:$0xff]  ;;  %v383_v12 = vmul.f32 %v349_v5, %v349_v5  ;;  %v437_v17 = vmul.f32 %v356_v0, %v356_v0 }
  0x11   : > { %v369_v4 = vadd.f32 %v352_v2, %v351_v1  ;;  %421 = vadd.xlane.f32.xlu2 %v420_v3  ;;  %v366_v7 = vadd.f32 %v350_v6, %v349_v5  ;;  %v386_v9 = vmul.f32 %v352_v2, %v352_v2  ;;  %v348_v11 = vld [vmem:[%s3449_s16 + $0x18] sm:$0xff]  ;;  %v384_v13 = vmul.f32 %v350_v6, %v350_v6  ;;  %v3460_v20 = vld [vmem:[%s3442_s13 + $0x10] sm:$0xff]  ;;  %v345_v24 = vld [vmem:[%s3449_s16] sm:$0xff] }
  0x12   : > { %v363_v14 = vadd.f32 %v348_v11, %v347_v10  ;;  %v381_v18 = vmul.f32 %v347_v10, %v347_v10  ;;  %v382_v19 = vmul.f32 %v348_v11, %v348_v11  ;;  %v447_v21 = vsel %vm410_vm0, %v437_v17, 0.0  ;;  %v346_v25 = vld [vmem:[%s3449_s16 + $0x8] sm:$0xff]  ;;  %v3477_v34 = vld [vmem:[%s3442_s13] sm:$0xff] }
  0x13   : > { %370 = vadd.xlane.f32.xlu0 %v369_v4  ;;  %367 = vadd.xlane.f32.xlu1 %v366_v7  ;;  %v396_v15 = vadd.f32 %v386_v9, %v385_v8  ;;  %v393_v16 = vadd.f32 %v384_v13, %v383_v12  ;;  %v417_v23 = vsel %vm410_vm0, %v3460_v20, 0.0  ;;  %v3468_v26 = vld [vmem:[%s3442_s13 + $0x8] sm:$0xff]  ;;  %v379_v27 = vmul.f32 %v345_v24, %v345_v24 }
  0x14   : > { %v390_v22 = vadd.f32 %v382_v19, %v381_v18  ;;  %v380_v28 = vmul.f32 %v346_v25, %v346_v25  ;;  %v414_v29 = vsel %vm410_vm0, %v3468_v26, 0.0  ;;  %v360_v30 = vadd.f32 %v346_v25, %v345_v24 }
  0x15   : > { %v435_v32 = vmul.f32 %v3468_v26, %v3468_v26  ;;  %v436_v33 = vmul.f32 %v3460_v20, %v3460_v20  ;;  %v411_v37 = vsel %vm410_vm0, %v3477_v34, 0.0  ;;  %v434_v38 = vmul.f32 %v3477_v34, %v3477_v34 }
  0x16   : > { %v387_v31 = vadd.f32 %v380_v28, %v379_v27  ;;  %vm378_vm1 = vcmp.eq.s32.totalorder %v3486_v44, 1  ;;  %vm359_vm2 = vcmp.eq.s32.totalorder %v3486_v44, 0  ;;  %vm409_vm3 = vcmp.eq.s32.totalorder %v3486_v44, 2 }
  0x17   : > { %v441_v35 = vsel %vm410_vm0, %v435_v32, 0.0  ;;  %v444_v36 = vsel %vm410_vm0, %v436_v33, 0.0  ;;  %v438_v39 = vsel %vm410_vm0, %v434_v38, 0.0  ;;  %vm433_vm4 = vcmp.eq.s32.totalorder %v3486_v44, 3 }
  0x18   : > { %v463_v5 = vsel %vm4577_vm5, %v460_v63, 0 }
  0x19   : > { %364 = vadd.xlane.f32.xlu2 %v363_v14  ;;  %v485_v12 = vand.u32 4294901760, %v463_v5 }
  0x1b   : > { %397 = vadd.xlane.f32.xlu0 %v396_v15  ;;  %394 = vadd.xlane.f32.xlu1 %v393_v16 }
  0x21   : > { %448 = vadd.xlane.f32.xlu2 %v447_v21 }
  0x23   : > { %391 = vadd.xlane.f32.xlu0 %v390_v22  ;;  %418 = vadd.xlane.f32.xlu1 %v417_v23  ;;  %v486_v23 = vsub.f32 %v463_v5, %v485_v12 }
  0x25   : > { %v487_v33 = vand.u32 4294901760, %v486_v23 }
  0x29   : > { %415 = vadd.xlane.f32.xlu2 %v414_v29 }
  0x2b   : > { %361 = vadd.xlane.f32.xlu0 %v360_v30  ;;  %388 = vadd.xlane.f32.xlu1 %v387_v31 }
  0x31   : > { %442 = vadd.xlane.f32.xlu2 %v441_v35 }
  0x33   : > { %445 = vadd.xlane.f32.xlu0 %v444_v36  ;;  %412 = vadd.xlane.f32.xlu1 %v411_v37 }
  0x3b   : > { %439 = vadd.xlane.f32.xlu0 %v438_v39 }
  0x84   : > { %v422_v41 = vpop.xlane.xlu2 %421 }
  0x85   : > { %v428_v51 = vsel %vm409_vm3, %v422_v41, 0.0 }
  0x86   : > { %v371_v42 = vpop.xlane.xlu0 %370  ;;  %v368_v43 = vpop.xlane.xlu1 %367 }
  0x87   : > { %v377_v49 = vsel %vm359_vm2, %v371_v42, 0.0  ;;  %v376_v8 = vsel %vm359_vm2, %v368_v43, 0.0  ;;  %v488_v43 = vsub.f32 %v486_v23, %v487_v33 }
  0x8c   : > { %v365_v45 = vpop.xlane.xlu2 %364 }
  0x8d   : > { %v375_v6 = vsel %vm359_vm2, %v365_v45, 0.0 }
  0x8e   : > { %v398_v46 = vpop.xlane.xlu0 %397  ;;  %v395_v48 = vpop.xlane.xlu1 %394 }
  0x8f   : > { %v404_v47 = vsel %vm378_vm1, %v398_v46, 0.0  ;;  %v403_v3 = vsel %vm378_vm1, %v395_v48, 0.0 }
  0x90   : > { %v408_v50 = vadd.f32 %v404_v47, %v377_v49  ;;  %v407_v11 = vadd.f32 %v403_v3, %v376_v8  ;;  %v489_v49 = vand.u32 4294901760, %v488_v43 }
  0x92   : > { %v432_v52 = vadd.f32 %v428_v51, %v408_v50 }
  0x94   : > { %v449_v53 = vpop.xlane.xlu2 %448 }
  0x95   : > { %v455_v54 = vsel %vm433_vm4, %v449_v53, 0.0  ;;  %v652_v53 = vld [vmem:[%s4573_s5 + $0x10] sm:$0xff] }
  0x96   : > { %v392_v55 = vpop.xlane.xlu0 %391  ;;  %v459_v56 = vadd.f32 %v455_v54, %v432_v52  ;;  %v419_v57 = vpop.xlane.xlu1 %418  ;;  %v650_v54 = vld [vmem:[%s4573_s5] sm:$0xff] }
  0x97   : > { %v402_v2 = vsel %vm378_vm1, %v392_v55, 0.0  ;;  %v427_v9 = vsel %vm409_vm3, %v419_v57, 0.0  ;;  %v662_v55 = vsel %vm654_vm6, %v652_v53, 0 }
  0x98   : > { %v3500_v58 = vand.u32 4294901760, %v459_v56  ;;  %v406_v10 = vadd.f32 %v402_v2, %v375_v6  ;;  %v431_v15 = vadd.f32 %v427_v9, %v407_v11  ;;  %v3545_v57 = vand.u32 4294901760, %v662_v55 }
  0x9a   : > { %478 = vmatpush.msra.mxu0 %v3500_v58  ;;  %578 = vmatpush.msra.mxu3 %v3500_v58  ;;  %v3505_v59 = vsub.f32 %v459_v56, %v3500_v58  ;;  %v656_v56 = vsel %vm654_vm6, %v650_v54, 0 }
  0x9c   : > { %549 = vmatpush.msra.mxu2 %v3505_v59  ;;  %v416_v60 = vpop.xlane.xlu2 %415  ;;  %v508_v61 = vand.u32 4294901760, %v3505_v59 }
  0x9d   : > { %v426_v7 = vsel %vm409_vm3, %v416_v60, 0.0  ;;  %v653_v60 = vld [vmem:[%s4573_s5 + $0x18] sm:$0xff] }
  0x9e   : > { %v362_v62 = vpop.xlane.xlu0 %361  ;;  %v389_v0 = vpop.xlane.xlu1 %388  ;;  %v509_v1 = vsub.f32 %v3505_v59, %v508_v61  ;;  %v430_v13 = vadd.f32 %v426_v7, %v406_v10 }
  0x9f   : > { %v401_v24 = vsel %vm378_vm1, %v389_v0, 0.0  ;;  %v374_v25 = vsel %vm359_vm2, %v362_v62, 0.0  ;;  %v701_v62 = vsub.f32 %v662_v55, %v3545_v57  ;;  %v665_v0 = vsel %vm654_vm6, %v653_v60, 0 }
  0xa0   : > { %v510_v4 = vand.u32 4294901760, %v509_v1  ;;  %v405_v31 = vadd.f32 %v401_v24, %v374_v25  ;;  %v708_v7 = vand.u32 4294901760, %v665_v0 }
  0xa1   : > { %v702_v6 = vand.u32 4294901760, %v701_v62 }
  0xa2   : > { %511 = vmatpush.msra.mxu1 %v510_v4 }
  0xa4   : > { %v443_v14 = vpop.xlane.xlu2 %442 }
  0xa5   : > { %v453_v16 = vsel %vm433_vm4, %v443_v14, 0.0  ;;  %v709_v14 = vsub.f32 %v665_v0, %v708_v7 }
  0xa6   : > { %v446_v17 = vpop.xlane.xlu0 %445  ;;  %v457_v18 = vadd.f32 %v453_v16, %v430_v13  ;;  %v413_v21 = vpop.xlane.xlu1 %412  ;;  %v703_v13 = vsub.f32 %v701_v62, %v702_v6 }
  0xa7   : > { %v454_v19 = vsel %vm433_vm4, %v446_v17, 0.0  ;;  %v425_v29 = vsel %vm409_vm3, %v413_v21, 0.0 }
  0xa8   : > { %v458_v22 = vadd.f32 %v454_v19, %v431_v15  ;;  %v481_v27 = vand.u32 4294901760, %v457_v18  ;;  %v429_v36 = vadd.f32 %v425_v29, %v405_v31  ;;  %v704_v21 = vand.u32 4294901760, %v703_v13 }
  0xaa   : > { %v479_v28 = vand.u32 4294901760, %v458_v22  ;;  %v519_v30 = vsub.f32 %v457_v18, %v481_v27 }
  0xac   : > { %480 = vmatpush.msra.mxu0 %v479_v28  ;;  %580 = vmatpush.msra.mxu3 %v479_v28  ;;  %v513_v32 = vsub.f32 %v458_v22, %v479_v28  ;;  %v520_v35 = vand.u32 4294901760, %v519_v30  ;;  %v710_v22 = vand.u32 4294901760, %v709_v14 }
  0xae   : > { %482 = vmatpush.msra.mxu0 %v481_v27  ;;  %552 = vmatpush.msra.mxu2 %v513_v32  ;;  %v440_v37 = vpop.xlane.xlu0 %439  ;;  %v514_v38 = vand.u32 4294901760, %v513_v32  ;;  %v521_v42 = vsub.f32 %v519_v30, %v520_v35 }
  0xaf   : > { %582 = vmatpush.msra.mxu3 %v481_v27  ;;  %v452_v39 = vsel %vm433_vm4, %v440_v37, 0.0 }
  0xb0   : > { %v456_v40 = vadd.f32 %v452_v39, %v429_v36  ;;  %555 = vmatpush.msra.mxu2 %v519_v30  ;;  %v515_v41 = vsub.f32 %v513_v32, %v514_v38  ;;  %v522_v47 = vand.u32 4294901760, %v521_v42 }
  0xb2   : > { %v483_v45 = vand.u32 4294901760, %v456_v40  ;;  %v516_v46 = vand.u32 4294901760, %v515_v41 }
  0xb4   : > { %484 = vmatpush.msra.mxu0 %v483_v45  ;;  %517 = vmatpush.msra.mxu1 %v516_v46  ;;  %v525_v48 = vsub.f32 %v456_v40, %v483_v45  ;;  %v3349_v40 = vmov 256.0  }
  0xb5   : > { %584 = vmatpush.msra.mxu3 %v483_v45  ;;  %490 = vmatmul.f32.vlgmr.msra.gmra.mxu0 %v489_v49  ;;  %3268 = vrcp.f32 %v3349_v40 }
  0xb6   : > { %607 = vmatpush.msrb.mxu0 %v508_v61  ;;  %523 = vmatpush.msra.mxu1 %v522_v47  ;;  %v526_v50 = vand.u32 4294901760, %v525_v48  ;;  %v651_v61 = vld [vmem:[%s4573_s5 + $0x8] sm:$0xff] }
  0xb7   : > { %558 = vmatpush.msra.mxu2 %v525_v48  ;;  %588 = vmatmul.f32.vlgmr.msra.gmra.mxu3 %v487_v33  ;;  %v659_v3 = vsel %vm654_vm6, %v651_v61, 0 }
  0xb8   : > { %611 = vmatpush.msrb.mxu0 %v514_v38  ;;  %561 = vmatmul.f32.vlgmr.msra.gmra.mxu2 %v486_v23  ;;  %v527_v51 = vsub.f32 %v525_v48, %v526_v50  ;;  %v692_v10 = vand.u32 4294901760, %v659_v3  ;;  %v3350_v48 = vmov 1024.0  }
  0xb9   : > { %3270 = vrcp.f32 %v3350_v48 }
  0xba   : > { %615 = vmatpush.msrb.mxu0 %v520_v35  ;;  %v528_v52 = vand.u32 4294901760, %v527_v51  ;;  %v693_v17 = vsub.f32 %v659_v3, %v692_v10 }
  0xbb   : > { %v3269_v43 = vpop.eup %3268 }
  0xbc   : > { %619 = vmatpush.msrb.mxu0 %v526_v50  ;;  %529 = vmatpush.msra.mxu1 %v528_v52  ;;  %v694_v25 = vand.u32 4294901760, %v693_v17  ;;  %v1059_v47 = vmul.f32 256.0, %v3269_v43  ;;  %vm1063_vm7 = vweird.f32 %v3269_v43 }
  0xbd   : > { %531 = vmatmul.f32.vlgmr.msra.gmra.mxu1 %v485_v12  ;;  %621 = vmatmul.f32.vlgmr.msrb.gmra.mxu0 %v485_v12 }
  0xbe   : > { %638 = vmatpush.msrb.mxu1 %v3500_v58  ;;  %v3547_v58 = vand.u32 4294901760, %v656_v56  ;;  %v695_v30 = vsub.f32 %v693_v17, %v694_v25  ;;  %v1060_v51 = vsub.f32 1.0, %v1059_v47 }
  0xbf   : > { %v3271_v53 = vpop.eup %3270 }
  0xc0   : > { %640 = vmatpush.msrb.mxu1 %v479_v28  ;;  %v685_v63 = vsub.f32 %v656_v56, %v3547_v58  ;;  %v711_v28 = vsub.f32 %v709_v14, %v710_v22  ;;  %v696_v35 = vand.u32 4294901760, %v695_v30  ;;  %vm915_vm8 = vweird.f32 %v3271_v53 }
  0xc2   : > { %642 = vmatpush.msrb.mxu1 %v481_v27  ;;  %v686_v9 = vand.u32 4294901760, %v685_v63  ;;  %v712_v32 = vand.u32 4294901760, %v711_v28 }
  0xc4   : > { %644 = vmatpush.msrb.mxu1 %v483_v45  ;;  %v687_v16 = vsub.f32 %v685_v63, %v686_v9 }
  0xc5   : > { %646 = vmatmul.f32.vlgmr.msrb.gmra.mxu1 %v485_v12 }
  0xc6   : > { %v688_v24 = vand.u32 4294901760, %v687_v16 }
 0x132   : > { %v491_v59 = vpop.f32.mrf.mxu0 }
 0x13a   : > { %v532_v1 = vpop.f32.mrf.mxu1  ;;  %v589_v5 = vpop.f32.mrf.mxu3 }
 0x13b   : > { %v562_v2 = vpop.f32.mrf.mxu2  ;;  %v533_v4 = vadd.f32 %v532_v1, %v491_v59  ;;  %v622_v11 = vpop.f32.mrf.mxu0  ;;  %v911_v59 = vmul.f32 1024.0, %v3271_v53 }
 0x13d   : > { %v563_v8 = vadd.f32 %v562_v2, %v533_v4 }
 0x13f   : > { %v590_v12 = vadd.f32 %v589_v5, %v563_v8 }
 0x141   : > { %v623_v15 = vadd.f32 %v622_v11, %v590_v12 }
 0x142   : > { %v647_v18 = vpop.f32.mrf.mxu1 }
 0x143   : > { %v648_v19 = vadd.f32 %v647_v18, %v623_v15 }
 0x145   : > { %v682_v23 = vand.u32 4294901760, %v648_v19 }
 0x147   : > { %v733_v27 = vsub.f32 %v648_v19, %v682_v23  ;;  %683 = vmatpush.msrb.mxu2 %v682_v23  ;;  %3204 = vmatpush.msrb.mxu3 %v682_v23 }
 0x148   : > { %810 = vmatpush.msra.mxu1 %v682_v23  ;;  %705 = vmatmul.f32.vlgmr.msrb.gmra.mxu3 %v704_v21 }
 0x149   : > { %772 = vmatpush.msra.mxu0 %v733_v27  ;;  %v734_v29 = vand.u32 4294901760, %v733_v27  ;;  %689 = vmatmul.f32.vlgmr.msrb.gmra.mxu2 %v688_v24 }
 0x14a   : > { %775 = vmatmul.f32.vlgmr.msra.gmra.mxu0 %v685_v63  ;;  %814 = vmatmul.f32.vlgmr.msra.gmra.mxu1 %v686_v9  ;;  %v912_v63 = vsub.f32 1.0, %v911_v59 }
 0x14b   : > { %854 = vmatpush.msra.mxu2 %v734_v29  ;;  %v735_v31 = vsub.f32 %v733_v27, %v734_v29 }
 0x14d   : > { %v736_v33 = vand.u32 4294901760, %v735_v31 }
 0x14f   : > { %737 = vmatpush.msra.mxu3 %v736_v33 }
 0x150   : > { %713 = vmatmul.f32.gmra.mxu3 %v712_v32 }
 0x151   : > { %888 = vmatpush.msrb.mxu3 %v682_v23  ;;  %697 = vmatmul.f32.gmra.mxu2 %v696_v35 }
 0x152   : > { %780 = vmatmul.f32.gmra.mxu0 %v693_v17  ;;  %820 = vmatmul.f32.gmra.mxu1 %v694_v25 }
 0x158   : > { %739 = vmatmul.f32.vlgmr.msra.gmra.mxu3 %v3547_v58 }
 0x159   : > { %856 = vmatmul.f32.vlgmr.msra.gmra.mxu2 %v3547_v58 }
 0x15a   : > { %785 = vmatmul.f32.gmra.mxu0 %v701_v62  ;;  %826 = vmatmul.f32.gmra.mxu1 %v702_v6 }
 0x160   : > { %743 = vmatmul.f32.gmra.mxu3 %v692_v10 }
 0x161   : > { %860 = vmatmul.f32.gmra.mxu2 %v692_v10 }
 0x162   : > { %790 = vmatmul.f32.gmra.mxu0 %v709_v14  ;;  %832 = vmatmul.f32.gmra.mxu1 %v710_v22 }
 0x168   : > { %747 = vmatmul.f32.gmra.mxu3 %v3545_v57 }
 0x169   : > { %864 = vmatmul.f32.gmra.mxu2 %v3545_v57 }
 0x170   : > { %751 = vmatmul.f32.gmra.mxu3 %v708_v7 }
 0x171   : > { %868 = vmatmul.f32.gmra.mxu2 %v708_v7 }
 0x178   : > { %890 = vmatmul.f32.vlgmr.msrb.gmra.mxu3 %v3547_v58 }
 0x180   : > { %894 = vmatmul.f32.gmra.mxu3 %v692_v10 }
 0x188   : > { %898 = vmatmul.f32.gmra.mxu3 %v3545_v57  ;;  %v1061_v57 = vmul.f32 %v3269_v43, %v1060_v51 }
 0x18a   : > { %v1062_v62 = vadd.f32 %v3269_v43, %v1061_v57 }
 0x18c   : > { %v1064_v4 = vsel %vm1063_vm7, %v3269_v43, %v1062_v62 }
 0x190   : > { %902 = vmatmul.f32.gmra.mxu3 %v708_v7  ;;  %v913_v7 = vmul.f32 %v3271_v53, %v912_v63 }
 0x192   : > { %v914_v13 = vadd.f32 %v3271_v53, %v913_v7  ;;  %v3604_v7 = vld [vmem:[%s4572_s4 + $0x18] sm:$0xff] }
 0x194   : > { %v3571_v19 = vsel %vm915_vm8, %v3271_v53, %v914_v13 }
 0x1c7   : > { %v776_v45 = vpop.f32.mrf.mxu0  ;;  %v815_v49 = vpop.f32.mrf.mxu1 }
 0x1cb   : > { %v706_v36 = vpop.f32.mrf.mxu3 }
 0x1cc   : > { %v690_v39 = vpop.f32.mrf.mxu2 }
 0x1cf   : > { %v781_v55 = vpop.f32.mrf.mxu0  ;;  %v821_v61 = vpop.f32.mrf.mxu1 }
 0x1d3   : > { %v714_v37 = vpop.f32.mrf.mxu3 }
 0x1d4   : > { %v698_v42 = vpop.f32.mrf.mxu2 }
 0x1d7   : > { %v786_v6 = vpop.f32.mrf.mxu0  ;;  %v827_v12 = vpop.f32.mrf.mxu1 }
 0x1db   : > { %v740_v38 = vpop.f32.mrf.mxu3 }
 0x1dc   : > { %v741_v50 = vadd.f32 %v740_v38, %v690_v39  ;;  %v857_v52 = vpop.f32.mrf.mxu2 }
 0x1de   : > { %v777_v54 = vadd.f32 %v776_v45, %v741_v50 }
 0x1df   : > { %v791_v24 = vpop.f32.mrf.mxu0  ;;  %v833_v28 = vpop.f32.mrf.mxu1 }
 0x1e0   : > { %v816_v58 = vadd.f32 %v815_v49, %v777_v54 }
 0x1e2   : > { %v858_v0 = vadd.f32 %v857_v52, %v816_v58 }
 0x1e3   : > { %v744_v41 = vpop.f32.mrf.mxu3 }
 0x1e4   : > { %v745_v60 = vadd.f32 %v744_v41, %v698_v42  ;;  %v861_v2 = vpop.f32.mrf.mxu2 }
 0x1e6   : > { %v782_v1 = vadd.f32 %v781_v55, %v745_v60 }
 0x1e8   : > { %v822_v8 = vadd.f32 %v821_v61, %v782_v1 }
 0x1ea   : > { %v862_v14 = vadd.f32 %v861_v2, %v822_v8 }
 0x1eb   : > { %v748_v46 = vpop.f32.mrf.mxu3 }
 0x1ec   : > { %v749_v9 = vadd.f32 %v748_v46, %v706_v36  ;;  %v865_v18 = vpop.f32.mrf.mxu2 }
 0x1ee   : > { %v787_v15 = vadd.f32 %v786_v6, %v749_v9 }
 0x1f0   : > { %v828_v21 = vadd.f32 %v827_v12, %v787_v15 }
 0x1f2   : > { %v866_v25 = vadd.f32 %v865_v18, %v828_v21 }
 0x1f3   : > { %v752_v56 = vpop.f32.mrf.mxu3 }
 0x1f4   : > { %v753_v22 = vadd.f32 %v752_v56, %v714_v37  ;;  %v869_v33 = vpop.f32.mrf.mxu2 }
 0x1f6   : > { %v792_v27 = vadd.f32 %v791_v24, %v753_v22 }
 0x1f8   : > { %v834_v31 = vadd.f32 %v833_v28, %v792_v27 }
 0x1fa   : > { %v870_v36 = vadd.f32 %v869_v33, %v834_v31 }
 0x1fb   : > { %v891_v3 = vpop.f32.mrf.mxu3 }
 0x1fc   : > { %v3563_v5 = vadd.f32 %v891_v3, %v858_v0 }
 0x1fe   : > { %v3566_v10 = vmul.f32 %v1064_v4, %v3563_v5 }
 0x200   : > { %v1069_v11 = vmul.f32 %v3566_v10, %v3566_v10 }
 0x202   : > { %1077 = vrot.lane.b32.xlu0 %v1069_v11, %s3351_s9  ;;  %v3609_v11 = vld [vmem:[%s4572_s4] sm:$0xff] }
 0x203   : > { %v895_v16 = vpop.f32.mrf.mxu3 }
 0x204   : > { %v896_v17 = vadd.f32 %v895_v16, %v862_v14 }
 0x206   : > { %v3574_v23 = vmul.f32 %v3571_v19, %v896_v17  ;;  %v3589_v41 = vmul.f32 %v1064_v4, %v896_v17 }
 0x208   : > { %v1070_v42 = vmul.f32 %v3589_v41, %v3589_v41 }
 0x20b   : > { %v899_v29 = vpop.f32.mrf.mxu3 }
 0x20c   : > { %v3576_v30 = vadd.f32 %v899_v29, %v866_v25 }
 0x20e   : > { %v3579_v32 = vmul.f32 %v1064_v4, %v3576_v30  ;;  %v3624_v21 = vmul.f32 %v3571_v19, %v3576_v30  ;;  %v3637_v30 = vmul.f32 %v3571_v19, %v3563_v5  ;;  %v3653_v5 = vld [vmem:[%s4572_s4 + $0x8] sm:$0xff] }
 0x210   : > { %v1071_v35 = vmul.f32 %v3579_v32, %v3579_v32  ;;  %v923_v28 = vmul.f32 %v3624_v21, %v3624_v21 }
 0x212   : > { %1081 = vrot.lane.b32.xlu1 %v1071_v35, %s3351_s9 }
 0x213   : > { %v903_v37 = vpop.f32.mrf.mxu3 }
 0x214   : > { %v904_v38 = vadd.f32 %v903_v37, %v870_v36  ;;  %v3642_v37 = vld [vmem:[%s4572_s4 + $0x10] sm:$0xff] }
 0x216   : > { %v3584_v39 = vmul.f32 %v1064_v4, %v904_v38  ;;  %v3627_v22 = vmul.f32 %v3571_v19, %v904_v38 }
 0x218   : > { %v1072_v40 = vmul.f32 %v3584_v39, %v3584_v39  ;;  %v924_v33 = vmul.f32 %v3627_v22, %v3627_v22 }
 0x21a   : > { %1083 = vrot.lane.b32.xlu2 %v1072_v40, %s3351_s9 }
 0x222   : > { %1079 = vrot.lane.b32.xlu2 %v1070_v42, %s3351_s9 }
 0x274   : > { %v1084_v43 = vpop.permute.xlu2 %1083  ;;  %v1078_v45 = vpop.permute.xlu0 %1077 }
 0x275   : > { %v1092_v46 = vsub.f32 %v3584_v39, %v1084_v43  ;;  %v1089_v47 = vsub.f32 %v3566_v10, %v1078_v45  ;;  %v921_v43 = vmul.f32 %v3637_v30, %v3637_v30 }
 0x277   : > { %v1096_v48 = vmax.f32 %v1092_v46, 0.0  ;;  %v1093_v49 = vmax.f32 %v1089_v47, 0.0  ;;  %v3353_v47 = vmov 3  }
 0x278   : > { %3253 = vset.pattern.permute.xlu0 %v3353_v47  ;;  %3254 = vset.pattern.permute.xlu2 %v3353_v47 }
 0x279   : > { %v1100_v50 = vadd.f32 1e-05, %v1096_v48  ;;  %v1097_v51 = vadd.f32 1e-05, %v1093_v49  ;;  %3255 = vset.pattern.permute.xlu1 %v3353_v47 }
 0x27b   : > { %3272 = vrsqrt.f32 %v1100_v50  ;;  %vm1137_vm11 = vweird.f32 %v1100_v50  ;;  %vm1107_vm12 = vweird.f32 %v1097_v51 }
 0x27c   : > { %3274 = vrsqrt.f32 %v1097_v51  ;;  %v1080_v52 = vpop.permute.xlu2 %1079 }
 0x27d   : > { %v1090_v53 = vsub.f32 %v3589_v41, %v1080_v52 }
 0x27f   : > { %v1094_v54 = vmax.f32 %v1090_v53, 0.0 }
 0x281   : > { %v3273_v55 = vpop.eup %3272  ;;  %v3597_v56 = vadd.f32 1e-05, %v1094_v54 }
 0x282   : > { %v3275_v57 = vpop.eup %3274  ;;  %v1132_v59 = vmul.f32 %v3273_v55, %v1100_v50  ;;  %vm1138_vm9 = vweird.f32 %v3273_v55 }
 0x283   : > { %v1102_v58 = vmul.f32 %v3275_v57, %v1097_v51  ;;  %3276 = vrsqrt.f32 %v3597_v56  ;;  %vm1108_vm10 = vweird.f32 %v3275_v57  ;;  %vm1139_vm13 = vmor %vm1137_vm11, %vm1138_vm9  ;;  %vm1117_vm4 = vweird.f32 %v3597_v56 }
 0x284   : > { %v1133_v60 = vmul.f32 %v3273_v55, %v1132_v59  ;;  %v1082_v61 = vpop.permute.xlu1 %1081  ;;  %vm1109_vm14 = vmor %vm1107_vm12, %vm1108_vm10 }
 0x285   : > { %v1103_v62 = vmul.f32 %v3275_v57, %v1102_v58  ;;  %v1091_v63 = vsub.f32 %v3579_v32, %v1082_v61 }
 0x286   : > { %v1134_v0 = vmul.f32 0.5, %v1133_v60 }
 0x287   : > { %v1104_v1 = vmul.f32 0.5, %v1103_v62  ;;  %v1095_v2 = vmax.f32 %v1091_v63, 0.0 }
 0x288   : > { %v1135_v3 = vsub.f32 1.5, %v1134_v0 }
 0x289   : > { %v1105_v4 = vsub.f32 1.5, %v1104_v1  ;;  %v1099_v6 = vadd.f32 1e-05, %v1095_v2  ;;  %v3277_v9 = vpop.eup %3276 }
 0x28a   : > { %v1136_v8 = vmul.f32 %v3273_v55, %v1135_v3  ;;  %v1112_v16 = vmul.f32 %v3277_v9, %v3597_v56  ;;  %vm1118_vm3 = vweird.f32 %v3277_v9 }
 0x28b   : > { %3278 = vrsqrt.f32 %v1099_v6  ;;  %v1106_v12 = vmul.f32 %v3275_v57, %v1105_v4  ;;  %vm1127_vm1 = vweird.f32 %v1099_v6  ;;  %vm1119_vm6 = vmor %vm1117_vm4, %vm1118_vm3  ;;  %vm1053_vm4 = vcmask 7168  }
 0x28c   : > { %v1140_v13 = vsel %vm1139_vm13, %v3273_v55, %v1136_v8  ;;  %v1113_v24 = vmul.f32 %v3277_v9, %v1112_v16 }
 0x28d   : > { %v3612_v14 = vmul.f32 %v1140_v13, %v3604_v7  ;;  %v1110_v15 = vsel %vm1109_vm14, %v3275_v57, %v1106_v12 }
 0x28e   : > { %v3616_v17 = vmul.f32 %v1110_v15, %v3609_v11  ;;  %v1114_v29 = vmul.f32 0.5, %v1113_v24 }
 0x28f   : > { %1175 = vrot.lane.b32.xlu0 %v3612_v14, %s3352_s17 }
 0x290   : > { %1169 = vrot.lane.b32.xlu2 %v3616_v17, %s3352_s17  ;;  %v1115_v36 = vsub.f32 1.5, %v1114_v29 }
 0x291   : > { %v3279_v18 = vpop.eup %3278 }
 0x292   : > { %v1122_v25 = vmul.f32 %v3279_v18, %v1099_v6  ;;  %vm1128_vm15 = vweird.f32 %v3279_v18  ;;  %v1116_v45 = vmul.f32 %v3277_v9, %v1115_v36 }
 0x293   : > { %vm1129_vm2 = vmor %vm1127_vm1, %vm1128_vm15 }
 0x294   : > { %v1123_v27 = vmul.f32 %v3279_v18, %v1122_v25  ;;  %v1120_v19 = vsel %vm1119_vm6, %v3277_v9, %v1116_v45  ;;  %vm1454_vm6 = vcmask 257024  }
 0x295   : > { %v1142_v46 = vmul.f32 %v1120_v19, %v3653_v5 }
 0x296   : > { %v1124_v31 = vmul.f32 0.5, %v1123_v27 }
 0x297   : > { %933 = vrot.lane.b32.xlu0 %v923_v28, %s3351_s9 }
 0x298   : > { %v1125_v35 = vsub.f32 1.5, %v1124_v31  ;;  %935 = vrot.lane.b32.xlu2 %v924_v33, %s3351_s9 }
 0x29a   : > { %v1126_v38 = vmul.f32 %v3279_v18, %v1125_v35 }
 0x29c   : > { %v1130_v40 = vsel %vm1129_vm2, %v3279_v18, %v1126_v38 }
 0x29d   : > { %v1143_v42 = vmul.f32 %v1130_v40, %v3642_v37 }
 0x29f   : > { %1173 = vrot.lane.b32.xlu1 %v1143_v42, %s3352_s17 }
 0x2a0   : > { %929 = vrot.lane.b32.xlu2 %v921_v43, %s3351_s9 }
 0x2a7   : > { %1171 = vrot.lane.b32.xlu1 %v1142_v46, %s3352_s17 }
 0x2ea   : > { %v1170_v50 = vpop.permute.xlu2 %1169 }
 0x2eb   : > { %v1181_v51 = vmul.f32 %v1170_v50, %v3566_v10  ;;  %v3356_v10 = vmov 4  }
 0x301   : > { %v1176_v48 = vpop.permute.xlu0 %1175 }
 0x302   : > { %v1184_v49 = vmul.f32 %v1176_v48, %v3584_v39  ;;  %v922_v39 = vmul.f32 %v3574_v23, %v3574_v23 }
 0x304   : > { %1195 = vrot.lane.b32.xlu0 %v1184_v49, %s3354_s22 }
 0x309   : > { %v934_v58 = vpop.permute.xlu0 %933 }
 0x30a   : > { %v943_v61 = vsub.f32 %v3624_v21, %v934_v58 }
 0x30c   : > { %1189 = vrot.lane.b32.xlu0 %v1181_v51, %s3354_s22  ;;  %v947_v1 = vmax.f32 %v943_v61, 0.0 }
 0x30e   : > { %v951_v4 = vadd.f32 1e-05, %v947_v1 }
 0x310   : > { %vm979_vm14 = vweird.f32 %v951_v4 }
 0x311   : > { %v1174_v52 = vpop.permute.xlu1 %1173 }
 0x312   : > { %v1183_v53 = vmul.f32 %v1174_v52, %v3579_v32  ;;  %v936_v32 = vpop.permute.xlu2 %935 }
 0x314   : > { %1193 = vrot.lane.b32.xlu1 %v1183_v53, %s3354_s22  ;;  %1003 = vrot.lane.b32.xlu0 %v3604_v7, %s3355_s23 }
 0x319   : > { %v1172_v54 = vpop.permute.xlu1 %1171 }
 0x31a   : > { %v1182_v55 = vmul.f32 %v1172_v54, %v3589_v41  ;;  %v944_v41 = vsub.f32 %v3627_v22, %v936_v32  ;;  %v930_v59 = vpop.permute.xlu2 %929 }
 0x31b   : > { %v941_v60 = vsub.f32 %v3637_v30, %v930_v59 }
 0x31c   : > { %1191 = vrot.lane.b32.xlu2 %v1182_v55, %s3354_s22  ;;  %1157 = vperm.xlu0 %3253, %v1143_v42   ;;  %v948_v56 = vmax.f32 %v944_v41, 0.0 }
 0x31d   : > { %931 = vrot.lane.b32.xlu1 %v922_v39, %s3351_s9  ;;  %v945_v63 = vmax.f32 %v941_v60, 0.0 }
 0x31e   : > { %v952_v57 = vadd.f32 1e-05, %v948_v56 }
 0x31f   : > { %v949_v2 = vadd.f32 1e-05, %v945_v63 }
 0x320   : > { %3280 = vrsqrt.f32 %v952_v57  ;;  %vm989_vm8 = vweird.f32 %v952_v57 }
 0x321   : > { %3282 = vrsqrt.f32 %v949_v2  ;;  %vm959_vm12 = vweird.f32 %v949_v2 }
 0x322   : > { %3284 = vrsqrt.f32 %v951_v4 }
 0x324   : > { %997 = vrot.lane.b32.xlu2 %v3609_v11, %s3355_s23  ;;  %1152 = vperm.xlu0 %3253, %v1142_v46  }
 0x325   : > { %1001 = vrot.lane.b32.xlu1 %v3642_v37, %s3355_s23 }
 0x326   : > { %v3281_v62 = vpop.eup %3280 }
 0x327   : > { %v984_v0 = vmul.f32 %v3281_v62, %v952_v57  ;;  %vm990_vm7 = vweird.f32 %v3281_v62 }
 0x328   : > { %vm991_vm9 = vmor %vm989_vm8, %vm990_vm7  ;;  %vm1344_vm7 = vcmask 519168  }
 0x329   : > { %v985_v3 = vmul.f32 %v3281_v62, %v984_v0 }
 0x32b   : > { %v986_v9 = vmul.f32 0.5, %v985_v3 }
 0x32c   : > { %1162 = vperm.xlu2 %3254, %v3612_v14   ;;  %v3283_v14 = vpop.eup %3282 }
 0x32d   : > { %999 = vrot.lane.b32.xlu1 %v3653_v5, %s3355_s23  ;;  %v987_v13 = vsub.f32 1.5, %v986_v9  ;;  %v3285_v16 = vpop.eup %3284  ;;  %vm960_vm10 = vweird.f32 %v3283_v14 }
 0x32e   : > { %v974_v24 = vmul.f32 %v3285_v16, %v951_v4  ;;  %vm980_vm11 = vweird.f32 %v3285_v16  ;;  %vm961_vm13 = vmor %vm959_vm12, %vm960_vm10 }
 0x32f   : > { %v988_v18 = vmul.f32 %v3281_v62, %v987_v13  ;;  %vm981_vm15 = vmor %vm979_vm14, %vm980_vm11  ;;  %vm2120_vm14 = vcmask 121856  }
 0x330   : > { %v975_v35 = vmul.f32 %v3285_v16, %v974_v24 }
 0x331   : > { %v992_v29 = vsel %vm991_vm9, %v3281_v62, %v988_v18 }
 0x332   : > { %v976_v40 = vmul.f32 0.5, %v975_v35  ;;  %v3170_v35 = vld [vmem:[%s4571_s3] sm:$0xff] }
 0x334   : > { %3257 = vset.pattern.permute.xlu2 %v3356_v10  ;;  %v977_v19 = vsub.f32 1.5, %v976_v40 }
 0x335   : > { %1147 = vperm.xlu1 %3255, %v3616_v17   ;;  %v954_v17 = vmul.f32 %v3283_v14, %v949_v2 }
 0x336   : > { %v978_v49 = vmul.f32 %v3285_v16, %v977_v19 }
 0x337   : > { %v955_v25 = vmul.f32 %v3283_v14, %v954_v17  ;;  %v3358_v17 = vmov 1  }
 0x338   : > { %v982_v54 = vsel %vm981_vm15, %v3285_v16, %v978_v49  ;;  %3260 = vset.pattern.permute.xlu0 %v3358_v17 }
 0x339   : > { %v956_v38 = vmul.f32 0.5, %v955_v25 }
 0x33b   : > { %v957_v42 = vsub.f32 1.5, %v956_v38  ;;  %v3171_v38 = vld [vmem:[%s4571_s3 + $0x8] sm:$0xff] }
 0x33d   : > { %3256 = vset.pattern.permute.xlu1 %v3356_v10  ;;  %v958_v47 = vmul.f32 %v3283_v14, %v957_v42 }
 0x33f   : > { %v962_v52 = vsel %vm961_vm13, %v3283_v14, %v958_v47 }
 0x376   : > { %v1196_v6 = vpop.permute.xlu0 %1195  ;;  %v1192_v36 = vpop.permute.xlu2 %1191 }
 0x377   : > { %v1204_v8 = vsub.f32 %v3604_v7, %v1196_v6  ;;  %v1202_v43 = vsub.f32 %v3653_v5, %v1192_v36  ;;  %v3324_v6 = vld [vmem:[%s3442_s13 + $0x18] sm:$0xff]  ;;  %s3362_s13 = smov 113  }
 0x379   : > { %1222 = vperm.xlu2 %3257, %v1204_v8  }
 0x37e   : > { %v1190_v12 = vpop.permute.xlu0 %1189  ;;  %v998_v50 = vpop.permute.xlu2 %997 }
 0x37f   : > { %v1201_v15 = vsub.f32 %v3609_v11, %v1190_v12  ;;  %v1009_v53 = vmul.f32 %v998_v50, %v962_v52 }
 0x381   : > { %1207 = vperm.xlu2 %3257, %v1201_v15  }
 0x386   : > { %v1194_v27 = vpop.permute.xlu1 %1193  ;;  %v1004_v28 = vpop.permute.xlu0 %1003 }
 0x387   : > { %v1203_v31 = vsub.f32 %v3642_v37, %v1194_v27  ;;  %v1012_v33 = vmul.f32 %v1004_v28, %v992_v29  ;;  %v1163_v62 = vpop.permute.xlu2 %1162 }
 0x388   : > { %v1168_v8 = vmul.f32 %v3324_v6, %v1163_v62  ;;  %v1555_v6 = vld [vmem:[%s3449_s16 + $0x28] sm:$0xff] }
 0x389   : > { %1023 = vrot.lane.b32.xlu2 %v1012_v33, %s3352_s17  ;;  %1217 = vperm.xlu1 %3256, %v1203_v31  }
 0x38a   : > { %3258 = vset.pattern.permute.xlu2 %v3358_v17 }
 0x38e   : > { %v1158_v4 = vpop.permute.xlu0 %1157 }
 0x38f   : > { %v932_v45 = vpop.permute.xlu1 %931  ;;  %v1167_v9 = vmul.f32 %v1158_v4, %v3460_v20  ;;  %v1554_v4 = vld [vmem:[%s3449_s16 + $0x20] sm:$0xff] }
 0x390   : > { %v942_v46 = vsub.f32 %v3574_v23, %v932_v45 }
 0x391   : > { %1212 = vperm.xlu1 %3256, %v1202_v43  }
 0x392   : > { %v946_v48 = vmax.f32 %v942_v46, 0.0 }
 0x394   : > { %v950_v51 = vadd.f32 1e-05, %v946_v48 }
 0x396   : > { %3286 = vrsqrt.f32 %v950_v51  ;;  %vm969_vm2 = vweird.f32 %v950_v51  ;;  %v1153_v16 = vpop.permute.xlu0 %1152 }
 0x397   : > { %v1002_v55 = vpop.permute.xlu1 %1001 }
 0x398   : > { %v1011_v39 = vmul.f32 %v1002_v55, %v982_v54 }
 0x399   : > { %1017 = vrot.lane.b32.xlu1 %v1009_v53, %s3352_s17 }
 0x39a   : > { %1021 = vrot.lane.b32.xlu0 %v1011_v39, %s3352_s17  ;;  %3259 = vset.pattern.permute.xlu1 %v3358_v17 }
 0x39c   : > { %v3287_v10 = vpop.eup %3286 }
 0x39d   : > { %v964_v32 = vmul.f32 %v3287_v10, %v950_v51  ;;  %vm970_vm1 = vweird.f32 %v3287_v10 }
 0x39e   : > { %vm971_vm3 = vmor %vm969_vm2, %vm970_vm1 }
 0x39f   : > { %v965_v41 = vmul.f32 %v3287_v10, %v964_v32  ;;  %v1000_v60 = vpop.permute.xlu1 %999 }
 0x3a1   : > { %v966_v56 = vmul.f32 0.5, %v965_v41 }
 0x3a3   : > { %v967_v57 = vsub.f32 1.5, %v966_v56 }
 0x3a5   : > { %v968_v59 = vmul.f32 %v3287_v10, %v967_v57  ;;  %v3175_v57 = vld [vmem:[%s4570_s2 + $0x8] sm:$0xff] }
 0x3a6   : > { %1423 = vmatpush.bf16.msrb.mxu1 %v3175_v57 }
 0x3a7   : > { %v972_v58 = vsel %vm971_vm3, %v3287_v10, %v968_v59  ;;  %v1148_v3 = vpop.permute.xlu1 %1147 }
 0x3a8   : > { %v1010_v61 = vmul.f32 %v1000_v60, %v972_v58  ;;  %v1165_v18 = vmul.f32 %v1148_v3, %v3477_v34  ;;  %v3174_v58 = vld [vmem:[%s4570_s2] sm:$0xff] }
 0x3aa   : > { %1019 = vrot.lane.b32.xlu0 %v1010_v61, %s3352_s17  ;;  %1424 = vmatpush.bf16.msrb.mxu1 %v3174_v58 }
 0x3d3   : > { %v1223_v63 = vpop.permute.xlu2 %1222 }
 0x3d4   : > { %v1228_v13 = vadd.f32 %v1223_v63, %v1168_v8 }
 0x3db   : > { %v1208_v0 = vpop.permute.xlu2 %1207 }
 0x3dc   : > { %v1225_v25 = vadd.f32 %v1208_v0, %v1165_v18 }
 0x3e3   : > { %v1024_v1 = vpop.permute.xlu2 %1023 }
 0x3e4   : > { %v1032_v2 = vmul.f32 %v1024_v1, %v3627_v22  ;;  %1057 = vst.msk [vmem:[#allocation5 + $0x18] sm:$0xff] %vm1053_vm4, %v1024_v1  ;;  %v1166_v22 = vmul.f32 %v1153_v16, %v3468_v26  ;;  %v3359_v26 = vmov 0  }
 0x3e5   : > { %1537 = vst [vmem:[#allocation6] sm:$0xf] %v3359_v26 }
 0x3e6   : > { %1043 = vrot.lane.b32.xlu1 %v1032_v2, %s3357_s24  ;;  %1538 = vst [vmem:[#allocation6 + $0x10] sm:$0xf] %v3359_v26 }
 0x3e7   : > { %1539 = vst [vmem:[#allocation6 + $0x20] sm:$0xf] %v3359_v26 }
 0x3e8   : > { %1540 = vst [vmem:[#allocation6 + $0x30] sm:$0xf] %v3359_v26 }
 0x3e9   : > { %1541 = vst [vmem:[#allocation6 + $0xc] sm:$0xf] %v3359_v26 }
 0x3ea   : > { %1542 = vst [vmem:[#allocation6 + $0x1c] sm:$0xf] %v3359_v26 }
 0x3eb   : > { %1543 = vst [vmem:[#allocation6 + $0x2c] sm:$0xf] %v3359_v26  ;;  %v1561_v51 = vld [vmem:[#allocation5 + $0x18] sm:$0xff] }
 0x3ec   : > { %1544 = vst [vmem:[#allocation6 + $0x3c] sm:$0xf] %v3359_v26 }
 0x3fb   : > { %v1218_v12 = vpop.permute.xlu1 %1217 }
 0x3fc   : > { %v1227_v14 = vadd.f32 %v1218_v12, %v1167_v9  ;;  %v1556_v9 = vld [vmem:[%s3449_s16 + $0x30] sm:$0xff]  ;;  %v1557_v12 = vld [vmem:[%s3449_s16 + $0x38] sm:$0xff] }
 0x3fe   : > { %v1230_v15 = vpack.c.bf16 %v1228_v13, %v1227_v14  ;;  %v1552_v13 = vld [vmem:[%s3449_s16 + $0x10] sm:$0xff]  ;;  %v1553_v14 = vld [vmem:[%s3449_s16 + $0x18] sm:$0xff] }
 0x400   : > { %1277 = vmatpush.bf16.msrb.mxu0 %v1230_v15 }
 0x403   : > { %v1213_v24 = vpop.permute.xlu1 %1212 }
 0x404   : > { %v1226_v27 = vadd.f32 %v1213_v24, %v1166_v22 }
 0x406   : > { %v1229_v28 = vpack.c.bf16 %v1226_v27, %v1225_v25  ;;  %v1550_v25 = vld [vmem:[%s3449_s16] sm:$0xff]  ;;  %v1551_v27 = vld [vmem:[%s3449_s16 + $0x8] sm:$0xff] }
 0x408   : > { %1278 = vmatpush.bf16.msrb.mxu0 %v1229_v28 }
 0x40b   : > { %v1018_v20 = vpop.permute.xlu1 %1017  ;;  %3011 = vmatmul.msk.bf16.vlgmr.msrb.gmra.mxu0 %vm4577_vm5, %v3170_v35 }
 0x40c   : > { %v1022_v29 = vpop.permute.xlu0 %1021  ;;  %v1029_v31 = vmul.f32 %v1018_v20, %v3637_v30  ;;  %1054 = vst.msk [vmem:[#allocation5] sm:$0xff] %vm1053_vm4, %v1018_v20 }
 0x40d   : > { %v1031_v33 = vmul.f32 %v1022_v29, %v3624_v21  ;;  %1056 = vst.msk [vmem:[#allocation5 + $0x10] sm:$0xff] %vm1053_vm4, %v1022_v29 }
 0x40e   : > { %1037 = vrot.lane.b32.xlu0 %v1029_v31, %s3357_s24 }
 0x40f   : > { %1041 = vrot.lane.b32.xlu2 %v1031_v33, %s3357_s24 }
 0x413   : > { %v1558_v36 = vld [vmem:[#allocation5] sm:$0xff] }
 0x414   : > { %v1560_v30 = vld [vmem:[#allocation5 + $0x10] sm:$0xff] }
 0x41b   : > { %3012 = vmatmul.msk.bf16.gmra.mxu0 %vm4577_vm5, %v3171_v38 }
 0x41c   : > { %v1020_v34 = vpop.permute.xlu0 %1019 }
 0x41d   : > { %v1030_v21 = vmul.f32 %v1020_v34, %v3574_v23  ;;  %1055 = vst.msk [vmem:[#allocation5 + $0x8] sm:$0xff] %vm1053_vm4, %v1020_v34 }
 0x41f   : > { %1039 = vrot.lane.b32.xlu2 %v1030_v21, %s3357_s24 }
 0x424   : > { %v1559_v23 = vld [vmem:[#allocation5 + $0x8] sm:$0xff] }
 0x427   : > { %1301 = vperm.xlu2 %3258, %v3609_v11  }
 0x42f   : > { %1313 = vperm.xlu2 %3258, %v3604_v7  }
 0x437   : > { %3261 = vset.pattern.permute.xlu2 %v3359_v26 }
 0x438   : > { %1574 = vperm.xlu2 %3261, %v1560_v30  }
 0x440   : > { %1564 = vperm.xlu2 %3261, %v1558_v36  }
 0x448   : > { %1569 = vperm.xlu2 %3261, %v1559_v23  }
 0x458   : > { %v1044_v40 = vpop.permute.xlu1 %1043 }
 0x459   : > { %v1052_v43 = vsub.f32 %v3604_v7, %v1044_v40 }
 0x469   : > { %v1042_v42 = vpop.permute.xlu2 %1041 }
 0x46a   : > { %v1051_v45 = vsub.f32 %v3642_v37, %v1042_v42 }
 0x46c   : > { %v1464_v19 = vpack.c.bf16 %v1052_v43, %v1051_v45 }
 0x46e   : > { %1469 = vrot.lane.b32.xlu1 %v1464_v19, %s3360_s12 }
 0x476   : > { %1305 = vperm.xlu1 %3259, %v3653_v5  }
 0x479   : > { %v1040_v46 = vpop.permute.xlu2 %1039 }
 0x47a   : > { %v1050_v48 = vsub.f32 %v3653_v5, %v1040_v46 }
 0x480   : > { %v1038_v47 = vpop.permute.xlu0 %1037 }
 0x481   : > { %v1049_v49 = vsub.f32 %v3609_v11, %v1038_v47  ;;  %v1302_v52 = vpop.permute.xlu2 %1301 }
 0x483   : > { %v1463_v50 = vpack.c.bf16 %v1050_v48, %v1049_v49 }
 0x485   : > { %1467 = vrot.lane.b32.xlu0 %v1463_v50, %s3360_s12  ;;  %s3367_s12 = smov 96  }
 0x488   : > { %v1280_v53 = vpop.f32.mrf.mxu0 }
 0x489   : > { %v1316_v54 = vadd.f32 %v1302_v52, %v1280_v53  ;;  %v1314_v56 = vpop.permute.xlu2 %1313 }
 0x48b   : > { %v1349_v55 = vmul.f32 0.17677669, %v1316_v54  ;;  %v3172_v54 = vld [vmem:[%s4571_s3 + $0x10] sm:$0xff] }
 0x48c   : > { %3013 = vmatmul.msk.bf16.gmra.mxu0 %vm4577_vm5, %v3172_v54 }
 0x48d   : > { %1309 = vperm.xlu0 %3260, %v3642_v37  }
 0x490   : > { %v1282_v10 = vpop.f32.mrf.mxu0 }
 0x492   : > { %v1575_v60 = vpop.permute.xlu2 %1574 }
 0x493   : > { %v1586_v17 = vmul.f32 %v1575_v60, %v1554_v4  ;;  %v1587_v22 = vmul.f32 %v1575_v60, %v1555_v6 }
 0x495   : > { %3262 = vset.pattern.permute.xlu0 %v3359_v26 }
 0x496   : > { %1579 = vperm.xlu0 %3262, %v1561_v51  }
 0x498   : > { %v1285_v62 = vpop.f32.mrf.mxu0 }
 0x49a   : > { %v1565_v63 = vpop.permute.xlu2 %1564 }
 0x49b   : > { %v1582_v34 = vmul.f32 %v1565_v63, %v1550_v25  ;;  %v1583_v21 = vmul.f32 %v1565_v63, %v1551_v27 }
 0x4a0   : > { %v1287_v3 = vpop.f32.mrf.mxu0 }
 0x4a1   : > { %v1319_v8 = vadd.f32 %v1314_v56, %v1287_v3 }
 0x4a2   : > { %v1570_v15 = vpop.permute.xlu2 %1569 }
 0x4a3   : > { %v1352_v28 = vmul.f32 0.17677669, %v1319_v8  ;;  %v1584_v20 = vmul.f32 %v1570_v15, %v1552_v13  ;;  %v1585_v29 = vmul.f32 %v1570_v15, %v1553_v14 }
 0x4a5   : > { %v1590_v30 = vpack.c.bf16 %v1584_v20, %v1582_v34  ;;  %v1591_v35 = vpack.c.bf16 %v1585_v29, %v1583_v21 }
 0x4ab   : > { %1353 = vxpose.xlu1.b32.start [1/4] (short) (narrow) %v1349_v55, 64 }
 0x4e0   : > { %v1470_v39 = vpop.permute.xlu1 %1469 }
 0x4e1   : > { %1485 = vmatpush.bf16.msrb.mxu2 %v1470_v39 }
 0x4e8   : > { %v1306_v32 = vpop.permute.xlu1 %1305 }
 0x4e9   : > { %v1317_v41 = vadd.f32 %v1306_v32, %v1282_v10  ;;  %v3173_v32 = vld [vmem:[%s4571_s3 + $0x18] sm:$0xff] }
 0x4ea   : > { %3014 = vmatmul.msk.bf16.gmra.mxu0 %vm4577_vm5, %v3173_v32 }
 0x4eb   : > { %v1350_v59 = vmul.f32 0.17677669, %v1317_v41 }
 0x4ed   : > { %1354 = vxpose.xlu1.b32.cont [2/4] (short) (narrow) %v1350_v59, 64 }
 0x4f7   : > { %v1468_v61 = vpop.permute.xlu0 %1467 }
 0x4f8   : > { %1486 = vmatpush.bf16.msrb.mxu2 %v1468_v61 }
 0x4fb   : > { %3027 = vmatmul.msk.bf16.vlgmr.msrb.gmra.mxu2 %vm4577_vm5, %v3174_v58 }
 0x4ff   : > { %v1310_v0 = vpop.permute.xlu0 %1309 }
 0x500   : > { %v1318_v1 = vadd.f32 %v1310_v0, %v1285_v62 }
 0x502   : > { %v1351_v2 = vmul.f32 0.17677669, %v1318_v1 }
 0x504   : > { %1355 = vxpose.xlu1.b32.cont [3/4] (short) (narrow) %v1351_v2, 64 }
 0x508   : > { %v1580_v16 = vpop.permute.xlu0 %1579 }
 0x509   : > { %v1588_v18 = vmul.f32 %v1580_v16, %v1556_v9  ;;  %v1589_v24 = vmul.f32 %v1580_v16, %v1557_v12 }
 0x50b   : > { %v1592_v31 = vpack.c.bf16 %v1588_v18, %v1586_v17  ;;  %v1593_v33 = vpack.c.bf16 %v1589_v24, %v1587_v22  ;;  %3028 = vmatmul.msk.bf16.gmra.mxu2 %vm4577_vm5, %v3175_v57 }
 0x50c   : > { %1356 = vxpose.xlu1.b32.end [4/4] (short) (narrow) %v1352_v28, 64 }
 0x50d   : > { %1689 = vmatpush.bf16.msra.mxu2 %v1592_v31  ;;  %1718 = vmatpush.bf16.msra.mxu0 %v1593_v33 }
 0x511   : > { %1690 = vmatpush.bf16.msra.mxu2 %v1590_v30  ;;  %1719 = vmatpush.bf16.msra.mxu0 %v1591_v35 }
 0x57e   : > { %v1488_v36 = vpop.f32.mrf.mxu2 }
 0x57f   : > { %v1489_v19 = vadd.f32 %v1488_v36, %v3609_v11 }
 0x586   : > { %v1490_v23 = vpop.f32.mrf.mxu2 }
 0x587   : > { %v1491_v46 = vadd.f32 %v1490_v23, %v3653_v5 }
 0x589   : > { %v1498_v48 = vpack.c.bf16 %v1491_v46, %v1489_v19 }
 0x58e   : > { %v1493_v38 = vpop.f32.mrf.mxu2 }
 0x58f   : > { %v1494_v40 = vadd.f32 %v1493_v38, %v3642_v37  ;;  %v3361_v38 = vmov 2  }
 0x596   : > { %v1495_v42 = vpop.f32.mrf.mxu2 }
 0x597   : > { %v1496_v43 = vadd.f32 %v1495_v42, %v3604_v7 }
 0x598   : > { %v1369_v45 = vpop.trf.xlu1 }
 0x599   : > { %v1499_v47 = vpack.c.bf16 %v1496_v43, %v1494_v40  ;;  %v1290_v40 = vpop.f32.mrf.mxu0 }
 0x59b   : > { %1506 = vmatpush.bf16.msra.mxu3 %v1499_v47 }
 0x59f   : > { %1507 = vmatpush.bf16.msra.mxu3 %v1498_v48 }
 0x5a0   : > { %v1370_v49 = vpop.trf.xlu1 }
 0x5a1   : > { %v1385_v50 = vpack.c.bf16 %v1370_v49, %v1369_v45  ;;  %v1292_v42 = vpop.f32.mrf.mxu0 }
 0x5a3   : > { %3023 = vmatmul.msk.bf16.vlgmr.msrb.gmra.mxu1 %vm4577_vm5, %v1385_v50  ;;  %3029 = vmatmul.msk.bf16.vlgmr.msra.gmra.mxu3 %vm4577_vm5, %v1385_v50 }
 0x5a8   : > { %v1371_v51 = vpop.trf.xlu1 }
 0x5a9   : > { %v1295_v43 = vpop.f32.mrf.mxu0 }
 0x5b0   : > { %v1372_v52 = vpop.trf.xlu1 }
 0x5b1   : > { %v1386_v53 = vpack.c.bf16 %v1372_v52, %v1371_v51  ;;  %v1297_v19 = vpop.f32.mrf.mxu0 }
 0x5b3   : > { %3024 = vmatmul.msk.bf16.gmra.mxu1 %vm4577_vm5, %v1386_v53  ;;  %3030 = vmatmul.msk.bf16.gmra.mxu3 %vm4577_vm5, %v1386_v53 }
 0x5b8   : > { %v1373_v55 = vpop.trf.xlu1 }
 0x5c0   : > { %v1374_v39 = vpop.trf.xlu1 }
 0x5c1   : > { %v1387_v10 = vpack.c.bf16 %v1374_v39, %v1373_v55 }
 0x5c3   : > { %3025 = vmatmul.msk.bf16.gmra.mxu1 %vm4577_vm5, %v1387_v10  ;;  %3031 = vmatmul.msk.bf16.gmra.mxu3 %vm4577_vm5, %v1387_v10 }
 0x5c8   : > { %v1375_v41 = vpop.trf.xlu1 }
 0x5d0   : > { %v1376_v56 = vpop.trf.xlu1 }
 0x5d1   : > { %v1388_v57 = vpack.c.bf16 %v1376_v56, %v1375_v41 }
 0x5d3   : > { %3026 = vmatmul.msk.bf16.gmra.mxu1 %vm4577_vm5, %v1388_v57  ;;  %3032 = vmatmul.msk.bf16.gmra.mxu3 %vm4577_vm5, %v1388_v57 }
 0x620   : > { %v1426_v59 = vpop.f32.mrf.mxu1 }
 0x621   : > { %v1446_v58 = vpack.c.bf16 %v1426_v59, %v1426_v59 }
 0x623   : > { %1455 = vst.msk [vmem:[#allocation2] sm:$0xf] %vm1454_vm6, %v1446_v58 }
 0x626   : > { %v1509_v60 = vpop.f32.mrf.mxu3 }
 0x627   : > { %1529 = vst.msk [vmem:[#allocation3] sm:$0xff] %vm1053_vm4, %v1509_v60 }
 0x628   : > { %v1428_v61 = vpop.f32.mrf.mxu1 }
 0x629   : > { %v1447_v62 = vpack.c.bf16 %v1428_v61, %v1428_v61 }
 0x62b   : > { %1456 = vst.msk [vmem:[#allocation2 + $0x4] sm:$0xf] %vm1454_vm6, %v1447_v62 }
 0x62e   : > { %v1511_v63 = vpop.f32.mrf.mxu3  ;;  %v1602_v0 = vld [vmem:[#allocation3] sm:$0xff] }
 0x62f   : > { %1530 = vst.msk [vmem:[#allocation3 + $0x8] sm:$0xff] %vm1053_vm4, %v1511_v63  ;;  %1612 = vperm.xlu0 %3262, %v1602_v0  }
 0x630   : > { %v1431_v1 = vpop.f32.mrf.mxu1 }
 0x631   : > { %v1448_v2 = vpack.c.bf16 %v1431_v1, %v1431_v1 }
 0x632   : > { %v3176_v3 = vld [vmem:[#allocation2] sm:$0xff] }
 0x633   : > { %1457 = vst.msk [vmem:[#allocation2 + $0x8] sm:$0xf] %vm1454_vm6, %v1448_v2  ;;  %3049 = vmatmul.msk.bf16.vlgmr.msra.gmra.mxu2 %vm4577_vm5, %v3176_v3  ;;  %3053 = vmatmul.msk.bf16.vlgmr.msra.gmra.mxu0 %vm4577_vm5, %v3176_v3 }
 0x636   : > { %v1514_v4 = vpop.f32.mrf.mxu3  ;;  %v1603_v6 = vld [vmem:[#allocation3 + $0x8] sm:$0xff] }
 0x637   : > { %1531 = vst.msk [vmem:[#allocation3 + $0x10] sm:$0xff] %vm1053_vm4, %v1514_v4  ;;  %1617 = vperm.xlu2 %3261, %v1603_v6  }
 0x638   : > { %v1433_v8 = vpop.f32.mrf.mxu1 }
 0x639   : > { %v1449_v9 = vpack.c.bf16 %v1433_v8, %v1433_v8 }
 0x63b   : > { %1458 = vst.msk [vmem:[#allocation2 + $0xc] sm:$0xf] %vm1454_vm6, %v1449_v9 }
 0x63e   : > { %v1516_v12 = vpop.f32.mrf.mxu3  ;;  %v1604_v13 = vld [vmem:[#allocation3 + $0x10] sm:$0xff] }
 0x63f   : > { %1532 = vst.msk [vmem:[#allocation3 + $0x18] sm:$0xff] %vm1053_vm4, %v1516_v12  ;;  %1622 = vperm.xlu0 %3262, %v1604_v13  }
 0x640   : > { %v1436_v14 = vpop.f32.mrf.mxu1 }
 0x641   : > { %v1450_v15 = vpack.c.bf16 %v1436_v14, %v1436_v14 }
 0x642   : > { %v3177_v16 = vld [vmem:[#allocation2 + $0x8] sm:$0xff] }
 0x643   : > { %1459 = vst.msk [vmem:[#allocation2 + $0x10] sm:$0xf] %vm1454_vm6, %v1450_v15  ;;  %3050 = vmatmul.msk.bf16.gmra.mxu2 %vm4577_vm5, %v3177_v16  ;;  %3054 = vmatmul.msk.bf16.gmra.mxu0 %vm4577_vm5, %v3177_v16 }
 0x646   : > { %v1519_v17 = vpop.f32.mrf.mxu3  ;;  %v1605_v22 = vld [vmem:[#allocation3 + $0x18] sm:$0xff] }
 0x647   : > { %1533 = vst.msk [vmem:[#allocation3 + $0x20] sm:$0xff] %vm1053_vm4, %v1519_v17  ;;  %1627 = vperm.xlu2 %3261, %v1605_v22  }
 0x648   : > { %v1438_v18 = vpop.f32.mrf.mxu1 }
 0x649   : > { %v1451_v24 = vpack.c.bf16 %v1438_v18, %v1438_v18 }
 0x64b   : > { %1460 = vst.msk [vmem:[#allocation2 + $0x14] sm:$0xf] %vm1454_vm6, %v1451_v24 }
 0x64e   : > { %v1521_v25 = vpop.f32.mrf.mxu3  ;;  %v1606_v27 = vld [vmem:[#allocation3 + $0x20] sm:$0xff] }
 0x64f   : > { %1534 = vst.msk [vmem:[#allocation3 + $0x28] sm:$0xff] %vm1053_vm4, %v1521_v25  ;;  %1632 = vperm.xlu0 %3262, %v1606_v27  }
 0x650   : > { %v1441_v28 = vpop.f32.mrf.mxu1 }
 0x651   : > { %v1452_v20 = vpack.c.bf16 %v1441_v28, %v1441_v28 }
 0x652   : > { %v3178_v29 = vld [vmem:[#allocation2 + $0x10] sm:$0xff] }
 0x653   : > { %1461 = vst.msk [vmem:[#allocation2 + $0x18] sm:$0xf] %vm1454_vm6, %v1452_v20  ;;  %3051 = vmatmul.msk.bf16.gmra.mxu2 %vm4577_vm5, %v3178_v29  ;;  %3055 = vmatmul.msk.bf16.gmra.mxu0 %vm4577_vm5, %v3178_v29 }
 0x656   : > { %v1524_v31 = vpop.f32.mrf.mxu3  ;;  %v1607_v33 = vld [vmem:[#allocation3 + $0x28] sm:$0xff] }
 0x657   : > { %1535 = vst.msk [vmem:[#allocation3 + $0x30] sm:$0xff] %vm1053_vm4, %v1524_v31  ;;  %1637 = vperm.xlu2 %3261, %v1607_v33  }
 0x658   : > { %v1443_v34 = vpop.f32.mrf.mxu1 }
 0x659   : > { %v1453_v21 = vpack.c.bf16 %v1443_v34, %v1443_v34 }
 0x65b   : > { %1462 = vst.msk [vmem:[#allocation2 + $0x1c] sm:$0xf] %vm1454_vm6, %v1453_v21 }
 0x65e   : > { %v1526_v30 = vpop.f32.mrf.mxu3  ;;  %v1608_v35 = vld [vmem:[#allocation3 + $0x30] sm:$0xff] }
 0x65f   : > { %1536 = vst.msk [vmem:[#allocation3 + $0x38] sm:$0xff] %vm1053_vm4, %v1526_v30  ;;  %1642 = vperm.xlu0 %3262, %v1608_v35  }
 0x662   : > { %v3179_v36 = vld [vmem:[#allocation2 + $0x18] sm:$0xff] }
 0x663   : > { %3052 = vmatmul.msk.bf16.gmra.mxu2 %vm4577_vm5, %v3179_v36  ;;  %3056 = vmatmul.msk.bf16.gmra.mxu0 %vm4577_vm5, %v3179_v36 }
 0x666   : > { %v1609_v23 = vld [vmem:[#allocation3 + $0x38] sm:$0xff] }
 0x667   : > { %3263 = vset.pattern.permute.xlu0 %v3361_v38  ;;  %1647 = vperm.xlu2 %3261, %v1609_v23  }
 0x668   : > { %1321 = vperm.xlu0 %3263, %v3609_v11  }
 0x66f   : > { %3264 = vset.pattern.permute.xlu2 %v3361_v38 }
 0x670   : > { %1333 = vperm.xlu0 %3263, %v3604_v7   ;;  %1325 = vperm.xlu2 %3264, %v3653_v5  }
 0x678   : > { %1329 = vperm.xlu2 %3264, %v3642_v37  }
 0x691   : > { %v1618_v45 = vpop.permute.xlu2 %1617 }
 0x6a1   : > { %v1628_v46 = vpop.permute.xlu2 %1627  ;;  %v1613_v49 = vpop.permute.xlu0 %1612 }
 0x6b0   : > { %v1721_v47 = vpop.f32.mrf.mxu0 }
 0x6b1   : > { %v1638_v50 = vpop.permute.xlu2 %1637  ;;  %v1623_v11 = vpop.permute.xlu0 %1622  ;;  %v1722_v15 = vadd.f32 %v1721_v47, %v1613_v49 }
 0x6b6   : > { %v1692_v48 = vpop.f32.mrf.mxu2 }
 0x6b7   : > { %v1693_v34 = vadd.f32 %v1692_v48, %v1613_v49 }
 0x6b8   : > { %v1723_v51 = vpop.f32.mrf.mxu0 }
 0x6b9   : > { %v1724_v16 = vadd.f32 %v1723_v51, %v1618_v45 }
 0x6be   : > { %v1694_v52 = vpop.f32.mrf.mxu2 }
 0x6bf   : > { %v3793_v41 = vadd.f32 %v1694_v52, %v1618_v45 }
 0x6c0   : > { %v1726_v54 = vpop.f32.mrf.mxu0 }
 0x6c1   : > { %v1648_v53 = vpop.permute.xlu2 %1647  ;;  %v1633_v55 = vpop.permute.xlu0 %1632  ;;  %v1727_v12 = vadd.f32 %v1726_v54, %v1623_v11 }
 0x6c3   : > { %v1754_v24 = vmax.f32 %v1722_v15, %v1727_v12 }
 0x6c6   : > { %v1697_v7 = vpop.f32.mrf.mxu2 }
 0x6c7   : > { %v3802_v28 = vadd.f32 %v1697_v7, %v1623_v11 }
 0x6c8   : > { %v1728_v5 = vpop.f32.mrf.mxu0 }
 0x6c9   : > { %v1729_v13 = vadd.f32 %v1728_v5, %v1628_v46  ;;  %v1741_v23 = vmax.f32 %v1693_v34, %v3802_v28 }
 0x6ca   : > { %v1326_v39 = vpop.permute.xlu2 %1325 }
 0x6cb   : > { %v1337_v37 = vadd.f32 %v1326_v39, %v1292_v42  ;;  %v1755_v25 = vmax.f32 %v1724_v16, %v1729_v13 }
 0x6cd   : > { %v1341_v10 = vpack.c.bf16 %v1337_v37, %v1337_v37 }
 0x6ce   : > { %v1699_v32 = vpop.f32.mrf.mxu2 }
 0x6cf   : > { %1346 = vst.msk [vmem:[#allocation4 + $0x4] sm:$0xf] %vm1344_vm7, %v1341_v10  ;;  %v3795_v56 = vadd.f32 %v1699_v32, %v1628_v46 }
 0x6d0   : > { %v1731_v58 = vpop.f32.mrf.mxu0 }
 0x6d1   : > { %v1643_v57 = vpop.permute.xlu0 %1642  ;;  %v1742_v59 = vmax.f32 %v3793_v41, %v3795_v56  ;;  %v1732_v17 = vadd.f32 %v1731_v58, %v1633_v55 }
 0x6d2   : > { %v1330_v60 = vpop.permute.xlu2 %1329 }
 0x6d3   : > { %v1338_v61 = vadd.f32 %v1330_v60, %v1295_v43  ;;  %v1756_v29 = vmax.f32 %v1754_v24, %v1732_v17 }
 0x6d5   : > { %v1342_v62 = vpack.c.bf16 %v1338_v61, %v1338_v61 }
 0x6d6   : > { %v1702_v63 = vpop.f32.mrf.mxu2 }
 0x6d7   : > { %1347 = vst.msk [vmem:[#allocation4 + $0x8] sm:$0xf] %vm1344_vm7, %v1342_v62  ;;  %v3804_v21 = vadd.f32 %v1702_v63, %v1633_v55 }
 0x6d8   : > { %v1733_v0 = vpop.f32.mrf.mxu0 }
 0x6d9   : > { %v1734_v22 = vadd.f32 %v1733_v0, %v1638_v50  ;;  %v1743_v43 = vmax.f32 %v1741_v23, %v3804_v21 }
 0x6da   : > { %v1322_v1 = vpop.permute.xlu0 %1321 }
 0x6db   : > { %v1336_v2 = vadd.f32 %v1322_v1, %v1290_v40  ;;  %v1757_v31 = vmax.f32 %v1755_v25, %v1734_v22 }
 0x6dd   : > { %v1340_v3 = vpack.c.bf16 %v1336_v2, %v1336_v2 }
 0x6de   : > { %v1704_v4 = vpop.f32.mrf.mxu2 }
 0x6df   : > { %1345 = vst.msk [vmem:[#allocation4] sm:$0xf] %vm1344_vm7, %v1340_v3  ;;  %v3806_v30 = vadd.f32 %v1704_v4, %v1638_v50 }
 0x6e0   : > { %v1736_v8 = vpop.f32.mrf.mxu0 }
 0x6e1   : > { %v1737_v27 = vadd.f32 %v1736_v8, %v1643_v57  ;;  %v1744_v45 = vmax.f32 %v1742_v59, %v3806_v30 }
 0x6e2   : > { %v1334_v6 = vpop.permute.xlu0 %1333 }
 0x6e3   : > { %v1339_v9 = vadd.f32 %v1334_v6, %v1297_v19  ;;  %v1758_v35 = vmax.f32 %v1756_v29, %v1737_v27 }
 0x6e5   : > { %v1343_v14 = vpack.c.bf16 %v1339_v9, %v1339_v9 }
 0x6e6   : > { %v1707_v18 = vpop.f32.mrf.mxu2 }
 0x6e7   : > { %1348 = vst.msk [vmem:[#allocation4 + $0xc] sm:$0xf] %vm1344_vm7, %v1343_v14  ;;  %v3809_v38 = vadd.f32 %v1707_v18, %v1643_v57 }
 0x6e8   : > { %v1738_v20 = vpop.f32.mrf.mxu0 }
 0x6e9   : > { %v1739_v33 = vadd.f32 %v1738_v20, %v1648_v53  ;;  %v1745_v47 = vmax.f32 %v1743_v43, %v3809_v38 }
 0x6eb   : > { %v1759_v36 = vmax.f32 %v1757_v31, %v1739_v33 }
 0x6ed   : > { %v1760_v40 = vmax.f32 %v1758_v35, %v1759_v36  ;;  %v1948_v35 = vadd.s32 128, %v3486_v44 }
 0x6ee   : > { %v1709_v42 = vpop.f32.mrf.mxu2 }
 0x6ef   : > { %v3813_v19 = vadd.f32 %v1709_v42, %v1648_v53  ;;  %v1761_v46 = vrot.slane %v1760_v40, 4  ;;  %v1960_v43 = vand.u32 15, %v1948_v35 }
 0x6f1   : > { %v1746_v48 = vmax.f32 %v1744_v45, %v3813_v19  ;;  %v1762_v49 = vmax.f32 %v1760_v40, %v1761_v46  ;;  %vm2017_vm9 = vcmp.lt.s32.totalorder %v1960_v43, 15  ;;  %vm1982_vm12 = vcmp.ge.s32.totalorder %v1960_v43, 1 }
 0x6f3   : > { %v1747_v50 = vmax.f32 %v1745_v47, %v1746_v48  ;;  %v1763_v51 = vrot.slane %v1762_v49, 2 }
 0x6f5   : > { %v1748_v52 = vrot.slane %v1747_v50, 4  ;;  %v1764_v11 = vmax.f32 %v1762_v49, %v1763_v51 }
 0x6f7   : > { %v1749_v54 = vmax.f32 %v1747_v50, %v1748_v52  ;;  %v1765_v7 = vrot.slane %v1764_v11, 1 }
 0x6f9   : > { %v1750_v55 = vrot.slane %v1749_v54, 2  ;;  %v1766_v5 = vmax.f32 %v1764_v11, %v1765_v7 }
 0x6fb   : > { %v1751_v39 = vmax.f32 %v1749_v54, %v1750_v55  ;;  %v1768_v37 = vsub.f32 %v1722_v15, %v1766_v5  ;;  %v1770_v10 = vsub.f32 %v1724_v16, %v1766_v5  ;;  %v1772_v32 = vsub.f32 %v1727_v12, %v1766_v5 }
 0x6fc   : > { %v1774_v53 = vsub.f32 %v1729_v13, %v1766_v5  ;;  %v1776_v57 = vsub.f32 %v1732_v17, %v1766_v5  ;;  %v1778_v59 = vsub.f32 %v1734_v22, %v1766_v5  ;;  %v1780_v58 = vsub.f32 %v1737_v27, %v1766_v5 }
 0x6fd   : > { %v1785_v60 = vmul.f32 1.442695, %v1768_v37  ;;  %v1789_v61 = vmul.f32 1.442695, %v1770_v10  ;;  %v1793_v62 = vmul.f32 1.442695, %v1772_v32  ;;  %v1782_v63 = vsub.f32 %v1739_v33, %v1766_v5 }
 0x6fe   : > { %v1797_v0 = vmul.f32 1.442695, %v1774_v53  ;;  %v1801_v1 = vmul.f32 1.442695, %v1776_v57  ;;  %v1752_v2 = vrot.slane %v1751_v39, 1 }
 0x6ff   : > { %3288 = vpow2.f32 %v1785_v60  ;;  %v1805_v3 = vmul.f32 1.442695, %v1778_v59  ;;  %v1809_v4 = vmul.f32 1.442695, %v1780_v58  ;;  %v1813_v8 = vmul.f32 1.442695, %v1782_v63 }
 0x700   : > { %3290 = vpow2.f32 %v1789_v61  ;;  %v1753_v6 = vmax.f32 %v1751_v39, %v1752_v2 }
 0x701   : > { %3292 = vpow2.f32 %v1793_v62 }
 0x702   : > { %3294 = vpow2.f32 %v1797_v0  ;;  %v1767_v9 = vsub.f32 %v1693_v34, %v1753_v6  ;;  %v1769_v12 = vsub.f32 %v3793_v41, %v1753_v6  ;;  %v1771_v13 = vsub.f32 %v3802_v28, %v1753_v6 }
 0x703   : > { %3296 = vpow2.f32 %v1801_v1  ;;  %v1773_v14 = vsub.f32 %v3795_v56, %v1753_v6  ;;  %v1775_v15 = vsub.f32 %v3804_v21, %v1753_v6  ;;  %v1779_v17 = vsub.f32 %v3809_v38, %v1753_v6 }
 0x704   : > { %3298 = vpow2.f32 %v1805_v3  ;;  %v1781_v22 = vsub.f32 %v3813_v19, %v1753_v6  ;;  %v1783_v18 = vmul.f32 1.442695, %v1767_v9  ;;  %v1787_v25 = vmul.f32 1.442695, %v1769_v12  ;;  %v3181_v12 = vld [vmem:[#allocation4 + $0x8] sm:$0xff] }
 0x705   : > { %v3821_v16 = vpop.eup %3288  ;;  %3300 = vpow2.f32 %v1809_v4  ;;  %v1791_v41 = vmul.f32 1.442695, %v1771_v13  ;;  %v1795_v27 = vmul.f32 1.442695, %v1773_v14  ;;  %v1777_v29 = vsub.f32 %v3806_v30, %v1753_v6  ;;  %v3180_v4 = vld [vmem:[#allocation4] sm:$0xff] }
 0x706   : > { %v3825_v24 = vpop.eup %3290  ;;  %3302 = vpow2.f32 %v1813_v8  ;;  %v1799_v31 = vmul.f32 1.442695, %v1775_v15  ;;  %v1807_v21 = vmul.f32 1.442695, %v1779_v17  ;;  %v1811_v23 = vmul.f32 1.442695, %v1781_v22 }
 0x707   : > { %v3827_v28 = vpop.eup %3292  ;;  %v1828_v56 = vadd.f32 %v3825_v24, %v3821_v16  ;;  %3304 = vpow2.f32 %v1783_v18  ;;  %v1953_v38 = vand.u32 15, %v3486_v44  ;;  %v1803_v30 = vmul.f32 1.442695, %v1777_v29  ;;  %v3087_v6 = vld [vmem:[#allocation6 + $0x20] sm:$0xf] }
 0x708   : > { %v3295_v20 = vpop.eup %3294  ;;  %3306 = vpow2.f32 %v1787_v25  ;;  %v1846_v2 = vpack.c.bf16 %v3825_v24, %v3821_v16  ;;  %v3192_v8 = vld [vmem:[#allocation6 + $0x2c] sm:$0xf0]  ;;  %v3123_v13 = vld [vmem:[#allocation6 + $0xc] sm:$0xf]  ;;  %v3200_v14 = vld [vmem:[#allocation6 + $0x18] sm:$0xf0]  ;;  %v3861_v24 = vunpack.c.l.b16 %v3359_v26  ;;  %v3864_v25 = vunpack.c.h.b16 %v3359_v26 }
 0x709   : > { %v3297_v33 = vpop.eup %3296  ;;  %v1829_v34 = vadd.f32 %v3827_v28, %v1828_v56  ;;  %3308 = vpow2.f32 %v1791_v41  ;;  %vm3835_vm8 = vcmp.lt.s32.totalorder %v1953_v38, 15  ;;  %vm1981_vm11 = vcmp.ge.s32.totalorder %v1953_v38, 1  ;;  %v3075_v16 = vld [vmem:[#allocation6] sm:$0xf]  ;;  %v3189_v17 = vld [vmem:[#allocation6 + $0xc] sm:$0xf0] }
 0x70a   : > { %v3299_v36 = vpop.eup %3298  ;;  %3310 = vpow2.f32 %v1795_v27  ;;  %vm2022_vm10 = vmpackc.low %vm2017_vm9, %vm3835_vm8  ;;  %v1848_v61 = vpack.c.bf16 %v3295_v20, %v3827_v28  ;;  %v3088_v9 = vor.u32 %v3192_v8, %v3087_v6  ;;  %v3124_v15 = vor.u32 %v3200_v14, %v3123_v13  ;;  %v3135_v19 = vld [vmem:[#allocation6 + $0x2c] sm:$0xf] }
 0x70b   : > { %v3301_v40 = vpop.eup %3300  ;;  %v1830_v42 = vadd.f32 %v3295_v20, %v1829_v34  ;;  %3312 = vpow2.f32 %v1799_v31  ;;  %v2023_v11 = vsel %vm2022_vm10, 65537, %v3359_v26  ;;  %vm1987_vm13 = vmpackc.low %vm1982_vm12, %vm1981_vm11  ;;  %v1850_v7 = vpack.c.bf16 %v3299_v36, %v3297_v33  ;;  %v3867_v31 = vld [vmem:[#allocation6 + $0x2c] sm:$0xf] }
 0x70c   : > { %v3303_v45 = vpop.eup %3302  ;;  %3314 = vpow2.f32 %v1807_v21  ;;  %2024 = vrot.lane.b32.xlu0 %v2023_v11, %s3362_s13  ;;  %v1988_v55 = vsel %vm1987_vm13, 65537, %v3359_v26  ;;  %v3076_v22 = vor.u32 %v3189_v17, %v3075_v16  ;;  %vm2027_vm12 = vcmask 924672  }
 0x70d   : > { %v3305_v46 = vpop.eup %3304  ;;  %v1831_v47 = vadd.f32 %v3297_v33, %v1830_v42  ;;  %v1852_v48 = vpack.c.bf16 %v3303_v45, %v3301_v40  ;;  %3316 = vpow2.f32 %v1811_v23  ;;  %2051 = vrot.lane.b32.xlu1 %v1988_v55, %s3352_s17  ;;  %2117 = vrot.lane.b32.xlu2 %v1988_v55, %s3363_s25  ;;  %v3869_v33 = vld [vmem:[#allocation6 + $0x3c] sm:$0xf]  ;;  %vm4578_vm13 = vcmask 138240  }
 0x70e   : > { %v3307_v49 = vpop.eup %3306  ;;  %3318 = vpow2.f32 %v1803_v30 }
 0x70f   : > { %v3309_v44 = vpop.eup %3308  ;;  %v1832_v50 = vadd.f32 %v3299_v36, %v1831_v47  ;;  %v1815_v51 = vadd.f32 %v3307_v49, %v3305_v46  ;;  %1893 = vmatpush.bf16.msrb.mxu3 %v1852_v48  ;;  %v1845_v52 = vpack.c.bf16 %v3307_v49, %v3305_v46  ;;  %v3203_v46 = vld [vmem:[#allocation6 + $0x38] sm:$0xf0] }
 0x710   : > { %v3311_v54 = vpop.eup %3310  ;;  %v3136_v48 = vor.u32 %v3203_v46, %v3135_v19 }
 0x711   : > { %v1833_v5 = vadd.f32 %v3301_v40, %v1832_v50  ;;  %v1816_v39 = vadd.f32 %v3309_v44, %v1815_v51  ;;  %v1847_v37 = vpack.c.bf16 %v3311_v54, %v3309_v44  ;;  %v3313_v10 = vpop.eup %3312 }
 0x712   : > { %v3315_v32 = vpop.eup %3314 }
 0x713   : > { %v3844_v53 = vadd.f32 %v3303_v45, %v1833_v5  ;;  %v1817_v57 = vadd.f32 %v3311_v54, %v1816_v39  ;;  %1894 = vmatpush.bf16.msrb.mxu3 %v1850_v7  ;;  %v3317_v59 = vpop.eup %3316  ;;  %v3903_v54 = vld [vmem:[#allocation6 + $0x1c] sm:$0xf] }
 0x714   : > { %v1851_v60 = vpack.c.bf16 %v3317_v59, %v3315_v32  ;;  %v3319_v62 = vpop.eup %3318  ;;  %1989 = vrot.lane.b32.xlu0 %v1988_v55, %s3364_s26 }
 0x715   : > { %v1818_v58 = vadd.f32 %v3313_v10, %v1817_v57  ;;  %v1849_v1 = vpack.c.bf16 %v3319_v62, %v3313_v10  ;;  %2090 = vrot.lane.b32.xlu2 %v2023_v11, %s3351_s9  ;;  %s3366_s9 = smov 95   ;;  %v1835_v47 = vrot.slane %v3844_v53, 4 }
 0x716   : > { %1874 = vmatpush.bf16.msra.mxu1 %v1851_v60  ;;  %2473 = vrot.lane.b32.xlu1 %v3136_v48, %s3366_s9 }
 0x717   : > { %v1819_v63 = vadd.f32 %v3319_v62, %v1818_v58  ;;  %1895 = vmatpush.bf16.msrb.mxu3 %v1848_v61  ;;  %v1836_v51 = vadd.f32 %v1835_v47, %v3844_v53 }
 0x719   : > { %v1820_v0 = vadd.f32 %v3315_v32, %v1819_v63 }
 0x71a   : > { %1875 = vmatpush.bf16.msra.mxu1 %v1849_v1 }
 0x71b   : > { %v3851_v3 = vadd.f32 %v3317_v59, %v1820_v0  ;;  %1896 = vmatpush.bf16.msrb.mxu3 %v1846_v2 }
 0x71c   : > { %2223 = vrot.lane.b32.xlu0 %v3076_v22, %s3352_s17 }
 0x71d   : > { %2144 = vrot.lane.b32.xlu2 %v2023_v11, %s3365_s11  ;;  %v3901_v11 = vld [vmem:[#allocation6 + $0xc] sm:$0xf] }
 0x71e   : > { %3067 = vmatmul.msk.bf16.vlgmr.msrb.gmra.mxu3 %vm410_vm0, %v3180_v4  ;;  %1876 = vmatpush.bf16.msra.mxu1 %v1847_v37  ;;  %v1837_v37 = vrot.slane %v1836_v51, 2 }
 0x720   : > { %v3922_v62 = vadd.f32 %v1837_v37, %v1836_v51 }
 0x722   : > { %1877 = vmatpush.bf16.msra.mxu1 %v1845_v52  ;;  %v1822_v52 = vrot.slane %v3851_v3, 4 }
 0x724   : > { %v3914_v10 = vadd.f32 %v1822_v52, %v3851_v3 }
 0x725   : > { %3065 = vmatmul.msk.bf16.vlgmr.msra.gmra.mxu1 %vm410_vm0, %v3180_v4  ;;  %2229 = vrot.lane.b32.xlu2 %v3088_v9, %s3352_s17 }
 0x726   : > { %v1824_v63 = vrot.slane %v3914_v10, 2 }
 0x72d   : > { %2467 = vrot.lane.b32.xlu2 %v3124_v15, %s3366_s9 }
 0x72e   : > { %3068 = vmatmul.msk.bf16.gmra.mxu3 %vm410_vm0, %v3181_v12 }
 0x735   : > { %3066 = vmatmul.msk.bf16.gmra.mxu1 %vm410_vm0, %v3181_v12 }
 0x767   : > { %v2118_v18 = vpop.permute.xlu2 %2117 }
 0x768   : > { %v2119_v41 = vrot.slane %v2118_v18, 4 }
 0x76a   : > { %v2121_v27 = vsel %vm2120_vm14, %v2119_v41, %v2118_v18  ;;  %v2129_v28 = vunpack.c.l.b16 %v2119_v41  ;;  %v2130_v56 = vunpack.c.h.b16 %v2119_v41 }
 0x76b   : > { %v2122_v20 = vunpack.c.l.b16 %v2121_v27  ;;  %v2123_v29 = vunpack.c.h.b16 %v2121_v27 }
 0x76c   : > { %vm2133_vm0 = vcmp.ne.s32.totalorder %v2129_v28, %v3861_v24  ;;  %vm2134_vm15 = vcmp.ne.s32.totalorder %v2130_v56, %v3864_v25 }
 0x76d   : > { %vm2126_vm1 = vcmp.ne.s32.totalorder %v2122_v20, %v3861_v24  ;;  %vm2127_vm2 = vcmp.ne.s32.totalorder %v2123_v29, %v3864_v25  ;;  %vm3875_vm3 = vmpackc.low %vm2134_vm15, %vm2133_vm0 }
 0x76e   : > { %vm3879_vm6 = vmpackc.low %vm2127_vm2, %vm2126_vm1  ;;  %v2141_v21 = vsel %vm3875_vm3, %v3867_v31, 0  ;;  %v2143_v35 = vsel %vm3875_vm3, %v3869_v33, 0  ;;  %v2137_v7 = vsel %vm3875_vm3, %v3901_v11, 0  ;;  %v2139_v55 = vsel %vm3875_vm3, %v3903_v54, 0 }
 0x76f   : > { %v2091_v36 = vpop.permute.xlu2 %2090  ;;  %v2410_v23 = vunpack.c.l.b16 %v2141_v21  ;;  %v2413_v38 = vunpack.c.l.b16 %v2143_v35  ;;  %v2404_v5 = vunpack.c.l.b16 %v2137_v7  ;;  %v2407_v39 = vunpack.c.l.b16 %v2139_v55 }
 0x770   : > { %v2092_v40 = vrot.slane %v2091_v36, 4  ;;  %v1825_v7 = vadd.f32 %v1824_v63, %v3914_v10 }
 0x771   : > { %v2419_v42 = vpack.c.b16 %v2413_v38, %v2410_v23  ;;  %v2416_v53 = vpack.c.b16 %v2407_v39, %v2404_v5  ;;  %v1839_v39 = vrot.slane %v3922_v62, 1 }
 0x772   : > { %v2094_v43 = vsel %vm1053_vm4, %v2092_v40, %v2091_v36  ;;  %v2102_v44 = vunpack.c.l.b16 %v2092_v40  ;;  %v2103_v50 = vunpack.c.h.b16 %v2092_v40 }
 0x773   : > { %v2095_v45 = vunpack.c.l.b16 %v2094_v43  ;;  %v2096_v30 = vunpack.c.h.b16 %v2094_v43  ;;  %2430 = vrot.lane.b32.xlu2 %v2419_v42, %s3367_s12  ;;  %2424 = vrot.lane.b32.xlu1 %v2416_v53, %s3367_s12  ;;  %v1826_v53 = vrot.slane %v1825_v7, 1 }
 0x774   : > { %vm2106_vm4 = vcmp.ne.s32.totalorder %v2102_v44, %v3861_v24  ;;  %vm2107_vm10 = vcmp.ne.s32.totalorder %v2103_v50, %v3864_v25 }
 0x775   : > { %vm2099_vm7 = vcmp.ne.s32.totalorder %v2095_v45, %v3861_v24  ;;  %vm2100_vm8 = vcmp.ne.s32.totalorder %v2096_v30, %v3864_v25  ;;  %vm3916_vm11 = vmpackc.low %vm2107_vm10, %vm2106_vm4  ;;  %vm4579_vm10 = vcmask 908288  }
 0x776   : > { %vm3894_vm9 = vmpackc.low %vm2100_vm8, %vm2099_vm7  ;;  %v2114_v6 = vsel %vm3916_vm11, %v3867_v31, 0  ;;  %v2116_v13 = vsel %vm3916_vm11, %v3869_v33, 0  ;;  %v2110_v56 = vsel %vm3916_vm11, %v3901_v11, 0  ;;  %v2112_v20 = vsel %vm3916_vm11, %v3903_v54, 0 }
 0x777   : > { %v2145_v32 = vpop.permute.xlu2 %2144  ;;  %v2367_v14 = vunpack.c.l.b16 %v2114_v6  ;;  %v2370_v27 = vunpack.c.l.b16 %v2116_v13  ;;  %v2361_v40 = vunpack.c.l.b16 %v2110_v56  ;;  %v2364_v44 = vunpack.c.l.b16 %v2112_v20 }
 0x778   : > { %v2146_v57 = vrot.slane %v2145_v32, 4 }
 0x779   : > { %v2376_v38 = vpack.c.b16 %v2370_v27, %v2367_v14 }
 0x77a   : > { %v2148_v61 = vsel %vm4578_vm13, %v2146_v57, %v2145_v32  ;;  %v2156_v16 = vunpack.c.l.b16 %v2146_v57  ;;  %v2157_v17 = vunpack.c.h.b16 %v2146_v57  ;;  %v1840_v57 = vadd.f32 %v1839_v39, %v3922_v62 }
 0x77b   : > { %v2149_v0 = vunpack.c.l.b16 %v2148_v61  ;;  %v2150_v1 = vunpack.c.h.b16 %v2148_v61  ;;  %2387 = vrot.lane.b32.xlu0 %v2376_v38, %s3368_s14 }
 0x77c   : > { %3320 = vrcp.f32 %v1840_v57 }
 0x77d   : > { %vm2153_vm14 = vcmp.ne.s32.totalorder %v2149_v0, %v3861_v24  ;;  %vm2154_vm0 = vcmp.ne.s32.totalorder %v2150_v1, %v3864_v25 }
 0x77e   : > { %v2025_v58 = vpop.permute.xlu0 %2024  ;;  %vm3932_vm2 = vmpackc.low %vm2154_vm0, %vm2153_vm14  ;;  %vm2160_vm14 = vcmp.ne.s32.totalorder %v2156_v16, %v3861_v24  ;;  %vm2161_vm0 = vcmp.ne.s32.totalorder %v2157_v17, %v3864_v25 }
 0x77f   : > { %v2026_v60 = vrot.slane %v2025_v58, 4  ;;  %v2052_v22 = vpop.permute.xlu1 %2051 }
 0x780   : > { %v2053_v41 = vrot.slane %v2052_v22, 4 }
 0x781   : > { %v2028_v2 = vsel %vm2027_vm12, %v2026_v60, %v2025_v58  ;;  %v2036_v3 = vunpack.c.l.b16 %v2026_v60  ;;  %v2037_v4 = vunpack.c.h.b16 %v2026_v60  ;;  %vm4580_vm12 = vcmask 1039360  }
 0x782   : > { %v2029_v8 = vunpack.c.l.b16 %v2028_v2  ;;  %v2030_v9 = vunpack.c.h.b16 %v2028_v2  ;;  %v2055_v26 = vsel %vm4580_vm12, %v2053_v41, %v2052_v22  ;;  %v2063_v21 = vunpack.c.l.b16 %v2053_v41 }
 0x783   : > { %vm2040_vm15 = vcmp.ne.s32.totalorder %v2036_v3, %v3861_v24  ;;  %vm2041_vm1 = vcmp.ne.s32.totalorder %v2037_v4, %v3864_v25  ;;  %v2064_v35 = vunpack.c.h.b16 %v2053_v41  ;;  %v2056_v36 = vunpack.c.l.b16 %v2055_v26 }
 0x784   : > { %vm2033_vm3 = vcmp.ne.s32.totalorder %v2029_v8, %v3861_v24  ;;  %vm2034_vm7 = vcmp.ne.s32.totalorder %v2030_v9, %v3864_v25  ;;  %vm3941_vm8 = vmpackc.low %vm2041_vm1, %vm2040_vm15  ;;  %v2057_v23 = vunpack.c.h.b16 %v2055_v26  ;;  %vm3964_vm1 = vcmp.ne.s32.totalorder %v2063_v21, %v3861_v24 }
 0x785   : > { %vm3945_vm4 = vmpackc.low %vm2034_vm7, %vm2033_vm3  ;;  %vm2060_vm11 = vcmp.ne.s32.totalorder %v2056_v36, %v3861_v24  ;;  %vm2068_vm5 = vcmp.ne.s32.totalorder %v2064_v35, %v3864_v25  ;;  %v1827_v58 = vadd.f32 %v1826_v53, %v1825_v7 }
 0x786   : > { %v1990_v28 = vpop.permute.xlu0 %1989  ;;  %vm3958_vm15 = vmpackc.low %vm2161_vm0, %vm2160_vm14  ;;  %vm2061_vm3 = vcmp.ne.s32.totalorder %v2057_v23, %v3864_v25 }
 0x787   : > { %v1991_v29 = vrot.slane %v1990_v28, 4  ;;  %vm3973_vm0 = vmpackc.low %vm2061_vm3, %vm2060_vm11  ;;  %v2168_v51 = vsel %vm3958_vm15, %v3867_v31, 0  ;;  %v2170_v52 = vsel %vm3958_vm15, %v3869_v33, 0  ;;  %v2166_v31 = vsel %vm3958_vm15, %v3903_v54, 0  ;;  %v3321_v54 = vpop.eup %3320 }
 0x788   : > { %vm4000_vm3 = vmpackc.low %vm2068_vm5, %vm3964_vm1  ;;  %v2496_v37 = vunpack.c.l.b16 %v2168_v51  ;;  %v2499_v10 = vunpack.c.l.b16 %v2170_v52  ;;  %v2493_v32 = vunpack.c.l.b16 %v2166_v31  ;;  %3322 = vrcp.f32 %v1827_v58 }
 0x789   : > { %v1993_v43 = vsel %vm4579_vm10, %v1991_v29, %v1990_v28  ;;  %v2001_v45 = vunpack.c.l.b16 %v1991_v29  ;;  %v2002_v30 = vunpack.c.h.b16 %v1991_v29  ;;  %vm2475_vm5 = vcmask 777216  }
 0x78a   : > { %v1994_v46 = vunpack.c.l.b16 %v1993_v43  ;;  %v1995_v47 = vunpack.c.h.b16 %v1993_v43  ;;  %v2505_v59 = vpack.c.b16 %v2499_v10, %v2496_v37 }
 0x78b   : > { %vm2005_vm7 = vcmp.ne.s32.totalorder %v2001_v45, %v3861_v24  ;;  %vm2006_vm14 = vcmp.ne.s32.totalorder %v2002_v30, %v3864_v25 }
 0x78c   : > { %vm1998_vm13 = vcmp.ne.s32.totalorder %v1994_v46, %v3861_v24  ;;  %vm1999_vm10 = vcmp.ne.s32.totalorder %v1995_v47, %v3864_v25  ;;  %vm3980_vm12 = vmpackc.low %vm2006_vm14, %vm2005_vm7  ;;  %v2373_v24 = vpack.c.b16 %v2364_v44, %v2361_v40  ;;  %v2164_v25 = vsel %vm3958_vm15, %v3901_v11, 0 }
 0x78d   : > { %vm3991_vm11 = vmpackc.low %vm1999_vm10, %vm1998_vm13  ;;  %v2490_v33 = vunpack.c.l.b16 %v2164_v25  ;;  %vm2320_vm13 = vcmask 916480   ;;  %vm2277_vm10 = vcmask 1031168   ;;  %vm4615_vm14 = vcmask 138240  }
 0x78e   : > { %2381 = vrot.lane.b32.xlu2 %v2373_v24, %s3368_s14  ;;  %v3323_v63 = vpop.eup %3322 }
 0x78f   : > { %v2502_v11 = vpack.c.b16 %v2493_v32, %v2490_v33 }
 0x791   : > { %2510 = vrot.lane.b32.xlu0 %v2502_v11, %s3369_s15 }
 0x796   : > { %2516 = vrot.lane.b32.xlu2 %v2505_v59, %s3369_s15 }
 0x7a1   : > { %v1898_v60 = vpop.f32.mrf.mxu3 }
 0x7a2   : > { %v1911_v61 = vmul.f32 %v3321_v54, %v1898_v60  ;;  %v1879_v0 = vpop.f32.mrf.mxu1 }
 0x7a3   : > { %v1910_v1 = vmul.f32 %v3323_v63, %v1879_v0 }
 0x7a5   : > { %v1918_v2 = vpack.c.bf16 %v1911_v61, %v1910_v1 }
 0x7a7   : > { %3069 = vst [vmem:[#allocation6 + $0x4] sm:$0xff] %v1918_v2  ;;  %v2109_v62 = vsel %vm3894_vm9, %v1918_v2, 0  ;;  %v4016_v3 = vsel %vm3932_vm2, %v1918_v2, 0  ;;  %v2136_v4 = vsel %vm3879_vm6, %v1918_v2, 0 }
 0x7a8   : > { %v2359_v22 = vunpack.c.l.b16 %v2109_v62  ;;  %v2488_v27 = vunpack.c.l.b16 %v4016_v3  ;;  %v2403_v40 = vunpack.c.h.b16 %v2136_v4  ;;  %v2402_v42 = vunpack.c.l.b16 %v2136_v4 }
 0x7a9   : > { %v1900_v6 = vpop.f32.mrf.mxu3  ;;  %v2360_v61 = vunpack.c.h.b16 %v2109_v62  ;;  %v2489_v2 = vunpack.c.h.b16 %v4016_v3 }
 0x7aa   : > { %v1913_v8 = vmul.f32 %v3321_v54, %v1900_v6  ;;  %v1881_v9 = vpop.f32.mrf.mxu1 }
 0x7ab   : > { %v1912_v13 = vmul.f32 %v3323_v63, %v1881_v9 }
 0x7ad   : > { %v1919_v14 = vpack.c.bf16 %v1913_v8, %v1912_v13 }
 0x7ae   : > { %v4027_v21 = vld [vmem:[#allocation6 + $0x8] sm:$0xf]  ;;  %v3188_v30 = vld [vmem:[#allocation6 + $0x4] sm:$0xf] }
 0x7af   : > { %3070 = vst [vmem:[#allocation6 + $0x14] sm:$0xff] %v1919_v14  ;;  %v2111_v17 = vsel %vm3894_vm9, %v1919_v14, 0  ;;  %v2165_v41 = vsel %vm3932_vm2, %v1919_v14, 0  ;;  %v2138_v29 = vsel %vm3879_vm6, %v1919_v14, 0  ;;  %v3083_v45 = vld [vmem:[#allocation6 + $0x8] sm:$0xf] }
 0x7b0   : > { %v2362_v56 = vunpack.c.l.b16 %v2111_v17  ;;  %v2491_v20 = vunpack.c.l.b16 %v2165_v41  ;;  %v2406_v35 = vunpack.c.h.b16 %v2138_v29  ;;  %v2044_v19 = vsel %vm3941_vm8, %v4027_v21, 0  ;;  %v3198_v4 = vld [vmem:[#allocation6 + $0x8] sm:$0xf]  ;;  %v3115_v6 = vld [vmem:[#allocation6 + $0x4] sm:$0xf] }
 0x7b1   : > { %v1903_v16 = vpop.f32.mrf.mxu3  ;;  %v2405_v47 = vunpack.c.l.b16 %v2138_v29  ;;  %v2249_v39 = vunpack.c.l.b16 %v2044_v19  ;;  %v2363_v11 = vunpack.c.h.b16 %v2111_v17  ;;  %v2492_v59 = vunpack.c.h.b16 %v2165_v41 }
 0x7b2   : > { %v1915_v28 = vmul.f32 %v3321_v54, %v1903_v16  ;;  %v1884_v26 = vpop.f32.mrf.mxu1  ;;  %v2371_v23 = vpack.c.b16 %v2362_v56, %v2359_v22  ;;  %v4029_v38 = vpack.c.b16 %v2491_v20, %v2488_v27  ;;  %v4034_v46 = vpack.c.b16 %v2406_v35, %v2403_v40  ;;  %v1973_v22 = vld [vmem:[#allocation6] sm:$0xff]  ;;  %v3194_v40 = vld [vmem:[#allocation6 + $0x8] sm:$0xf] }
 0x7b3   : > { %v1914_v36 = vmul.f32 %v3323_v63, %v1884_v26  ;;  %v4041_v31 = vpack.c.b16 %v2405_v47, %v2402_v42  ;;  %v4055_v13 = vpack.c.b16 %v2492_v59, %v2489_v2  ;;  %v3099_v42 = vld [vmem:[#allocation6 + $0x4] sm:$0xf]  ;;  %v4087_v49 = vsel %vm3991_vm11, %v1973_v22, 0 }
 0x7b5   : > { %v1920_v43 = vpack.c.bf16 %v1915_v28, %v1914_v36 }
 0x7b6   : > { %v3190_v44 = vld [vmem:[#allocation6 + $0x14] sm:$0xf0]  ;;  %v3077_v51 = vld [vmem:[#allocation6 + $0x10] sm:$0xf0] }
 0x7b7   : > { %v4036_v52 = vld [vmem:[#allocation6 + $0x18] sm:$0xf]  ;;  %3071 = vst [vmem:[#allocation6 + $0x24] sm:$0xff] %v1920_v43  ;;  %v3084_v7 = vor.u32 %v3190_v44, %v3083_v45  ;;  %v3080_v24 = vor.u32 %v3188_v30, %v3077_v51  ;;  %v3199_v60 = vld [vmem:[#allocation6 + $0x10] sm:$0xf0]  ;;  %v4048_v1 = vsel %vm3932_vm2, %v1920_v43, 0 }
 0x7b8   : > { %v2046_v25 = vsel %vm3941_vm8, %v4036_v52, 0  ;;  %v3117_v58 = vld [vmem:[#allocation6 + $0x14] sm:$0xf0]  ;;  %v2495_v62 = vunpack.c.h.b16 %v4048_v1  ;;  %v2140_v3 = vsel %vm3879_vm6, %v1920_v43, 0  ;;  %v3195_v20 = vld [vmem:[#allocation6 + $0x10] sm:$0xf0] }
 0x7b9   : > { %v1905_v33 = vpop.f32.mrf.mxu3  ;;  %v2252_v37 = vunpack.c.l.b16 %v2046_v25  ;;  %2227 = vrot.lane.b32.xlu0 %v3084_v7, %s3352_s17  ;;  %2225 = vrot.lane.b32.xlu2 %v3080_v24, %s3352_s17  ;;  %v3120_v8 = vor.u32 %v3198_v4, %v3117_v58  ;;  %v2408_v12 = vunpack.c.l.b16 %v2140_v3  ;;  %v2409_v41 = vunpack.c.h.b16 %v2140_v3  ;;  %v3101_v56 = vld [vmem:[#allocation6 + $0x14] sm:$0xf0]  ;;  %v1975_v29 = vld [vmem:[#allocation6 + $0x10] sm:$0xff] }
 0x7ba   : > { %v1917_v10 = vmul.f32 %v3321_v54, %v1905_v33  ;;  %v1886_v32 = vpop.f32.mrf.mxu1  ;;  %v4051_v54 = vpack.c.b16 %v2363_v11, %v2360_v61  ;;  %v2113_v26 = vsel %vm3894_vm9, %v1920_v43, 0  ;;  %v3104_v45 = vor.u32 %v3194_v40, %v3101_v56 }
 0x7bb   : > { %v2261_v53 = vpack.c.b16 %v2252_v37, %v2249_v39  ;;  %v1916_v57 = vmul.f32 %v3323_v63, %v1886_v32  ;;  %v3116_v63 = vor.u32 %v3199_v60, %v3115_v6  ;;  %v3100_v30 = vor.u32 %v3195_v20, %v3099_v42 }
 0x7bc   : > { %v2045_v19 = vsel %vm3945_vm4, %v1975_v29, 0  ;;  %v4091_v51 = vsel %vm3991_vm11, %v1975_v29, 0  ;;  %v2366_v33 = vunpack.c.h.b16 %v2113_v26  ;;  %v2072_v55 = vsel %vm3973_vm0, %v1975_v29, 0 }
 0x7bd   : > { %2269 = vrot.lane.b32.xlu1 %v2261_v53, %s3355_s23  ;;  %v1921_v0 = vpack.c.bf16 %v1917_v10, %v1916_v57  ;;  %v2251_v25 = vunpack.c.h.b16 %v2045_v19  ;;  %v2250_v39 = vunpack.c.l.b16 %v2045_v19  ;;  %v2365_v53 = vunpack.c.l.b16 %v2113_v26 }
 0x7be   : > { %v4079_v47 = vld [vmem:[#allocation6 + $0x20] sm:$0xff]  ;;  %v4103_v32 = vld [vmem:[#allocation6 + $0x28] sm:$0xf]  ;;  %v2179_v57 = vunpack.c.l.b16 %v4087_v49  ;;  %v2182_v59 = vunpack.c.l.b16 %v4091_v51  ;;  %v2494_v61 = vunpack.c.l.b16 %v4048_v1  ;;  %v2009_v1 = vsel %vm3980_vm12, %v4027_v21, 0 }
 0x7bf   : > { %3072 = vst [vmem:[#allocation6 + $0x34] sm:$0xff] %v1921_v0  ;;  %v2169_v9 = vsel %vm3932_vm2, %v1921_v0, 0  ;;  %v2142_v16 = vsel %vm3879_vm6, %v1921_v0, 0  ;;  %v2115_v34 = vsel %vm3894_vm9, %v1921_v0, 0  ;;  %v4096_v37 = vsel %vm3991_vm11, %v4079_v47, 0 }
 0x7c0   : > { %v2498_v14 = vunpack.c.h.b16 %v2169_v9  ;;  %v2411_v27 = vunpack.c.l.b16 %v2142_v16  ;;  %v2412_v28 = vunpack.c.h.b16 %v2142_v16  ;;  %v2369_v44 = vunpack.c.h.b16 %v2115_v34 }
 0x7c1   : > { %2465 = vrot.lane.b32.xlu0 %v3120_v8, %s3366_s9  ;;  %2463 = vrot.lane.b32.xlu2 %v3116_v63, %s3366_s9  ;;  %v2368_v7 = vunpack.c.l.b16 %v2115_v34  ;;  %v2497_v0 = vunpack.c.l.b16 %v2169_v9  ;;  %v2013_v8 = vsel %vm3980_vm12, %v4103_v32, 0  ;;  %v2070_v56 = vsel %vm3973_vm0, %v1973_v22, 0 }
 0x7c2   : > { %v4064_v17 = vpack.c.b16 %v2498_v14, %v2495_v62  ;;  %v4069_v35 = vpack.c.b16 %v2411_v27, %v2408_v12  ;;  %v4071_v36 = vpack.c.b16 %v2412_v28, %v2409_v41  ;;  %v4111_v60 = vpack.c.b16 %v2369_v44, %v2366_v33 }
 0x7c3   : > { %v4116_v2 = vpack.c.b16 %v2368_v7, %v2365_v53  ;;  %v4123_v62 = vpack.c.b16 %v2497_v0, %v2494_v61  ;;  %v4133_v3 = vunpack.c.l.b16 %v2013_v8  ;;  %v2011_v12 = vsel %vm3980_vm12, %v4036_v52, 0  ;;  %v3107_v61 = vld [vmem:[#allocation6 + $0x24] sm:$0xf] }
 0x7c4   : > { %v4142_v41 = vunpack.c.l.b16 %v2009_v1  ;;  %v4144_v27 = vunpack.c.l.b16 %v2011_v12  ;;  %v2191_v28 = vpack.c.b16 %v2182_v59, %v2179_v57  ;;  %v2294_v29 = vunpack.c.h.b16 %v2072_v55 }
 0x7c5   : > { %2377 = vrot.lane.b32.xlu1 %v2371_v23, %s3368_s14  ;;  %v2043_v23 = vsel %vm3945_vm4, %v1973_v22, 0  ;;  %v2293_v26 = vunpack.c.l.b16 %v2072_v55  ;;  %v2291_v34 = vunpack.c.h.b16 %v2070_v56  ;;  %v2290_v40 = vunpack.c.l.b16 %v2070_v56  ;;  %v3196_v22 = vld [vmem:[#allocation6 + $0x28] sm:$0xf]  ;;  %v3127_v55 = vld [vmem:[#allocation6 + $0x24] sm:$0xf] }
 0x7c6   : > { %v4081_v43 = vld [vmem:[#allocation6 + $0x30] sm:$0xff]  ;;  %v2248_v24 = vunpack.c.h.b16 %v2043_v23  ;;  %v2247_v11 = vunpack.c.l.b16 %v2043_v23  ;;  %v4109_v58 = vld [vmem:[#allocation6 + $0x38] sm:$0xf]  ;;  %v2193_v50 = vpack.c.b16 %v4144_v27, %v4142_v41  ;;  %v2073_v23 = vsel %vm4000_vm3, %v4036_v52, 0  ;;  %v4165_v52 = vpop.permute.xlu2 %2229 }
 0x7c7   : > { %v4101_v10 = vsel %vm3991_vm11, %v4081_v43, 0  ;;  %v2015_v14 = vsel %vm3980_vm12, %v4109_v58, 0  ;;  %v2303_v42 = vpack.c.b16 %v2294_v29, %v2291_v34  ;;  %v2071_v44 = vsel %vm4000_vm3, %v4027_v21, 0  ;;  %v3089_v33 = vld [vmem:[#allocation6 + $0x30] sm:$0xf0] }
 0x7c8   : > { %v2260_v4 = vpack.c.b16 %v2251_v25, %v2248_v24  ;;  %v2188_v6 = vunpack.c.l.b16 %v4101_v10  ;;  %v2259_v63 = vpack.c.b16 %v2250_v39, %v2247_v11  ;;  %v4135_v16 = vunpack.c.l.b16 %v2015_v14  ;;  %v3191_v39 = vld [vmem:[#allocation6 + $0x24] sm:$0xf]  ;;  %v3202_v59 = vld [vmem:[#allocation6 + $0x30] sm:$0xf0]  ;;  %v3129_v34 = vld [vmem:[#allocation6 + $0x34] sm:$0xf0] }
 0x7c9   : > { %2343 = vrot.lane.b32.xlu0 %v3104_v45, %s3364_s26  ;;  %2341 = vrot.lane.b32.xlu2 %v3100_v30, %s3364_s26  ;;  %v2302_v45 = vpack.c.b16 %v2293_v26, %v2290_v40  ;;  %v3109_v30 = vld [vmem:[#allocation6 + $0x34] sm:$0xf0]  ;;  %v2295_v7 = vunpack.c.l.b16 %v2073_v23  ;;  %v2292_v24 = vunpack.c.l.b16 %v2071_v44  ;;  %v2189_v53 = vunpack.c.h.b16 %v4101_v10  ;;  %v3197_v10 = vld [vmem:[#allocation6 + $0x30] sm:$0xf0]  ;;  %v2224_v40 = vpop.permute.xlu0 %2223 }
 0x7ca   : > { %v2196_v20 = vpack.c.b16 %v4135_v16, %v4133_v3  ;;  %v3112_v19 = vor.u32 %v3196_v22, %v3109_v30  ;;  %v3092_v21 = vor.u32 %v3191_v39, %v3089_v33  ;;  %v2186_v11 = vunpack.c.h.b16 %v4096_v37 }
 0x7cb   : > { %v2304_v25 = vpack.c.b16 %v2295_v7, %v2292_v24  ;;  %v3108_v0 = vor.u32 %v3197_v10, %v3107_v61  ;;  %v2180_v8 = vunpack.c.h.b16 %v4087_v49  ;;  %v2077_v12 = vsel %vm4000_vm3, %v4109_v58, 0  ;;  %v3095_v49 = vld [vmem:[#allocation6 + $0x28] sm:$0xf] }
 0x7cc   : > { %v2075_v48 = vsel %vm4000_vm3, %v4103_v32, 0  ;;  %v2049_v5 = vsel %vm3945_vm4, %v4081_v43, 0  ;;  %v2047_v30 = vsel %vm3945_vm4, %v4079_v47, 0  ;;  %v2048_v18 = vsel %vm3941_vm8, %v4103_v32, 0 }
 0x7cd   : > { %2506 = vrot.lane.b32.xlu1 %v4029_v38, %s3369_s15  ;;  %v2185_v38 = vunpack.c.l.b16 %v4096_v37  ;;  %v2253_v7 = vunpack.c.l.b16 %v2047_v30  ;;  %v2255_v39 = vunpack.c.l.b16 %v2048_v18  ;;  %vm4609_vm6 = vcmask 1039360  }
 0x7ce   : > { %v4174_v57 = vpop.permute.xlu2 %2467  ;;  %vm4610_vm9 = vmmov %vm4609_vm6  ;;  %vm4611_vm2 = vcmask 908288   ;;  %vm2432_vm4 = vcmask 785408   ;;  %vm2389_vm12 = vcmask 900096  }
 0x7cf   : > { %v4131_v9 = vpack.c.b16 %v2188_v6, %v2185_v38  ;;  %vm4612_vm15 = vmmov %vm4609_vm6 }
 0x7d0   : > { %vm4613_vm1 = vmmov %vm4611_vm2 }
 0x7d1   : > { %2267 = vrot.lane.b32.xlu2 %v2260_v4, %s3355_s23  ;;  %2265 = vrot.lane.b32.xlu0 %v2259_v63, %s3355_s23  ;;  %v2074_v4 = vsel %vm3973_vm0, %v4079_v47, 0  ;;  %vm4614_vm7 = vmmov %vm4609_vm6 }
 0x7d2   : > { %v2296_v6 = vunpack.c.l.b16 %v2074_v4  ;;  %v2297_v44 = vunpack.c.h.b16 %v2074_v4 }
 0x7d5   : > { %2589 = vrot.lane.b32.xlu1 %v2191_v28, %s3365_s11  ;;  %v2298_v28 = vunpack.c.l.b16 %v2075_v48 }
 0x7d6   : > { %v4180_v37 = vpop.permute.xlu2 %2430 }
 0x7d9   : > { %2310 = vrot.lane.b32.xlu0 %v2303_v42, %s3370_s18  ;;  %2308 = vrot.lane.b32.xlu2 %v2302_v45, %s3370_s18  ;;  %v3201_v42 = vld [vmem:[#allocation6 + $0x28] sm:$0xf] }
 0x7da   : > { %v3132_v45 = vor.u32 %v3201_v42, %v3129_v34 }
 0x7dd   : > { %2347 = vrot.lane.b32.xlu1 %v3112_v19, %s3364_s26  ;;  %v2256_v19 = vunpack.c.l.b16 %v2049_v5 }
 0x7df   : > { %v2262_v24 = vpack.c.b16 %v2256_v19, %v2253_v7 }
 0x7e1   : > { %2422 = vrot.lane.b32.xlu0 %v4034_v46, %s3367_s12  ;;  %2312 = vrot.lane.b32.xlu2 %v2304_v25, %s3370_s18  ;;  %v2195_v46 = vpack.c.b16 %v2189_v53, %v2186_v11  ;;  %v2257_v11 = vunpack.c.h.b16 %v2049_v5 }
 0x7e5   : > { %2514 = vrot.lane.b32.xlu1 %v4064_v17, %s3369_s15  ;;  %v3128_v17 = vor.u32 %v3202_v59, %v3127_v55  ;;  %v4236_v55 = vpop.permute.xlu1 %2473 }
 0x7e8   : > { %v4193_v1 = vpop.permute.xlu2 %2381 }
 0x7e9   : > { %2231 = vrot.lane.b32.xlu0 %v3092_v21, %s3352_s17  ;;  %2420 = vrot.lane.b32.xlu2 %v4041_v31, %s3367_s12  ;;  %v2076_v31 = vsel %vm3973_vm0, %v4081_v43, 0  ;;  %v2050_v43 = vsel %vm3941_vm8, %v4109_v58, 0  ;;  %vm2518_vm8 = vcmask 769024   ;;  %vm4616_vm0 = vmmov %vm4615_vm14 }
 0x7ea   : > { %v2299_v38 = vunpack.c.l.b16 %v2076_v31  ;;  %v2300_v23 = vunpack.c.h.b16 %v2076_v31  ;;  %v2258_v47 = vunpack.c.l.b16 %v2050_v43  ;;  %vm4617_vm11 = vmmov %vm4616_vm0 }
 0x7eb   : > { %vm4618_vm3 = vmmov %vm4616_vm0 }
 0x7ec   : > { %v2305_v63 = vpack.c.b16 %v2299_v38, %v2296_v6  ;;  %v2306_v25 = vpack.c.b16 %v2300_v23, %v2297_v44  ;;  %v2264_v53 = vpack.c.b16 %v2258_v47, %v2255_v39 }
 0x7ed   : > { %2597 = vrot.lane.b32.xlu1 %v2195_v46, %s3365_s11  ;;  %v4216_v33 = vpop.permute.xlu0 %2387  ;;  %v2254_v46 = vunpack.c.h.b16 %v2047_v30  ;;  %v2425_v10 = vpop.permute.xlu1 %2424 }
 0x7ef   : > { %v2263_v59 = vpack.c.b16 %v2257_v11, %v2254_v46 }
 0x7f0   : > { %v4205_v26 = vpop.permute.xlu2 %2516 }
 0x7f1   : > { %2469 = vrot.lane.b32.xlu0 %v3128_v17, %s3366_s9  ;;  %2379 = vrot.lane.b32.xlu2 %v4051_v54, %s3368_s14  ;;  %v2183_v54 = vunpack.c.h.b16 %v4091_v51  ;;  %v3193_v51 = vld [vmem:[#allocation6 + $0x34] sm:$0xf0] }
 0x7f2   : > { %v3096_v29 = vor.u32 %v3193_v51, %v3095_v49 }
 0x7f3   : > { %v2192_v14 = vpack.c.b16 %v2183_v54, %v2180_v8 }
 0x7f9   : > { %2345 = vrot.lane.b32.xlu0 %v3108_v0, %s3364_s26  ;;  %2508 = vrot.lane.b32.xlu2 %v4055_v13, %s3369_s15  ;;  %v2301_v13 = vunpack.c.l.b16 %v2077_v12 }
 0x7fb   : > { %v2307_v56 = vpack.c.b16 %v2301_v13, %v2298_v28 }
 0x801   : > { %2314 = vrot.lane.b32.xlu0 %v2305_v63, %s3370_s18  ;;  %2591 = vrot.lane.b32.xlu2 %v2192_v14, %s3365_s11 }
 0x803   : > { %v2511_v21 = vpop.permute.xlu0 %2510 }
 0x809   : > { %2318 = vrot.lane.b32.xlu0 %v2307_v56, %s3370_s18  ;;  %2233 = vrot.lane.b32.xlu2 %v3096_v29, %s3352_s17 }
 0x811   : > { %2426 = vrot.lane.b32.xlu0 %v4069_v35, %s3367_s12  ;;  %2471 = vrot.lane.b32.xlu2 %v3132_v45, %s3366_s9 }
 0x813   : > { %v2226_v22 = vpop.permute.xlu2 %2225 }
 0x814   : > { %v2235_v4 = vsel %vm4609_vm6, %v2224_v40, %v2226_v22  ;;  %vm4620_vm6 = vmmov %vm4616_vm0 }
 0x819   : > { %2271 = vrot.lane.b32.xlu0 %v2262_v24, %s3355_s23  ;;  %2316 = vrot.lane.b32.xlu2 %v2306_v25, %s3370_s18 }
 0x81b   : > { %v2464_v35 = vpop.permute.xlu2 %2463 }
 0x821   : > { %2275 = vrot.lane.b32.xlu0 %v2264_v53, %s3355_s23  ;;  %2428 = vrot.lane.b32.xlu2 %v4071_v36, %s3367_s12 }
 0x823   : > { %v2342_v58 = vpop.permute.xlu2 %2341 }
 0x829   : > { %2385 = vrot.lane.b32.xlu0 %v4111_v60, %s3368_s14  ;;  %2273 = vrot.lane.b32.xlu2 %v2263_v59, %s3355_s23 }
 0x82b   : > { %v4232_v15 = vpop.permute.xlu0 %2227  ;;  %v4234_v32 = vpop.permute.xlu2 %2267 }
 0x831   : > { %2512 = vrot.lane.b32.xlu0 %v4123_v62, %s3369_s15  ;;  %2383 = vrot.lane.b32.xlu2 %v4116_v2, %s3368_s14  ;;  %v4256_v2 = vpop.permute.xlu1 %2269 }
 0x832   : > { %v2279_v29 = vsel %vm2277_vm10, %v4234_v32, %v4256_v2 }
 0x833   : > { %v2466_v36 = vpop.permute.xlu0 %2465  ;;  %v2309_v17 = vpop.permute.xlu2 %2308 }
 0x834   : > { %v4244_v60 = vsel %vm2475_vm5, %v2466_v36, %v4174_v57  ;;  %v2476_v62 = vsel %vm2475_vm5, %v2464_v35, %v2466_v36 }
 0x839   : > { %2595 = vrot.lane.b32.xlu0 %v4131_v9, %s3365_s11  ;;  %2673 = vrot.lane.b32.xlu2 %v2464_v35, %s3365_s11  ;;  %v2236_v9 = vsel %vm4610_vm9, %v2226_v22, %v4232_v15  ;;  %v2378_v6 = vpop.permute.xlu1 %2377  ;;  %vm4621_vm9 = vmmov %vm4616_vm0 }
 0x83b   : > { %v4249_v61 = vpop.permute.xlu0 %2343  ;;  %v4251_v0 = vpop.permute.xlu2 %2312 }
 0x83c   : > { %v2349_v8 = vsel %vm4611_vm2, %v2342_v58, %v4249_v61  ;;  %vm4623_vm2 = vmmov %vm4616_vm0 }
 0x841   : > { %2675 = vrot.lane.b32.xlu0 %v2476_v62, %s3365_s11  ;;  %2637 = vrot.lane.b32.xlu2 %v2342_v58, %s3365_s11  ;;  %v4281_v28 = vpop.permute.xlu1 %2506 }
 0x843   : > { %v2266_v57 = vpop.permute.xlu0 %2265  ;;  %v2421_v31 = vpop.permute.xlu2 %2420 }
 0x844   : > { %v2278_v7 = vsel %vm2277_vm10, %v2266_v57, %v4234_v32 }
 0x849   : > { %2603 = vrot.lane.b32.xlu0 %v2236_v9, %s3365_s11  ;;  %2601 = vrot.lane.b32.xlu2 %v2235_v4, %s3365_s11  ;;  %v4290_v34 = vpop.permute.xlu1 %2589 }
 0x84b   : > { %v2311_v38 = vpop.permute.xlu0 %2310  ;;  %v4263_v54 = vpop.permute.xlu2 %2379 }
 0x84c   : > { %v2321_v63 = vsel %vm2320_vm13, %v2309_v17, %v2311_v38  ;;  %v2390_v5 = vsel %vm2389_vm12, %v2378_v6, %v4263_v54  ;;  %v2322_v30 = vsel %vm2320_vm13, %v2311_v38, %v4251_v0 }
 0x851   : > { %2639 = vrot.lane.b32.xlu0 %v2349_v8, %s3365_s11  ;;  %2625 = vrot.lane.b32.xlu2 %v2321_v63, %s3365_s11  ;;  %v2348_v23 = vpop.permute.xlu1 %2347 }
 0x853   : > { %v2423_v14 = vpop.permute.xlu0 %2422  ;;  %v4270_v12 = vpop.permute.xlu2 %2508 }
 0x854   : > { %v4274_v48 = vsel %vm2518_vm8, %v4270_v12, %v2511_v21  ;;  %v2433_v13 = vsel %vm2432_vm4, %v2421_v31, %v2423_v14  ;;  %v4278_v51 = vsel %vm2432_vm4, %v2423_v14, %v2425_v10 }
 0x855   : > { %2663 = vrot.lane.b32.xlu1 %v2433_v13, %s3365_s11 }
 0x859   : > { %2661 = vrot.lane.b32.xlu0 %v2421_v31, %s3365_s11  ;;  %v2391_v31 = vsel %vm2389_vm12, %v4263_v54, %v4193_v1  ;;  %v2515_v4 = vpop.permute.xlu1 %2514 }
 0x85a   : > { %v2522_v54 = vsel %vm2518_vm8, %v2515_v4, %v4205_v26 }
 0x85b   : > { %v2232_v49 = vpop.permute.xlu0 %2231  ;;  %v4284_v56 = vpop.permute.xlu2 %2591 }
 0x85c   : > { %v2237_v47 = vsel %vm4614_vm7, %v4165_v52, %v2232_v49  ;;  %vm4630_vm7 = vmmov %vm4616_vm0 }
 0x85d   : > { %2615 = vrot.lane.b32.xlu1 %v2279_v29, %s3365_s11 }
 0x861   : > { %2649 = vrot.lane.b32.xlu0 %v2378_v6, %s3365_s11 }
 0x863   : > { %v2470_v40 = vpop.permute.xlu0 %2469  ;;  %v2234_v42 = vpop.permute.xlu2 %2233 }
 0x864   : > { %v2238_v45 = vsel %vm4612_vm15, %v2232_v49, %v2234_v42  ;;  %vm4628_vm15 = vmmov %vm4616_vm0 }
 0x865   : > { %2609 = vrot.lane.b32.xlu2 %v2238_v45, %s3365_s11  ;;  %2651 = vrot.lane.b32.xlu1 %v2390_v5, %s3365_s11 }
 0x869   : > { %2627 = vrot.lane.b32.xlu0 %v2322_v30, %s3365_s11 }
 0x86b   : > { %v2346_v22 = vpop.permute.xlu0 %2345  ;;  %v2472_v19 = vpop.permute.xlu2 %2471 }
 0x86c   : > { %v2350_v44 = vsel %vm4613_vm1, %v2346_v22, %v2348_v23  ;;  %v2478_v43 = vsel %vm2475_vm5, %v2470_v40, %v2472_v19  ;;  %v2479_v21 = vsel %vm2475_vm5, %v2472_v19, %v4236_v55  ;;  %vm4619_vm5 = vmmov %vm4616_vm0 }
 0x86d   : > { %2643 = vrot.lane.b32.xlu1 %v2346_v22, %s3365_s11  ;;  %2645 = vrot.lane.b32.xlu2 %v2350_v44, %s3365_s11  ;;  %vm4629_vm1 = vmmov %vm4616_vm0 }
 0x871   : > { %2613 = vrot.lane.b32.xlu0 %v2278_v7, %s3365_s11 }
 0x873   : > { %v2315_v24 = vpop.permute.xlu0 %2314  ;;  %v2317_v25 = vpop.permute.xlu2 %2316 }
 0x874   : > { %v2323_v11 = vsel %vm2320_vm13, %v2315_v24, %v2317_v25 }
 0x875   : > { %2681 = vrot.lane.b32.xlu1 %v2478_v43, %s3365_s11 }
 0x879   : > { %2679 = vrot.lane.b32.xlu0 %v2470_v40, %s3365_s11 }
 0x87b   : > { %v2319_v18 = vpop.permute.xlu0 %2318  ;;  %v2429_v35 = vpop.permute.xlu2 %2428 }
 0x87c   : > { %v2324_v32 = vsel %vm2320_vm13, %v2317_v25, %v2319_v18  ;;  %v2436_v9 = vsel %vm2432_vm4, %v2429_v35, %v4180_v37  ;;  %vm4622_vm13 = vmmov %vm4616_vm0 }
 0x87d   : > { %2607 = vrot.lane.b32.xlu1 %v2237_v47, %s3365_s11 }
 0x881   : > { %2635 = vrot.lane.b32.xlu0 %v2319_v18, %s3365_s11 }
 0x883   : > { %v2427_v39 = vpop.permute.xlu0 %2426  ;;  %v2274_v53 = vpop.permute.xlu2 %2273 }
 0x884   : > { %v2435_v52 = vsel %vm2432_vm4, %v2427_v39, %v2429_v35  ;;  %vm4625_vm4 = vmmov %vm4616_vm0 }
 0x885   : > { %2683 = vrot.lane.b32.xlu1 %v2479_v21, %s3365_s11 }
 0x889   : > { %2631 = vrot.lane.b32.xlu0 %v2323_v11, %s3365_s11 }
 0x88b   : > { %v2272_v58 = vpop.permute.xlu0 %2271  ;;  %v2384_v46 = vpop.permute.xlu2 %2383 }
 0x88c   : > { %2655 = vrot.lane.b32.xlu2 %v2384_v46, %s3365_s11  ;;  %v2280_v10 = vsel %vm2277_vm10, %v2272_v58, %v2274_v53 }
 0x88d   : > { %2667 = vrot.lane.b32.xlu1 %v2427_v39, %s3365_s11 }
 0x891   : > { %2677 = vrot.lane.b32.xlu0 %v4244_v60, %s3365_s11 }
 0x893   : > { %v2276_v59 = vpop.permute.xlu0 %2275  ;;  %v2674_v57 = vpop.permute.xlu2 %2673 }
 0x894   : > { %2669 = vrot.lane.b32.xlu2 %v2435_v52, %s3365_s11  ;;  %v2281_v55 = vsel %vm2277_vm10, %v2274_v53, %v2276_v59  ;;  %vm4626_vm10 = vmmov %vm4616_vm0 }
 0x895   : > { %2633 = vrot.lane.b32.xlu1 %v2324_v32, %s3365_s11 }
 0x89b   : > { %v2386_v36 = vpop.permute.xlu0 %2385 }
 0x89c   : > { %v2392_v17 = vsel %vm2389_vm12, %v2384_v46, %v2386_v36  ;;  %2621 = vrot.lane.b32.xlu2 %v2281_v55, %s3365_s11  ;;  %v2393_v1 = vsel %vm2389_vm12, %v2386_v36, %v4216_v33  ;;  %vm4627_vm12 = vmmov %vm4616_vm0 }
 0x89d   : > { %2619 = vrot.lane.b32.xlu1 %v2280_v10, %s3365_s11  ;;  %2657 = vrot.lane.b32.xlu0 %v2392_v17, %s3365_s11 }
 0x8a3   : > { %v2513_v60 = vpop.permute.xlu0 %2512 }
 0x8a4   : > { %2629 = vrot.lane.b32.xlu2 %v4251_v0, %s3365_s11  ;;  %v2521_v37 = vsel %vm2518_vm8, %v2513_v60, %v2515_v4  ;;  %v3182_v4 = vld [vmem:[%s4575_s7 + $0x4] sm:$0xf] }
 0x8a5   : > { %2623 = vrot.lane.b32.xlu1 %v2276_v59, %s3365_s11  ;;  %2617 = vrot.lane.b32.xlu0 %v4256_v2, %s3365_s11  ;;  %v4356_v2 = vpop.permute.xlu2 %2637 }
 0x8ab   : > { %v4338_v62 = vpop.permute.xlu0 %2595 }
 0x8ac   : > { %2611 = vrot.lane.b32.xlu2 %v2234_v42, %s3365_s11 }
 0x8ad   : > { %2665 = vrot.lane.b32.xlu1 %v4278_v51, %s3365_s11  ;;  %2691 = vrot.lane.b32.xlu0 %v2513_v60, %s3365_s11  ;;  %v4369_v3 = vpop.permute.xlu2 %2601 }
 0x8b3   : > { %v4347_v0 = vpop.permute.xlu0 %2675 }
 0x8b4   : > { %2653 = vrot.lane.b32.xlu2 %v2391_v31, %s3365_s11  ;;  %v2725_v41 = vsel %vm4616_vm0, %v2674_v57, %v4347_v0 }
 0x8b5   : > { %2605 = vrot.lane.b32.xlu1 %v4232_v15, %s3365_s11  ;;  %2599 = vrot.lane.b32.xlu0 %v2196_v20, %s3365_s11  ;;  %v4367_v15 = vpop.permute.xlu1 %2597  ;;  %v2519_v20 = vsel %vm2518_vm8, %v4281_v28, %v4270_v12  ;;  %v2626_v8 = vpop.permute.xlu2 %2625  ;;  %vm4624_vm8 = vmmov %vm4616_vm0 }
 0x8bb   : > { %v4360_v38 = vpop.permute.xlu0 %2603 }
 0x8bc   : > { %2671 = vrot.lane.b32.xlu2 %v2436_v9, %s3365_s11  ;;  %v2701_v60 = vsel %vm4630_vm7, %v4369_v3, %v4360_v38  ;;  %v3141_v9 = vld [vmem:[%s4575_s7 + $0xc] sm:$0xf0]  ;;  %vm4645_vm7 = vmmov %vm4616_vm0 }
 0x8bd   : > { %2659 = vrot.lane.b32.xlu0 %v2393_v1, %s3365_s11  ;;  %2647 = vrot.lane.b32.xlu1 %v2348_v23, %s3365_s11  ;;  %v4450_v3 = vor.u32 %v3182_v4, %v3141_v9 }
 0x8bf   : > { %v4392_v12 = vpop.permute.xlu2 %2609 }
 0x8c3   : > { %v4371_v16 = vpop.permute.xlu0 %2639 }
 0x8c4   : > { %2685 = vrot.lane.b32.xlu2 %v4281_v28, %s3365_s11 }
 0x8c5   : > { %2687 = vrot.lane.b32.xlu0 %v2519_v20, %s3365_s11  ;;  %2693 = vrot.lane.b32.xlu1 %v2521_v37, %s3365_s11 }
 0x8c7   : > { %v4381_v33 = vpop.permute.xlu1 %2663  ;;  %v4400_v51 = vpop.permute.xlu2 %2645 }
 0x8cb   : > { %v2662_v6 = vpop.permute.xlu0 %2661 }
 0x8cc   : > { %2695 = vrot.lane.b32.xlu2 %v2522_v54, %s3365_s11  ;;  %v2721_v44 = vsel %vm4618_vm3, %v2662_v6, %v4381_v33  ;;  %vm4633_vm3 = vmmov %vm4616_vm0  ;;  %v3139_v6 = vld [vmem:[%s4575_s7] sm:$0xf] }
 0x8cd   : > { %2641 = vrot.lane.b32.xlu0 %v4249_v61, %s3365_s11  ;;  %2689 = vrot.lane.b32.xlu1 %v4274_v48, %s3365_s11 }
 0x8cf   : > { %v4390_v63 = vpop.permute.xlu1 %2615 }
 0x8d3   : > { %v2650_v14 = vpop.permute.xlu0 %2649 }
 0x8d4   : > { %2593 = vrot.lane.b32.xlu2 %v2193_v50, %s3365_s11 }
 0x8d7   : > { %v4398_v26 = vpop.permute.xlu1 %2651 }
 0x8d8   : > { %v2717_v52 = vsel %vm4626_vm10, %v2650_v14, %v4398_v26  ;;  %vm4641_vm10 = vmmov %vm4616_vm0 }
 0x8db   : > { %v2628_v13 = vpop.permute.xlu0 %2627 }
 0x8dc   : > { %v2709_v35 = vsel %vm4621_vm9, %v2626_v8, %v2628_v13  ;;  %v3183_v8 = vld [vmem:[%s4575_s7 + $0x8] sm:$0xf0]  ;;  %vm4636_vm9 = vmmov %vm4616_vm0 }
 0x8df   : > { %v2644_v28 = vpop.permute.xlu1 %2643 }
 0x8e0   : > { %v2715_v17 = vsel %vm4628_vm15, %v2644_v28, %v4400_v51  ;;  %vm4643_vm15 = vmmov %vm4616_vm0 }
 0x8e3   : > { %v2614_v61 = vpop.permute.xlu0 %2613 }
 0x8e4   : > { %v2705_v46 = vsel %vm4625_vm4, %v2614_v61, %v4390_v63  ;;  %vm4640_vm4 = vmmov %vm4616_vm0 }
 0x8e6   : > { %v2656_v49 = vpop.permute.xlu2 %2655 }
 0x8e7   : > { %v4402_v29 = vpop.permute.xlu1 %2681 }
 0x8eb   : > { %v2680_v48 = vpop.permute.xlu0 %2679 }
 0x8ec   : > { %v2727_v40 = vsel %vm4615_vm14, %v2680_v48, %v4402_v29  ;;  %vm4631_vm14 = vmmov %vm4616_vm0 }
 0x8ed   : > { %2794 = vmatpush.bf16.msrb.mxu2 %v2727_v40  ;;  %v2713_v57 = vsel %vm4631_vm14, %v4356_v2, %v4371_v16  ;;  %vm4646_vm14 = vmmov %vm4616_vm0 }
 0x8ee   : > { %v4406_v42 = vpop.permute.xlu2 %2669 }
 0x8ef   : > { %v2608_v45 = vpop.permute.xlu1 %2607 }
 0x8f0   : > { %v2703_v36 = vsel %vm4627_vm12, %v2608_v45, %v4392_v12  ;;  %vm4642_vm12 = vmmov %vm4616_vm0 }
 0x8f1   : > { %2795 = vmatpush.bf16.msrb.mxu2 %v2725_v41 }
 0x8f3   : > { %v2636_v27 = vpop.permute.xlu0 %2635 }
 0x8f6   : > { %v2622_v50 = vpop.permute.xlu2 %2621 }
 0x8f7   : > { %v2684_v5 = vpop.permute.xlu1 %2683 }
 0x8fb   : > { %v2632_v30 = vpop.permute.xlu0 %2631 }
 0x8fe   : > { %v2630_v23 = vpop.permute.xlu2 %2629 }
 0x8ff   : > { %v2668_v22 = vpop.permute.xlu1 %2667  ;;  %v2710_v47 = vsel %vm4622_vm13, %v2628_v13, %v2630_v23  ;;  %vm4637_vm13 = vmmov %vm4616_vm0 }
 0x900   : > { %v2723_v19 = vsel %vm4617_vm11, %v2668_v22, %v4406_v42  ;;  %vm4632_vm11 = vmmov %vm4616_vm0 }
 0x901   : > { %2796 = vmatpush.bf16.msrb.mxu2 %v2723_v19  ;;  %v2699_v37 = vsel %vm4632_vm11, %v4338_v62, %v4367_v15  ;;  %v3140_v62 = vor.u32 %v3183_v8, %v3139_v6  ;;  %vm4647_vm11 = vmmov %vm4616_vm0 }
 0x903   : > { %v2678_v24 = vpop.permute.xlu0 %2677 }
 0x905   : > { %2797 = vmatpush.bf16.msrb.mxu2 %v2721_v44 }
 0x906   : > { %v2612_v7 = vpop.permute.xlu2 %2611 }
 0x907   : > { %v2634_v25 = vpop.permute.xlu1 %2633  ;;  %v2704_v54 = vsel %vm4633_vm3, %v4392_v12, %v2612_v7  ;;  %v1937_v7 = vld [vmem:[%s4572_s4 + $0x18] sm:$0xff]  ;;  %vm4648_vm3 = vmmov %vm4616_vm0 }
 0x908   : > { %v2711_v43 = vsel %vm4619_vm5, %v2632_v30, %v2634_v25  ;;  %v2712_v18 = vsel %vm4620_vm6, %v2634_v25, %v2636_v27  ;;  %vm4634_vm5 = vmmov %vm4616_vm0  ;;  %v3371_v30 = vmov 5  }
 0x909   : > { %2775 = vmatpush.bf16.msrb.mxu1 %v2711_v43  ;;  %2832 = vmatpush.bf16.msrb.mxu0 %v2712_v18  ;;  %vm4635_vm6 = vmmov %vm4616_vm0  ;;  %v3147_v18 = vld [vmem:[%s4575_s7 + $0x8] sm:$0xf] }
 0x90a   : > { %v2728_v14 = vsel %vm4635_vm6, %v4402_v29, %v2684_v5  ;;  %v3153_v29 = vld [vmem:[%s4575_s7 + $0x24] sm:$0xf0]  ;;  %v3186_v5 = vld [vmem:[%s4575_s7 + $0x20] sm:$0xf0]  ;;  %3265 = vset.pattern.permute.xlu1 %v3371_v30  ;;  %3267 = vset.pattern.permute.xlu0 %v3371_v30 }
 0x90b   : > { %3266 = vset.pattern.permute.xlu2 %v3371_v30 }
 0x90d   : > { %2776 = vmatpush.bf16.msrb.mxu1 %v2709_v35  ;;  %2833 = vmatpush.bf16.msrb.mxu0 %v2710_v47  ;;  %v3184_v35 = vld [vmem:[%s4575_s7 + $0x10] sm:$0xf0] }
 0x90e   : > { %v4418_v39 = vpop.permute.xlu2 %2653 }
 0x90f   : > { %v4420_v53 = vpop.permute.xlu0 %2657  ;;  %v2620_v21 = vpop.permute.xlu1 %2619  ;;  %v2718_v43 = vsel %vm4645_vm7, %v4398_v26, %v4418_v39 }
 0x910   : > { %v2707_v11 = vsel %vm4623_vm2, %v2620_v21, %v2622_v50  ;;  %v2719_v58 = vsel %vm4624_vm8, %v2656_v49, %v4420_v53  ;;  %v2726_v49 = vsel %vm4637_vm13, %v4347_v0, %v2678_v24  ;;  %vm4638_vm2 = vmmov %vm4616_vm0 }
 0x911   : > { %2777 = vmatpush.bf16.msrb.mxu1 %v2707_v11  ;;  %2798 = vmatpush.bf16.msrb.mxu2 %v2719_v58  ;;  %vm4639_vm8 = vmmov %vm4616_vm0 }
 0x915   : > { %2778 = vmatpush.bf16.msrb.mxu1 %v2705_v46  ;;  %2799 = vmatpush.bf16.msrb.mxu2 %v2717_v52  ;;  %v3187_v46 = vld [vmem:[%s4575_s7 + $0x28] sm:$0xf0] }
 0x916   : > { %v2672_v59 = vpop.permute.xlu2 %2671 }
 0x917   : > { %v2618_v32 = vpop.permute.xlu0 %2617  ;;  %v2624_v55 = vpop.permute.xlu1 %2623 }
 0x918   : > { %v2708_v10 = vsel %vm4629_vm1, %v2622_v50, %v2624_v55  ;;  %v2706_v31 = vsel %vm4616_vm0, %v4390_v63, %v2618_v32  ;;  %v2697_v63 = vsel %vm4634_vm5, %v4290_v34, %v4284_v56  ;;  %v3185_v34 = vld [vmem:[%s4575_s7 + $0x1c] sm:$0xf]  ;;  %v1934_v50 = vld [vmem:[%s4572_s4] sm:$0xff]  ;;  %vm4644_vm1 = vmmov %vm4616_vm0  ;;  %vm4649_vm5 = vcmask 261120  }
 0x919   : > { %2779 = vmatpush.bf16.msrb.mxu1 %v2703_v36  ;;  %2800 = vmatpush.bf16.msrb.mxu2 %v2715_v17  ;;  %v3156_v40 = vor.u32 %v3185_v34, %v3153_v29  ;;  %vm4650_vm6 = vmmov %vm4649_vm5  ;;  %v2526_v34 = vld [vmem:[%s3449_s16 + $0x18] sm:$0xff] }
 0x91a   : > { %2834 = vmatpush.bf16.msrb.mxu0 %v2708_v10  ;;  %2533 = vperm.xlu1 %3265, %v1934_v50   ;;  %vm4652_vm13 = vmmov %vm4649_vm5 }
 0x91d   : > { %2780 = vmatpush.bf16.msrb.mxu1 %v2701_v60  ;;  %2801 = vmatpush.bf16.msrb.mxu2 %v2713_v57  ;;  %v2523_v57 = vld [vmem:[%s3449_s16] sm:$0xff] }
 0x91e   : > { %2835 = vmatpush.bf16.msrb.mxu0 %v2706_v31  ;;  %v4448_v1 = vpop.permute.xlu2 %2685 }
 0x91f   : > { %v2692_v20 = vpop.permute.xlu0 %2691  ;;  %v2666_v2 = vpop.permute.xlu1 %2665 }
 0x920   : > { %2802 = vmatmul.bf16.vlgmr.msrb.gmra.mxu2 %v4450_v3 }
 0x921   : > { %2781 = vmatpush.bf16.msrb.mxu1 %v2699_v37 }
 0x922   : > { %2836 = vmatpush.bf16.msrb.mxu0 %v2704_v54  ;;  %2548 = vperm.xlu1 %3265, %v1937_v7  }
 0x925   : > { %2782 = vmatpush.bf16.msrb.mxu1 %v2697_v63  ;;  %v2525_v63 = vld [vmem:[%s3449_s16 + $0x10] sm:$0xff] }
 0x926   : > { %v2696_v13 = vpop.permute.xlu2 %2695 }
 0x927   : > { %v2600_v12 = vpop.permute.xlu0 %2599  ;;  %v2606_v28 = vpop.permute.xlu1 %2605 }
 0x928   : > { %v2702_v61 = vsel %vm4636_vm9, %v4360_v38, %v2606_v28  ;;  %2783 = vmatmul.bf16.vlgmr.msrb.gmra.mxu1 %v3140_v62  ;;  %v2700_v48 = vsel %vm4638_vm2, %v4367_v15, %v2600_v12  ;;  %v2724_v38 = vsel %vm4639_vm8, %v4406_v42, %v2672_v59  ;;  %v2722_v15 = vsel %vm4641_vm10, %v4381_v33, %v2666_v2  ;;  %v3151_v42 = vld [vmem:[%s4575_s7 + $0x18] sm:$0xf]  ;;  %v1935_v33 = vld [vmem:[%s4572_s4 + $0x8] sm:$0xff]  ;;  %vm4651_vm9 = vmmov %vm4649_vm5 }
 0x929   : > { %2851 = vmatpush.bf16.msra.mxu1 %v2728_v14  ;;  %2837 = vmatpush.bf16.msrb.mxu0 %v2702_v61  ;;  %v3152_v23 = vor.u32 %v3186_v5, %v3151_v42 }
 0x92a   : > { %2538 = vperm.xlu2 %3266, %v1935_v33  }
 0x92d   : > { %2852 = vmatpush.bf16.msra.mxu1 %v2726_v49  ;;  %2838 = vmatpush.bf16.msrb.mxu0 %v2700_v48 }
 0x92e   : > { %v2594_v45 = vpop.permute.xlu2 %2593 }
 0x92f   : > { %v2660_v0 = vpop.permute.xlu0 %2659  ;;  %v2648_v41 = vpop.permute.xlu1 %2647  ;;  %v2698_v27 = vsel %vm4640_vm4, %v4284_v56, %v2594_v45  ;;  %v1936_v56 = vld [vmem:[%s4572_s4 + $0x10] sm:$0xff] }
 0x930   : > { %2807 = vmatmul.bf16.gmra.mxu2 %v3156_v40  ;;  %2543 = vperm.xlu0 %3267, %v1936_v56   ;;  %v2720_v22 = vsel %vm4642_vm12, %v4420_v53, %v2660_v0  ;;  %v3148_v53 = vor.u32 %v3184_v35, %v3147_v18  ;;  %v2716_v21 = vsel %vm4616_vm0, %v4400_v51, %v2648_v41  ;;  %v3159_v51 = vld [vmem:[%s4575_s7 + $0x20] sm:$0xf]  ;;  %v2529_v18 = vld [vmem:[%s3449_s16 + $0x30] sm:$0xff] }
 0x931   : > { %2853 = vmatpush.bf16.msra.mxu1 %v2724_v38  ;;  %2839 = vmatpush.bf16.msrb.mxu0 %v2698_v27  ;;  %v3160_v52 = vor.u32 %v3187_v46, %v3159_v51  ;;  %v2527_v41 = vld [vmem:[%s3449_s16 + $0x20] sm:$0xff] }
 0x934   : > { %2840 = vmatmul.bf16.vlgmr.msrb.gmra.mxu0 %v3140_v62 }
 0x935   : > { %2854 = vmatpush.bf16.msra.mxu1 %v2722_v15 }
 0x937   : > { %v2688_v19 = vpop.permute.xlu0 %2687  ;;  %v2694_v44 = vpop.permute.xlu1 %2693 }
 0x938   : > { %v2731_v24 = vsel %vm4643_vm15, %v2692_v20, %v2694_v44  ;;  %v2732_v25 = vsel %vm4644_vm1, %v2694_v44, %v2696_v13  ;;  %2788 = vmatmul.bf16.gmra.mxu1 %v3152_v23  ;;  %v2729_v47 = vsel %vm4646_vm14, %v4448_v1, %v2688_v19  ;;  %v2524_v20 = vld [vmem:[%s3449_s16 + $0x8] sm:$0xff] }
 0x939   : > { %2855 = vmatpush.bf16.msra.mxu1 %v2720_v22  ;;  %2819 = vmatpush.bf16.msra.mxu3 %v2731_v24 }
 0x93a   : > { %2876 = vmatpush.bf16.msra.mxu2 %v2732_v25 }
 0x93d   : > { %2856 = vmatpush.bf16.msra.mxu1 %v2718_v43  ;;  %2820 = vmatpush.bf16.msra.mxu3 %v2729_v47 }
 0x93f   : > { %v2642_v26 = vpop.permute.xlu0 %2641  ;;  %v2690_v39 = vpop.permute.xlu1 %2689 }
 0x940   : > { %v2730_v11 = vsel %vm4647_vm11, %v2688_v19, %v2690_v39  ;;  %v2714_v58 = vsel %vm4648_vm3, %v4371_v16, %v2642_v26  ;;  %3161 = vmatmul.msk.bf16.vlgmr.msra.gmra.mxu3 %vm4649_vm5, %v3148_v53 }
 0x941   : > { %2857 = vmatpush.bf16.msra.mxu1 %v2716_v21  ;;  %2877 = vmatpush.bf16.msra.mxu2 %v2730_v11  ;;  %v2530_v11 = vld [vmem:[%s3449_s16 + $0x38] sm:$0xff] }
 0x944   : > { %3163 = vmatmul.msk.bf16.vlgmr.msra.gmra.mxu2 %vm4650_vm6, %v3148_v53  ;;  %2845 = vmatmul.bf16.gmra.mxu0 %v3152_v23  ;;  %v2528_v23 = vld [vmem:[%s3449_s16 + $0x28] sm:$0xff] }
 0x945   : > { %2858 = vmatpush.bf16.msra.mxu1 %v2714_v58 }
 0x948   : > { %2859 = vmatmul.bf16.vlgmr.msra.gmra.mxu1 %v4450_v3 }
 0x950   : > { %3162 = vmatmul.msk.bf16.gmra.mxu3 %vm4651_vm9, %v3160_v52 }
 0x954   : > { %3164 = vmatmul.msk.bf16.gmra.mxu2 %vm4652_vm13, %v3160_v52 }
 0x958   : > { %2864 = vmatmul.bf16.gmra.mxu1 %v3156_v40 }
 0x984   : > { %v2539_v62 = vpop.permute.xlu2 %2538 }
 0x985   : > { %v2553_v61 = vadd.f32 %v2539_v62, %v2525_v63  ;;  %v2554_v38 = vadd.f32 %v2539_v62, %v2526_v34 }
 0x98c   : > { %v2534_v60 = vpop.permute.xlu1 %2533 }
 0x98d   : > { %v2551_v1 = vadd.f32 %v2534_v60, %v2523_v57  ;;  %v2552_v54 = vadd.f32 %v2534_v60, %v2524_v20 }
 0x994   : > { %v2549_v35 = vpop.permute.xlu1 %2548 }
 0x995   : > { %v2557_v39 = vadd.f32 %v2549_v35, %v2529_v18 }
 0x9a2   : > { %v2544_v27 = vpop.permute.xlu0 %2543 }
 0x9a3   : > { %v2803_v16 = vpop.f32.mrf.mxu2  ;;  %v2555_v5 = vadd.f32 %v2544_v27, %v2527_v41  ;;  %v2556_v44 = vadd.f32 %v2544_v27, %v2528_v23 }
 0x9a5   : > { %v2784_v59 = vpop.f32.mrf.mxu1 }
 0x9a6   : > { %v2804_v9 = vadd.f32 %v2803_v16, %v2784_v59  ;;  %v2558_v59 = vadd.f32 %v2549_v35, %v2530_v11 }
 0x9ab   : > { %v2805_v32 = vpop.f32.mrf.mxu2 }
 0x9ad   : > { %v2786_v55 = vpop.f32.mrf.mxu1 }
 0x9ae   : > { %v2806_v28 = vadd.f32 %v2805_v32, %v2786_v55 }
 0x9b1   : > { %v2841_v4 = vpop.f32.mrf.mxu0 }
 0x9b3   : > { %v2808_v17 = vpop.f32.mrf.mxu2 }
 0x9b5   : > { %v2789_v36 = vpop.f32.mrf.mxu1 }
 0x9b6   : > { %v2809_v42 = vadd.f32 %v2808_v17, %v2789_v36 }
 0x9b9   : > { %v2843_v12 = vpop.f32.mrf.mxu0 }
 0x9bb   : > { %v2810_v31 = vpop.f32.mrf.mxu2 }
 0x9bd   : > { %v2791_v10 = vpop.f32.mrf.mxu1 }
 0x9be   : > { %v2811_v47 = vadd.f32 %v2810_v31, %v2791_v10 }
 0x9c1   : > { %v2846_v33 = vpop.f32.mrf.mxu0 }
 0x9c3   : > { %v2822_v3 = vpop.f32.mrf.mxu3 }
 0x9c4   : > { %v2823_v2 = vadd.f32 %v2822_v3, %v2804_v9 }
 0x9c5   : > { %v2860_v37 = vpop.f32.mrf.mxu1 }
 0x9c6   : > { %v2889_v6 = vadd.f32 %v2823_v2, %v2551_v1  ;;  %v2861_v8 = vadd.f32 %v2860_v37, %v2841_v4 }
 0x9c7   : > { %v2879_v14 = vpop.f32.mrf.mxu2 }
 0x9c8   : > { %2897 = vst [vmem:[%s4543_s19] sm:$0xff] %v2889_v6  ;;  %v2880_v13 = vadd.f32 %v2879_v14, %v2861_v8 }
 0x9c9   : > { %v2848_v58 = vpop.f32.mrf.mxu0 }
 0x9ca   : > { %v2890_v49 = vadd.f32 %v2880_v13, %v2552_v54 }
 0x9cb   : > { %v2824_v29 = vpop.f32.mrf.mxu3 }
 0x9cc   : > { %v2825_v48 = vadd.f32 %v2824_v29, %v2806_v28  ;;  %2898 = vst [vmem:[%s4543_s19 + $0x8] sm:$0xff] %v2890_v49 }
 0x9cd   : > { %v2862_v40 = vpop.f32.mrf.mxu1 }
 0x9ce   : > { %v2891_v45 = vadd.f32 %v2825_v48, %v2553_v61  ;;  %v2863_v0 = vadd.f32 %v2862_v40, %v2843_v12 }
 0x9cf   : > { %v2881_v50 = vpop.f32.mrf.mxu2 }
 0x9d0   : > { %2899 = vst [vmem:[%s4543_s19 + $0x10] sm:$0xff] %v2891_v45  ;;  %v2882_v15 = vadd.f32 %v2881_v50, %v2863_v0 }
 0x9d2   : > { %v2892_v30 = vadd.f32 %v2882_v15, %v2554_v38 }
 0x9d3   : > { %v2827_v56 = vpop.f32.mrf.mxu3 }
 0x9d4   : > { %v2828_v22 = vadd.f32 %v2827_v56, %v2809_v42  ;;  %2900 = vst [vmem:[%s4543_s19 + $0x18] sm:$0xff] %v2892_v30 }
 0x9d5   : > { %v2865_v19 = vpop.f32.mrf.mxu1 }
 0x9d6   : > { %v2893_v7 = vadd.f32 %v2828_v22, %v2555_v5  ;;  %v2866_v24 = vadd.f32 %v2865_v19, %v2846_v33 }
 0x9d7   : > { %v2884_v25 = vpop.f32.mrf.mxu2 }
 0x9d8   : > { %2901 = vst [vmem:[%s4543_s19 + $0x20] sm:$0xff] %v2893_v7  ;;  %v2885_v43 = vadd.f32 %v2884_v25, %v2866_v24 }
 0x9da   : > { %v2894_v53 = vadd.f32 %v2885_v43, %v2556_v44 }
 0x9db   : > { %v2829_v21 = vpop.f32.mrf.mxu3 }
 0x9dc   : > { %v2830_v26 = vadd.f32 %v2829_v21, %v2811_v47  ;;  %2902 = vst [vmem:[%s4543_s19 + $0x28] sm:$0xff] %v2894_v53 }
 0x9dd   : > { %v2867_v51 = vpop.f32.mrf.mxu1 }
 0x9de   : > { %v2895_v46 = vadd.f32 %v2830_v26, %v2557_v39  ;;  %v2868_v52 = vadd.f32 %v2867_v51, %v2848_v58 }
 0x9df   : > { %v2886_v16 = vpop.f32.mrf.mxu2 }
 0x9e0   : > { %2903 = vst [vmem:[%s4543_s19 + $0x30] sm:$0xff] %v2895_v46  ;;  %v2887_v32 = vadd.f32 %v2886_v16, %v2868_v52 }
 0x9e2   : > { %v2896_v55 = vadd.f32 %v2887_v32, %v2558_v59 }
 0x9e4   : > { %2904 = vst [vmem:[%s4543_s19 + $0x38] sm:$0xff] %v2896_v55 }
 0x9e5 PF: > { %s18_s29 = sadd.s32 1, %s3347_s29   ;;  %s4653_s27 = smov %s3343_s28 }
 0x9e6   : > { %p15_p5 = scmp.ge.s32.totalorder %s18_s29, 4   ;;  %s4654_s28 = smov %s4656_s30 }
 0x9e8   :  { %17 = sbr.rel (!%p15_p5) target bundleno = 2 (0x2), region = 95 }

</bundles_post_ra>
